<compile_context>
chip_gen: v7x
topology: tpu7x:2x2x1
jax: 0.10.0
libtpu: 0.0.40
codegen_flags: <defaults>
</compile_context>

<pallas_src>
import functools
import math

import jax
import jax.numpy as jnp
from jax.experimental import pallas as pl
from jax.experimental.pallas import tpu as pltpu

BN_EPS = 1e-5
EMB_DIM = 768
STATE_DIM = 128
NUM_HEADS = 2
HEAD_DIM = STATE_DIM // NUM_HEADS
LANE = 128
SUBLANE = 8
NUM_BRANCHES = 2


# ----------------------------------------------------------------------------
# Fused kernel: grid=(2,) over branch; attention + final head as epilogue on the
# last grid step using the states accumulated in VMEM scratch.
# ----------------------------------------------------------------------------
def _fused_kernel(n_real,
                  x_ref, emb_ref, w1_ref, b1_ref, w2_ref, b2_ref,
                  w3_ref, b3_ref, wp_ref, bp_ref,
                  wq_ref, bq_ref, wk_ref, bk_ref, wv_ref, bv_ref,
                  wo_ref, bo_ref, wf_ref, bf_ref,
                  logit_ref, final_ref, state_sc):
    b = pl.program_id(0)

    # ---- branch b (b=0: reward, b=1: punish) --------------------------------
    x = x_ref[...]                                                   # [PAD_N,768] bf16
    # torch.matmul(multimodal_features, embedding)
    r = jnp.dot(x, emb_ref[0], preferred_element_type=jnp.float32)   # [PAD_N,768] f32

    # Linear(768,512) + ReLU   (BatchNorm1d(512) eval-mode folded into w2/b2)
    h = jnp.dot(r.astype(jnp.bfloat16), w1_ref[0],
                preferred_element_type=jnp.float32) + b1_ref[0]
    h = jnp.maximum(h, 0.0)

    # Linear(512,256) + ReLU   (BatchNorm1d(256) eval-mode folded into w3/b3)
    h = jnp.dot(h.astype(jnp.bfloat16), w2_ref[0],
                preferred_element_type=jnp.float32) + b2_ref[0]
    h = jnp.maximum(h, 0.0)

    # Dropout(p=0.5) is identity in eval mode.
    # TODO(synk): training-mode stochastic dropout / batch-stat BN not implemented.

    # Linear(256,128) -> state ; predict Linear(128,2) (lane-padded to 128 cols)
    state = jnp.dot(h.astype(jnp.bfloat16), w3_ref[0],
                    preferred_element_type=jnp.float32) + b3_ref[0]
    state_sc[b] = state
    logit_ref[0] = jnp.dot(state.astype(jnp.bfloat16), wp_ref[0],
                           preferred_element_type=jnp.float32) + bp_ref[0]

    # ---- epilogue on last branch: 2-head self-attn + mean-pool + ReLU + final
    @pl.when(b == pl.num_programs(0) - 1)
    def _():
        fused = jnp.concatenate(
            [state_sc[0, :n_real, :], state_sc[1, :n_real, :]], axis=0)  # [2N,128] f32
        xb = fused.astype(jnp.bfloat16)
        q = jnp.dot(xb, wq_ref[...], preferred_element_type=jnp.float32) + bq_ref[...]
        k = jnp.dot(xb, wk_ref[...], preferred_element_type=jnp.float32) + bk_ref[...]
        v = jnp.dot(xb, wv_ref[...], preferred_element_type=jnp.float32) + bv_ref[...]

        scale = 1.0 / math.sqrt(HEAD_DIM)
        heads = []
        for hh in range(NUM_HEADS):                                   # static unroll
            sl = slice(hh * HEAD_DIM, (hh + 1) * HEAD_DIM)
            qh, kh, vh = q[:, sl], k[:, sl], v[:, sl]
            s = jnp.dot(qh, kh.T, preferred_element_type=jnp.float32) * scale
            s = s - jnp.max(s, axis=-1, keepdims=True)
            p = jnp.exp(s)
            inv = pl.reciprocal(jnp.sum(p, axis=-1, keepdims=True), approx=True)
            heads.append(jnp.dot(p * inv, vh, preferred_element_type=jnp.float32))
        attn = jnp.concatenate(heads, axis=-1)                        # [2N,128]
        attn = jnp.dot(attn.astype(jnp.bfloat16), wo_ref[...],
                       preferred_element_type=jnp.float32) + bo_ref[...]

        pooled = jnp.mean(attn, axis=0, keepdims=True)                # mean over dim 0
        act = jnp.maximum(pooled, 0.0)                                # final: ReLU
        final_ref[...] = jnp.dot(act.astype(jnp.bfloat16), wf_ref[...],
                                 preferred_element_type=jnp.float32) + bf_ref[...]


# ----------------------------------------------------------------------------
# Wrapper: BN folding, lane/sublane padding, branch stacking, bf16 casts.
# ----------------------------------------------------------------------------
def _fold_bn_into_linear(w, bias, bn):
    """Eval-mode BN (after ReLU) is affine y = h*s + c; fold into the next Linear."""
    gamma, beta, mean, var = bn[0], bn[1], bn[2], bn[3]
    s = gamma * jax.lax.rsqrt(var + BN_EPS)
    c = beta - mean * s
    w_f = s[:, None] * w
    b_f = bias + (c @ w)[None, :]
    return w_f, b_f


def _prep_branch(p):
    w2f, b2f = _fold_bn_into_linear(p["w2"], p["b2"], p["bn1"])
    w3f, b3f = _fold_bn_into_linear(p["w3"], p["b3"], p["bn2"])
    wp_pad = jnp.zeros((STATE_DIM, LANE), jnp.float32).at[:, :2].set(p["wp"])
    bp_pad = jnp.zeros((1, LANE), jnp.float32).at[:, :2].set(p["bp"])
    return dict(w1=p["w1"], b1=p["b1"], w2=w2f, b2=b2f, w3=w3f, b3=b3f,
                wp=wp_pad, bp=bp_pad)


def reward_punish_forward(features, reward_emb, punish_emb,
                          reward_p, punish_p, attn_p, num_classes):
    assert num_classes <= LANE
    n = features.shape[0]
    pad_n = max(SUBLANE, pl.cdiv(n, SUBLANE) * SUBLANE)

    # Sublane-pad the batch and cast matmul operands to bf16.
    x = (jnp.zeros((pad_n, EMB_DIM), jnp.float32).at[:n].set(features)
         .astype(jnp.bfloat16))
    emb = jnp.stack([reward_emb, punish_emb]).astype(jnp.bfloat16)    # [2,768,768]

    rp, pp = _prep_branch(reward_p), _prep_branch(punish_p)
    def stk(name, bf16):
        a = jnp.stack([rp[name], pp[name]])
        return a.astype(jnp.bfloat16) if bf16 else a
    w1, w2, w3, wp = (stk(k, True) for k in ("w1", "w2", "w3", "wp"))
    b1, b2, b3, bp = (stk(k, False) for k in ("b1", "b2", "b3", "bp"))

    wq, wk, wv, wo = (attn_p[k].astype(jnp.bfloat16) for k in ("wq", "wk", "wv", "wo"))
    bq, bk_, bv, bo = attn_p["bq"], attn_p["bk"], attn_p["bv"], attn_p["bo"]
    wf = (jnp.zeros((STATE_DIM, LANE), jnp.float32)
          .at[:, :num_classes].set(attn_p["wf"]).astype(jnp.bfloat16))
    bf = jnp.zeros((1, LANE), jnp.float32).at[:, :num_classes].set(attn_p["bf"])

    def _branch_spec(shape):                 # branch-stacked param, 1 branch per step
        return pl.BlockSpec((1,) + shape, lambda b: (b, 0, 0))

    def _shared_spec(shape):                 # same block every step (loaded once)
        nd = len(shape)
        return pl.BlockSpec(shape, lambda b, nd=nd: (0,) * nd)

    in_specs = [
        _shared_spec((pad_n, EMB_DIM)),                               # x
        _branch_spec((EMB_DIM, EMB_DIM)),                             # emb
        _branch_spec((EMB_DIM, 512)), _branch_spec((1, 512)),         # w1, b1
        _branch_spec((512, 256)),     _branch_spec((1, 256)),         # w2, b2
        _branch_spec((256, STATE_DIM)), _branch_spec((1, STATE_DIM)), # w3, b3
        _branch_spec((STATE_DIM, LANE)), _branch_spec((1, LANE)),     # wp, bp
        _shared_spec((STATE_DIM, STATE_DIM)), _shared_spec((1, STATE_DIM)),  # wq, bq
        _shared_spec((STATE_DIM, STATE_DIM)), _shared_spec((1, STATE_DIM)),  # wk, bk
        _shared_spec((STATE_DIM, STATE_DIM)), _shared_spec((1, STATE_DIM)),  # wv, bv
        _shared_spec((STATE_DIM, STATE_DIM)), _shared_spec((1, STATE_DIM)),  # wo, bo
        _shared_spec((STATE_DIM, LANE)), _shared_spec((1, LANE)),            # wf, bf
    ]
    out_specs = (
        pl.BlockSpec((1, pad_n, LANE), lambda b: (b, 0, 0)),          # per-branch logits
        pl.BlockSpec((1, LANE), lambda b: (0, 0)),                    # final pred (resident)
    )
    out_shape = (
        jax.ShapeDtypeStruct((NUM_BRANCHES, pad_n, LANE), jnp.float32),
        jax.ShapeDtypeStruct((1, LANE), jnp.float32),
    )

    logits, final_pad = pl.pallas_call(
        functools.partial(_fused_kernel, n),
        out_shape=out_shape,
        grid_spec=pltpu.PrefetchScalarGridSpec(
            num_scalar_prefetch=0,
            grid=(NUM_BRANCHES,),
            in_specs=in_specs,
            out_specs=out_specs,
            scratch_shapes=[pltpu.VMEM((NUM_BRANCHES, pad_n, STATE_DIM), jnp.float32)],
        ),
        compiler_params=pltpu.CompilerParams(
            # Must be sequential: the attention epilogue on the last step reads both
            # branch states from this core's VMEM scratch.
            # TODO(synk): a v7x 2-TC variant would split branches across cores and do
            # the fusion in a second call.
            dimension_semantics=("arbitrary",),
        ),
    )(x, emb, w1, b1, w2, b2, w3, b3, wp, bp,
      wq, bq, wk, bk_, wv, bv, wo, bo, wf, bf)

    reward_logit = logits[0, :n, :2]
    punish_logit = logits[1, :n, :2]
    final_pred = final_pad[0, :num_classes]
    return final_pred, reward_logit, punish_logit


# ----------------------------------------------------------------------------
# Deterministic parameter init (synthetic; shapes match the PyTorch module).
# ----------------------------------------------------------------------------
def _nrm(key, shape, scale=0.02):
    return (scale * jax.random.normal(key, shape)).astype(jnp.float32)


def init_branch_params(key):
    ks = jax.random.split(key, 12)
    def bn(k, d):
        kg, kb, km, kv = jax.random.split(k, 4)
        gamma = 1.0 + 0.1 * jax.random.normal(kg, (d,))
        beta = 0.1 * jax.random.normal(kb, (d,))
        mean = 0.1 * jax.random.normal(km, (d,))
        var = 1.0 + 0.1 * jnp.abs(jax.random.normal(kv, (d,)))
        return jnp.stack([gamma, beta, mean, var], axis=0).astype(jnp.float32)
    return dict(
        w1=_nrm(ks[0], (768, 512)), b1=_nrm(ks[1], (1, 512)), bn1=bn(ks[2], 512),
        w2=_nrm(ks[3], (512, 256)), b2=_nrm(ks[4], (1, 256)), bn2=bn(ks[5], 256),
        w3=_nrm(ks[6], (256, 128)), b3=_nrm(ks[7], (1, 128)),
        wp=_nrm(ks[8], (128, 2)),   bp=_nrm(ks[9], (1, 2)),
    )


def init_attn_params(key, num_classes):
    ks = jax.random.split(key, 11)
    return dict(
        wq=_nrm(ks[0], (128, 128)), wk=_nrm(ks[1], (128, 128)), wv=_nrm(ks[2], (128, 128)),
        bq=_nrm(ks[3], (1, 128)),   bk=_nrm(ks[4], (1, 128)),   bv=_nrm(ks[5], (1, 128)),
        wo=_nrm(ks[6], (128, 128)), bo=_nrm(ks[7], (1, 128)),
        wf=_nrm(ks[8], (128, num_classes)), bf=_nrm(ks[9], (1, num_classes)),
    )


# ----------------------------------------------------------------------------
# Pure-JAX f32 reference (BN unfused, unpadded) — validates BN folding + bf16 path.
# ----------------------------------------------------------------------------
def branch_ref(x, emb, p):
    r = x @ emb
    h = jnp.maximum(r @ p["w1"] + p["b1"], 0.0)
    g, be, m, v = p["bn1"][0], p["bn1"][1], p["bn1"][2], p["bn1"][3]
    h = (h - m) * g / jnp.sqrt(v + BN_EPS) + be
    h = jnp.maximum(h @ p["w2"] + p["b2"], 0.0)
    g, be, m, v = p["bn2"][0], p["bn2"][1], p["bn2"][2], p["bn2"][3]
    h = (h - m) * g / jnp.sqrt(v + BN_EPS) + be
    state = h @ p["w3"] + p["b3"]
    return state, state @ p["wp"] + p["bp"]


def attn_final_ref(x, p):
    q = x @ p["wq"] + p["bq"]
    k = x @ p["wk"] + p["bk"]
    v = x @ p["wv"] + p["bv"]
    scale = 1.0 / math.sqrt(HEAD_DIM)
    outs = []
    for h in range(NUM_HEADS):
        sl = slice(h * HEAD_DIM, (h + 1) * HEAD_DIM)
        s = (q[:, sl] @ k[:, sl].T) * scale
        outs.append(jax.nn.softmax(s, axis=-1) @ v[:, sl])
    attn = jnp.concatenate(outs, axis=-1) @ p["wo"] + p["bo"]
    pooled = attn.mean(axis=0)
    return jnp.maximum(pooled, 0.0) @ p["wf"] + p["bf"][0]


# ----------------------------------------------------------------------------
if __name__ == "__main__":
    N = 4            # batch of multimodal feature vectors
    NUM_CLASSES = 8

    key = jax.random.PRNGKey(0)
    k_feat, k_remb, k_pemb, k_rp, k_pp, k_attn = jax.random.split(key, 6)

    # Synthetic stand-in for VLM (BLIP2) multimodal features.
    features = jax.random.normal(k_feat, (N, EMB_DIM), dtype=jnp.float32)
    reward_embedding = _nrm(k_remb, (EMB_DIM, EMB_DIM))
    punish_embedding = _nrm(k_pemb, (EMB_DIM, EMB_DIM))
    reward_params = init_branch_params(k_rp)
    punish_params = init_branch_params(k_pp)
    attn_params = init_attn_params(k_attn, NUM_CLASSES)

    # --- fused Pallas forward ---
    final_pred, reward_logit, punish_logit = reward_punish_forward(
        features, reward_embedding, punish_embedding,
        reward_params, punish_params, attn_params, NUM_CLASSES)
    final_pred, reward_logit, punish_logit = jax.block_until_ready(
        (final_pred, reward_logit, punish_logit))

    # --- f32 reference check (tolerance loosened for bf16 matmul operands) ---
    r_state_ref, r_logit_ref = branch_ref(features, reward_embedding, reward_params)
    p_state_ref, p_logit_ref = branch_ref(features, punish_embedding, punish_params)
    fused_ref = jnp.concatenate([r_state_ref, p_state_ref], axis=0)
    final_ref = attn_final_ref(fused_ref, attn_params)

    TOL = dict(rtol=2e-2, atol=2e-2)
    assert final_pred.shape == (NUM_CLASSES,)
    assert reward_logit.shape == (N, 2) and punish_logit.shape == (N, 2)
    assert jnp.allclose(reward_logit, r_logit_ref, **TOL)
    assert jnp.allclose(punish_logit, p_logit_ref, **TOL)
    assert jnp.allclose(final_pred, final_ref, **TOL)

    print("KERNEL_OK")
</pallas_src>

<mosaic_0001>
module attributes {stable_mosaic.version = 11 : i64} {
  func.func @_fused_kernel(%arg0: i32, %arg1: memref<8x768xbf16, #tpu.memory_space<vmem>>, %arg2: memref<1x768x768xbf16, #tpu.memory_space<vmem>>, %arg3: memref<1x768x512xbf16, #tpu.memory_space<vmem>>, %arg4: memref<1x1x512xf32, #tpu.memory_space<vmem>>, %arg5: memref<1x512x256xbf16, #tpu.memory_space<vmem>>, %arg6: memref<1x1x256xf32, #tpu.memory_space<vmem>>, %arg7: memref<1x256x128xbf16, #tpu.memory_space<vmem>>, %arg8: memref<1x1x128xf32, #tpu.memory_space<vmem>>, %arg9: memref<1x128x128xbf16, #tpu.memory_space<vmem>>, %arg10: memref<1x1x128xf32, #tpu.memory_space<vmem>>, %arg11: memref<128x128xbf16, #tpu.memory_space<vmem>>, %arg12: memref<1x128xf32, #tpu.memory_space<vmem>>, %arg13: memref<128x128xbf16, #tpu.memory_space<vmem>>, %arg14: memref<1x128xf32, #tpu.memory_space<vmem>>, %arg15: memref<128x128xbf16, #tpu.memory_space<vmem>>, %arg16: memref<1x128xf32, #tpu.memory_space<vmem>>, %arg17: memref<128x128xbf16, #tpu.memory_space<vmem>>, %arg18: memref<1x128xf32, #tpu.memory_space<vmem>>, %arg19: memref<128x128xbf16, #tpu.memory_space<vmem>>, %arg20: memref<1x128xf32, #tpu.memory_space<vmem>>, %arg21: memref<1x8x128xf32, #tpu.memory_space<vmem>>, %arg22: memref<1x128xf32, #tpu.memory_space<vmem>>, %arg23: memref<2x8x128xf32, #tpu.memory_space<vmem>>) attributes {dimension_semantics = [#tpu.dimension_semantics<arbitrary>], iteration_bounds = array<i64: 2>, scalar_prefetch = 0 : i64, scratch_operands = 1 : i64, tpu.core_type = #tpu.core_type<tc>, window_params = [{pipeline_mode = #tpu.pipeline_mode<synchronous>, transform_indices = @transform_0, window_bounds = array<i64: 8, 768>}, {transform_indices = @transform_1, window_bounds = array<i64: 1, 768, 768>}, {transform_indices = @transform_2, window_bounds = array<i64: 1, 768, 512>}, {transform_indices = @transform_3, window_bounds = array<i64: 1, 1, 512>}, {transform_indices = @transform_4, window_bounds = array<i64: 1, 512, 256>}, {transform_indices = @transform_5, window_bounds = array<i64: 1, 1, 256>}, {transform_indices = @transform_6, window_bounds = array<i64: 1, 256, 128>}, {transform_indices = @transform_7, window_bounds = array<i64: 1, 1, 128>}, {transform_indices = @transform_8, window_bounds = array<i64: 1, 128, 128>}, {transform_indices = @transform_9, window_bounds = array<i64: 1, 1, 128>}, {pipeline_mode = #tpu.pipeline_mode<synchronous>, transform_indices = @transform_10, window_bounds = array<i64: 128, 128>}, {pipeline_mode = #tpu.pipeline_mode<synchronous>, transform_indices = @transform_11, window_bounds = array<i64: 1, 128>}, {pipeline_mode = #tpu.pipeline_mode<synchronous>, transform_indices = @transform_12, window_bounds = array<i64: 128, 128>}, {pipeline_mode = #tpu.pipeline_mode<synchronous>, transform_indices = @transform_13, window_bounds = array<i64: 1, 128>}, {pipeline_mode = #tpu.pipeline_mode<synchronous>, transform_indices = @transform_14, window_bounds = array<i64: 128, 128>}, {pipeline_mode = #tpu.pipeline_mode<synchronous>, transform_indices = @transform_15, window_bounds = array<i64: 1, 128>}, {pipeline_mode = #tpu.pipeline_mode<synchronous>, transform_indices = @transform_16, window_bounds = array<i64: 128, 128>}, {pipeline_mode = #tpu.pipeline_mode<synchronous>, transform_indices = @transform_17, window_bounds = array<i64: 1, 128>}, {pipeline_mode = #tpu.pipeline_mode<synchronous>, transform_indices = @transform_18, window_bounds = array<i64: 128, 128>}, {pipeline_mode = #tpu.pipeline_mode<synchronous>, transform_indices = @transform_19, window_bounds = array<i64: 1, 128>}, {transform_indices = @transform_20, window_bounds = array<i64: 1, 8, 128>}, {pipeline_mode = #tpu.pipeline_mode<synchronous>, transform_indices = @transform_21, window_bounds = array<i64: 1, 128>}]} {
    %c0 = arith.constant 0 : index
    %c0_0 = arith.constant 0 : index
    %0 = vector.load %arg1[%c0, %c0_0] : memref<8x768xbf16, #tpu.memory_space<vmem>>, vector<8x768xbf16>
    %c0_1 = arith.constant 0 : index
    %c0_2 = arith.constant 0 : index
    %c0_3 = arith.constant 0 : index
    %1 = vector.load %arg2[%c0_1, %c0_2, %c0_3] : memref<1x768x768xbf16, #tpu.memory_space<vmem>>, vector<1x768x768xbf16>
    %2 = vector.shape_cast %1 : vector<1x768x768xbf16> to vector<768x768xbf16>
    %cst = arith.constant dense<0.000000e+00> : vector<8x768xf32>
    %3 = tpu.matmul %0, %2, %cst {dimension_numbers = #tpu.dot_dimension_numbers<[1], [0], [0], [1], [0, 0, 1, 1], [], []>} : vector<8x768xbf16>, vector<768x768xbf16>, vector<8x768xf32> -> vector<8x768xf32>
    %4 = arith.truncf %3 : vector<8x768xf32> to vector<8x768xbf16>
    %c0_4 = arith.constant 0 : index
    %c0_5 = arith.constant 0 : index
    %c0_6 = arith.constant 0 : index
    %5 = vector.load %arg3[%c0_4, %c0_5, %c0_6] : memref<1x768x512xbf16, #tpu.memory_space<vmem>>, vector<1x768x512xbf16>
    %6 = vector.shape_cast %5 : vector<1x768x512xbf16> to vector<768x512xbf16>
    %cst_7 = arith.constant dense<0.000000e+00> : vector<8x512xf32>
    %7 = tpu.matmul %4, %6, %cst_7 {dimension_numbers = #tpu.dot_dimension_numbers<[1], [0], [0], [1], [0, 0, 1, 1], [], []>} : vector<8x768xbf16>, vector<768x512xbf16>, vector<8x512xf32> -> vector<8x512xf32>
    %c0_8 = arith.constant 0 : index
    %c0_9 = arith.constant 0 : index
    %c0_10 = arith.constant 0 : index
    %8 = vector.load %arg4[%c0_8, %c0_9, %c0_10] : memref<1x1x512xf32, #tpu.memory_space<vmem>>, vector<1x1x512xf32>
    %9 = vector.shape_cast %8 : vector<1x1x512xf32> to vector<1x512xf32>
    %10 = vector.broadcast %9 : vector<1x512xf32> to vector<8x512xf32>
    %11 = arith.addf %7, %10 : vector<8x512xf32>
    %cst_11 = arith.constant 0.000000e+00 : f32
    %12 = vector.broadcast %cst_11 : f32 to vector<8x512xf32>
    %13 = arith.maximumf %11, %12 : vector<8x512xf32>
    %14 = arith.truncf %13 : vector<8x512xf32> to vector<8x512xbf16>
    %c0_12 = arith.constant 0 : index
    %c0_13 = arith.constant 0 : index
    %c0_14 = arith.constant 0 : index
    %15 = vector.load %arg5[%c0_12, %c0_13, %c0_14] : memref<1x512x256xbf16, #tpu.memory_space<vmem>>, vector<1x512x256xbf16>
    %16 = vector.shape_cast %15 : vector<1x512x256xbf16> to vector<512x256xbf16>
    %cst_15 = arith.constant dense<0.000000e+00> : vector<8x256xf32>
    %17 = tpu.matmul %14, %16, %cst_15 {dimension_numbers = #tpu.dot_dimension_numbers<[1], [0], [0], [1], [0, 0, 1, 1], [], []>} : vector<8x512xbf16>, vector<512x256xbf16>, vector<8x256xf32> -> vector<8x256xf32>
    %c0_16 = arith.constant 0 : index
    %c0_17 = arith.constant 0 : index
    %c0_18 = arith.constant 0 : index
    %18 = vector.load %arg6[%c0_16, %c0_17, %c0_18] : memref<1x1x256xf32, #tpu.memory_space<vmem>>, vector<1x1x256xf32>
    %19 = vector.shape_cast %18 : vector<1x1x256xf32> to vector<1x256xf32>
    %20 = vector.broadcast %19 : vector<1x256xf32> to vector<8x256xf32>
    %21 = arith.addf %17, %20 : vector<8x256xf32>
    %cst_19 = arith.constant 0.000000e+00 : f32
    %22 = vector.broadcast %cst_19 : f32 to vector<8x256xf32>
    %23 = arith.maximumf %21, %22 : vector<8x256xf32>
    %24 = arith.truncf %23 : vector<8x256xf32> to vector<8x256xbf16>
    %c0_20 = arith.constant 0 : index
    %c0_21 = arith.constant 0 : index
    %c0_22 = arith.constant 0 : index
    %25 = vector.load %arg7[%c0_20, %c0_21, %c0_22] : memref<1x256x128xbf16, #tpu.memory_space<vmem>>, vector<1x256x128xbf16>
    %26 = vector.shape_cast %25 : vector<1x256x128xbf16> to vector<256x128xbf16>
    %cst_23 = arith.constant dense<0.000000e+00> : vector<8x128xf32>
    %27 = tpu.matmul %24, %26, %cst_23 {dimension_numbers = #tpu.dot_dimension_numbers<[1], [0], [0], [1], [0, 0, 1, 1], [], []>} : vector<8x256xbf16>, vector<256x128xbf16>, vector<8x128xf32> -> vector<8x128xf32>
    %c0_24 = arith.constant 0 : index
    %c0_25 = arith.constant 0 : index
    %c0_26 = arith.constant 0 : index
    %28 = vector.load %arg8[%c0_24, %c0_25, %c0_26] : memref<1x1x128xf32, #tpu.memory_space<vmem>>, vector<1x1x128xf32>
    %29 = vector.shape_cast %28 : vector<1x1x128xf32> to vector<1x128xf32>
    %30 = vector.broadcast %29 : vector<1x128xf32> to vector<8x128xf32>
    %31 = arith.addf %27, %30 : vector<8x128xf32>
    %32 = arith.index_cast %arg0 : i32 to index
    %c0_27 = arith.constant 0 : index
    %c0_28 = arith.constant 0 : index
    %33 = vector.load %arg23[%32, %c0_27, %c0_28] : memref<2x8x128xf32, #tpu.memory_space<vmem>>, vector<1x8x128xf32>
    %34 = vector.shape_cast %33 : vector<1x8x128xf32> to vector<8x128xf32>
    %35 = vector.shape_cast %31 : vector<8x128xf32> to vector<1x8x128xf32>
    tpu.vector_store %arg23[%32, %c0_27, %c0_28], %35 {strides = array<i32>} : memref<2x8x128xf32, #tpu.memory_space<vmem>>, vector<1x8x128xf32>,
    %36 = arith.truncf %31 : vector<8x128xf32> to vector<8x128xbf16>
    %c0_29 = arith.constant 0 : index
    %c0_30 = arith.constant 0 : index
    %c0_31 = arith.constant 0 : index
    %37 = vector.load %arg9[%c0_29, %c0_30, %c0_31] : memref<1x128x128xbf16, #tpu.memory_space<vmem>>, vector<1x128x128xbf16>
    %38 = vector.shape_cast %37 : vector<1x128x128xbf16> to vector<128x128xbf16>
    %cst_32 = arith.constant dense<0.000000e+00> : vector<8x128xf32>
    %39 = tpu.matmul %36, %38, %cst_32 {dimension_numbers = #tpu.dot_dimension_numbers<[1], [0], [0], [1], [0, 0, 1, 1], [], []>} : vector<8x128xbf16>, vector<128x128xbf16>, vector<8x128xf32> -> vector<8x128xf32>
    %c0_33 = arith.constant 0 : index
    %c0_34 = arith.constant 0 : index
    %c0_35 = arith.constant 0 : index
    %40 = vector.load %arg10[%c0_33, %c0_34, %c0_35] : memref<1x1x128xf32, #tpu.memory_space<vmem>>, vector<1x1x128xf32>
    %41 = vector.shape_cast %40 : vector<1x1x128xf32> to vector<1x128xf32>
    %42 = vector.broadcast %41 : vector<1x128xf32> to vector<8x128xf32>
    %43 = arith.addf %39, %42 : vector<8x128xf32>
    %c0_36 = arith.constant 0 : index
    %c0_37 = arith.constant 0 : index
    %c0_38 = arith.constant 0 : index
    %44 = vector.load %arg21[%c0_36, %c0_37, %c0_38] : memref<1x8x128xf32, #tpu.memory_space<vmem>>, vector<1x8x128xf32>
    %45 = vector.shape_cast %44 : vector<1x8x128xf32> to vector<8x128xf32>
    %46 = vector.shape_cast %43 : vector<8x128xf32> to vector<1x8x128xf32>
    tpu.vector_store %arg21[%c0_36, %c0_37, %c0_38], %46 {strides = array<i32>} : memref<1x8x128xf32, #tpu.memory_space<vmem>>, vector<1x8x128xf32>,
    %c1_i32 = arith.constant 1 : i32
    %47 = arith.cmpi eq, %arg0, %c1_i32 : i32
    %48 = arith.extui %47 : i1 to i32
    %c0_i32 = arith.constant 0 : i32
    %49 = arith.cmpi ne, %48, %c0_i32 : i32
    scf.if %49 {
      %c0_39 = arith.constant 0 : index
      %c0_40 = arith.constant 0 : index
      %c0_41 = arith.constant 0 : index
      %50 = vector.load %arg23[%c0_39, %c0_40, %c0_41] : memref<2x8x128xf32, #tpu.memory_space<vmem>>, vector<1x4x128xf32>
      %51 = vector.shape_cast %50 : vector<1x4x128xf32> to vector<4x128xf32>
      %c1 = arith.constant 1 : index
      %c0_42 = arith.constant 0 : index
      %c0_43 = arith.constant 0 : index
      %52 = vector.load %arg23[%c1, %c0_42, %c0_43] : memref<2x8x128xf32, #tpu.memory_space<vmem>>, vector<1x4x128xf32>
      %53 = vector.shape_cast %52 : vector<1x4x128xf32> to vector<4x128xf32>
      %54 = tpu.concatenate %51, %53 in 0 : vector<4x128xf32>, vector<4x128xf32> -> vector<8x128xf32>
      %55 = arith.truncf %54 : vector<8x128xf32> to vector<8x128xbf16>
      %c0_44 = arith.constant 0 : index
      %c0_45 = arith.constant 0 : index
      %56 = vector.load %arg11[%c0_44, %c0_45] : memref<128x128xbf16, #tpu.memory_space<vmem>>, vector<128x128xbf16>
      %cst_46 = arith.constant dense<0.000000e+00> : vector<8x128xf32>
      %57 = tpu.matmul %55, %56, %cst_46 {dimension_numbers = #tpu.dot_dimension_numbers<[1], [0], [0], [1], [0, 0, 1, 1], [], []>} : vector<8x128xbf16>, vector<128x128xbf16>, vector<8x128xf32> -> vector<8x128xf32>
      %c0_47 = arith.constant 0 : index
      %c0_48 = arith.constant 0 : index
      %58 = vector.load %arg12[%c0_47, %c0_48] : memref<1x128xf32, #tpu.memory_space<vmem>>, vector<1x128xf32>
      %59 = vector.broadcast %58 : vector<1x128xf32> to vector<8x128xf32>
      %60 = arith.addf %57, %59 : vector<8x128xf32>
      %c0_49 = arith.constant 0 : index
      %c0_50 = arith.constant 0 : index
      %61 = vector.load %arg13[%c0_49, %c0_50] : memref<128x128xbf16, #tpu.memory_space<vmem>>, vector<128x128xbf16>
      %cst_51 = arith.constant dense<0.000000e+00> : vector<8x128xf32>
      %62 = tpu.matmul %55, %61, %cst_51 {dimension_numbers = #tpu.dot_dimension_numbers<[1], [0], [0], [1], [0, 0, 1, 1], [], []>} : vector<8x128xbf16>, vector<128x128xbf16>, vector<8x128xf32> -> vector<8x128xf32>
      %c0_52 = arith.constant 0 : index
      %c0_53 = arith.constant 0 : index
      %63 = vector.load %arg14[%c0_52, %c0_53] : memref<1x128xf32, #tpu.memory_space<vmem>>, vector<1x128xf32>
      %64 = vector.broadcast %63 : vector<1x128xf32> to vector<8x128xf32>
      %65 = arith.addf %62, %64 : vector<8x128xf32>
      %c0_54 = arith.constant 0 : index
      %c0_55 = arith.constant 0 : index
      %66 = vector.load %arg15[%c0_54, %c0_55] : memref<128x128xbf16, #tpu.memory_space<vmem>>, vector<128x128xbf16>
      %cst_56 = arith.constant dense<0.000000e+00> : vector<8x128xf32>
      %67 = tpu.matmul %55, %66, %cst_56 {dimension_numbers = #tpu.dot_dimension_numbers<[1], [0], [0], [1], [0, 0, 1, 1], [], []>} : vector<8x128xbf16>, vector<128x128xbf16>, vector<8x128xf32> -> vector<8x128xf32>
      %c0_57 = arith.constant 0 : index
      %c0_58 = arith.constant 0 : index
      %68 = vector.load %arg16[%c0_57, %c0_58] : memref<1x128xf32, #tpu.memory_space<vmem>>, vector<1x128xf32>
      %69 = vector.broadcast %68 : vector<1x128xf32> to vector<8x128xf32>
      %70 = arith.addf %67, %69 : vector<8x128xf32>
      %71 = vector.extract_strided_slice %60 {offsets = [0, 0], sizes = [8, 64], strides = [1, 1]} : vector<8x128xf32> to vector<8x64xf32>
      %72 = vector.extract_strided_slice %65 {offsets = [0, 0], sizes = [8, 64], strides = [1, 1]} : vector<8x128xf32> to vector<8x64xf32>
      %73 = vector.extract_strided_slice %70 {offsets = [0, 0], sizes = [8, 64], strides = [1, 1]} : vector<8x128xf32> to vector<8x64xf32>
      %74 = tpu.transpose %72, [1, 0] : vector<8x64xf32> -> vector<64x8xf32>
      %cst_59 = arith.constant dense<0.000000e+00> : vector<8x8xf32>
      %75 = tpu.matmul %71, %74, %cst_59 {dimension_numbers = #tpu.dot_dimension_numbers<[1], [0], [0], [1], [0, 0, 1, 1], [], []>} : vector<8x64xf32>, vector<64x8xf32>, vector<8x8xf32> -> vector<8x8xf32>
      %cst_60 = arith.constant 1.250000e-01 : f32
      %76 = vector.broadcast %cst_60 : f32 to vector<8x8xf32>
      %77 = arith.mulf %75, %76 : vector<8x8xf32>
      %cst_61 = arith.constant dense<0xFF800000> : vector<8xf32>
      %78 = vector.multi_reduction <maximumf>, %77, %cst_61 [1] : vector<8x8xf32> to vector<8xf32>
      %79 = vector.shape_cast %78 : vector<8xf32> to vector<8x1xf32>
      %80 = vector.broadcast %79 : vector<8x1xf32> to vector<8x8xf32>
      %81 = arith.subf %77, %80 : vector<8x8xf32>
      %82 = math.exp %81 : vector<8x8xf32>
      %cst_62 = arith.constant dense<0.000000e+00> : vector<8xf32>
      %83 = vector.multi_reduction <add>, %82, %cst_62 [1] : vector<8x8xf32> to vector<8xf32>
      %84 = vector.shape_cast %83 : vector<8xf32> to vector<8x1xf32>
      %85 = tpu.reciprocal %84 {approx = true} : vector<8x1xf32> -> vector<8x1xf32>
      %86 = vector.broadcast %85 : vector<8x1xf32> to vector<8x8xf32>
      %87 = arith.mulf %82, %86 : vector<8x8xf32>
      %cst_63 = arith.constant dense<0.000000e+00> : vector<8x64xf32>
      %88 = tpu.matmul %87, %73, %cst_63 {dimension_numbers = #tpu.dot_dimension_numbers<[1], [0], [0], [1], [0, 0, 1, 1], [], []>} : vector<8x8xf32>, vector<8x64xf32>, vector<8x64xf32> -> vector<8x64xf32>
      %89 = vector.extract_strided_slice %60 {offsets = [0, 64], sizes = [8, 64], strides = [1, 1]} : vector<8x128xf32> to vector<8x64xf32>
      %90 = vector.extract_strided_slice %65 {offsets = [0, 64], sizes = [8, 64], strides = [1, 1]} : vector<8x128xf32> to vector<8x64xf32>
      %91 = vector.extract_strided_slice %70 {offsets = [0, 64], sizes = [8, 64], strides = [1, 1]} : vector<8x128xf32> to vector<8x64xf32>
      %92 = tpu.transpose %90, [1, 0] : vector<8x64xf32> -> vector<64x8xf32>
      %cst_64 = arith.constant dense<0.000000e+00> : vector<8x8xf32>
      %93 = tpu.matmul %89, %92, %cst_64 {dimension_numbers = #tpu.dot_dimension_numbers<[1], [0], [0], [1], [0, 0, 1, 1], [], []>} : vector<8x64xf32>, vector<64x8xf32>, vector<8x8xf32> -> vector<8x8xf32>
      %cst_65 = arith.constant 1.250000e-01 : f32
      %94 = vector.broadcast %cst_65 : f32 to vector<8x8xf32>
      %95 = arith.mulf %93, %94 : vector<8x8xf32>
      %cst_66 = arith.constant dense<0xFF800000> : vector<8xf32>
      %96 = vector.multi_reduction <maximumf>, %95, %cst_66 [1] : vector<8x8xf32> to vector<8xf32>
      %97 = vector.shape_cast %96 : vector<8xf32> to vector<8x1xf32>
      %98 = vector.broadcast %97 : vector<8x1xf32> to vector<8x8xf32>
      %99 = arith.subf %95, %98 : vector<8x8xf32>
      %100 = math.exp %99 : vector<8x8xf32>
      %cst_67 = arith.constant dense<0.000000e+00> : vector<8xf32>
      %101 = vector.multi_reduction <add>, %100, %cst_67 [1] : vector<8x8xf32> to vector<8xf32>
      %102 = vector.shape_cast %101 : vector<8xf32> to vector<8x1xf32>
      %103 = tpu.reciprocal %102 {approx = true} : vector<8x1xf32> -> vector<8x1xf32>
      %104 = vector.broadcast %103 : vector<8x1xf32> to vector<8x8xf32>
      %105 = arith.mulf %100, %104 : vector<8x8xf32>
      %cst_68 = arith.constant dense<0.000000e+00> : vector<8x64xf32>
      %106 = tpu.matmul %105, %91, %cst_68 {dimension_numbers = #tpu.dot_dimension_numbers<[1], [0], [0], [1], [0, 0, 1, 1], [], []>} : vector<8x8xf32>, vector<8x64xf32>, vector<8x64xf32> -> vector<8x64xf32>
      %107 = tpu.concatenate %88, %106 in 1 : vector<8x64xf32>, vector<8x64xf32> -> vector<8x128xf32>
      %108 = arith.truncf %107 : vector<8x128xf32> to vector<8x128xbf16>
      %c0_69 = arith.constant 0 : index
      %c0_70 = arith.constant 0 : index
      %109 = vector.load %arg17[%c0_69, %c0_70] : memref<128x128xbf16, #tpu.memory_space<vmem>>, vector<128x128xbf16>
      %cst_71 = arith.constant dense<0.000000e+00> : vector<8x128xf32>
      %110 = tpu.matmul %108, %109, %cst_71 {dimension_numbers = #tpu.dot_dimension_numbers<[1], [0], [0], [1], [0, 0, 1, 1], [], []>} : vector<8x128xbf16>, vector<128x128xbf16>, vector<8x128xf32> -> vector<8x128xf32>
      %c0_72 = arith.constant 0 : index
      %c0_73 = arith.constant 0 : index
      %111 = vector.load %arg18[%c0_72, %c0_73] : memref<1x128xf32, #tpu.memory_space<vmem>>, vector<1x128xf32>
      %112 = vector.broadcast %111 : vector<1x128xf32> to vector<8x128xf32>
      %113 = arith.addf %110, %112 : vector<8x128xf32>
      %cst_74 = arith.constant dense<0.000000e+00> : vector<128xf32>
      %114 = vector.multi_reduction <add>, %113, %cst_74 [0] : vector<8x128xf32> to vector<128xf32>
      %115 = vector.shape_cast %114 : vector<128xf32> to vector<1x128xf32>
      %cst_75 = arith.constant 8.000000e+00 : f32
      %116 = vector.broadcast %cst_75 : f32 to vector<1x128xf32>
      %117 = arith.divf %115, %116 : vector<1x128xf32>
      %cst_76 = arith.constant 0.000000e+00 : f32
      %118 = vector.broadcast %cst_76 : f32 to vector<1x128xf32>
      %119 = arith.maximumf %117, %118 : vector<1x128xf32>
      %120 = arith.truncf %119 : vector<1x128xf32> to vector<1x128xbf16>
      %c0_77 = arith.constant 0 : index
      %c0_78 = arith.constant 0 : index
      %121 = vector.load %arg19[%c0_77, %c0_78] : memref<128x128xbf16, #tpu.memory_space<vmem>>, vector<128x128xbf16>
      %cst_79 = arith.constant dense<0.000000e+00> : vector<1x128xf32>
      %122 = tpu.matmul %120, %121, %cst_79 {dimension_numbers = #tpu.dot_dimension_numbers<[1], [0], [0], [1], [0, 0, 1, 1], [], []>} : vector<1x128xbf16>, vector<128x128xbf16>, vector<1x128xf32> -> vector<1x128xf32>
      %c0_80 = arith.constant 0 : index
      %c0_81 = arith.constant 0 : index
      %123 = vector.load %arg20[%c0_80, %c0_81] : memref<1x128xf32, #tpu.memory_space<vmem>>, vector<1x128xf32>
      %124 = arith.addf %122, %123 : vector<1x128xf32>
      %c0_82 = arith.constant 0 : index
      %c0_83 = arith.constant 0 : index
      %125 = vector.load %arg22[%c0_82, %c0_83] : memref<1x128xf32, #tpu.memory_space<vmem>>, vector<1x128xf32>
      tpu.vector_store %arg22[%c0_82, %c0_83], %124 {strides = array<i32>} : memref<1x128xf32, #tpu.memory_space<vmem>>, vector<1x128xf32>,
    } else {
    }
    return
  }
  func.func @transform_0(%arg0: i32) -> (i32, i32) {
    %c0_i32 = arith.constant 0 : i32
    %c0_i32_0 = arith.constant 0 : i32
    %c0_i32_1 = arith.constant 0 : i32
    return %c0_i32, %c0_i32_0 : i32, i32
  }
  func.func @transform_1(%arg0: i32) -> (i32, i32, i32) {
    %c0_i32 = arith.constant 0 : i32
    %c0_i32_0 = arith.constant 0 : i32
    %c0_i32_1 = arith.constant 0 : i32
    return %arg0, %c0_i32, %c0_i32_0 : i32, i32, i32
  }
  func.func @transform_2(%arg0: i32) -> (i32, i32, i32) {
    %c0_i32 = arith.constant 0 : i32
    %c0_i32_0 = arith.constant 0 : i32
    %c0_i32_1 = arith.constant 0 : i32
    return %arg0, %c0_i32, %c0_i32_0 : i32, i32, i32
  }
  func.func @transform_3(%arg0: i32) -> (i32, i32, i32) {
    %c0_i32 = arith.constant 0 : i32
    %c0_i32_0 = arith.constant 0 : i32
    %c0_i32_1 = arith.constant 0 : i32
    return %arg0, %c0_i32, %c0_i32_0 : i32, i32, i32
  }
  func.func @transform_4(%arg0: i32) -> (i32, i32, i32) {
    %c0_i32 = arith.constant 0 : i32
    %c0_i32_0 = arith.constant 0 : i32
    %c0_i32_1 = arith.constant 0 : i32
    return %arg0, %c0_i32, %c0_i32_0 : i32, i32, i32
  }
  func.func @transform_5(%arg0: i32) -> (i32, i32, i32) {
    %c0_i32 = arith.constant 0 : i32
    %c0_i32_0 = arith.constant 0 : i32
    %c0_i32_1 = arith.constant 0 : i32
    return %arg0, %c0_i32, %c0_i32_0 : i32, i32, i32
  }
  func.func @transform_6(%arg0: i32) -> (i32, i32, i32) {
    %c0_i32 = arith.constant 0 : i32
    %c0_i32_0 = arith.constant 0 : i32
    %c0_i32_1 = arith.constant 0 : i32
    return %arg0, %c0_i32, %c0_i32_0 : i32, i32, i32
  }
  func.func @transform_7(%arg0: i32) -> (i32, i32, i32) {
    %c0_i32 = arith.constant 0 : i32
    %c0_i32_0 = arith.constant 0 : i32
    %c0_i32_1 = arith.constant 0 : i32
    return %arg0, %c0_i32, %c0_i32_0 : i32, i32, i32
  }
  func.func @transform_8(%arg0: i32) -> (i32, i32, i32) {
    %c0_i32 = arith.constant 0 : i32
    %c0_i32_0 = arith.constant 0 : i32
    %c0_i32_1 = arith.constant 0 : i32
    return %arg0, %c0_i32, %c0_i32_0 : i32, i32, i32
  }
  func.func @transform_9(%arg0: i32) -> (i32, i32, i32) {
    %c0_i32 = arith.constant 0 : i32
    %c0_i32_0 = arith.constant 0 : i32
    %c0_i32_1 = arith.constant 0 : i32
    return %arg0, %c0_i32, %c0_i32_0 : i32, i32, i32
  }
  func.func @transform_10(%arg0: i32) -> (i32, i32) {
    %c0_i32 = arith.constant 0 : i32
    %c0_i32_0 = arith.constant 0 : i32
    %c0_i32_1 = arith.constant 0 : i32
    return %c0_i32, %c0_i32_0 : i32, i32
  }
  func.func @transform_11(%arg0: i32) -> (i32, i32) {
    %c0_i32 = arith.constant 0 : i32
    %c0_i32_0 = arith.constant 0 : i32
    %c0_i32_1 = arith.constant 0 : i32
    return %c0_i32, %c0_i32_0 : i32, i32
  }
  func.func @transform_12(%arg0: i32) -> (i32, i32) {
    %c0_i32 = arith.constant 0 : i32
    %c0_i32_0 = arith.constant 0 : i32
    %c0_i32_1 = arith.constant 0 : i32
    return %c0_i32, %c0_i32_0 : i32, i32
  }
  func.func @transform_13(%arg0: i32) -> (i32, i32) {
    %c0_i32 = arith.constant 0 : i32
    %c0_i32_0 = arith.constant 0 : i32
    %c0_i32_1 = arith.constant 0 : i32
    return %c0_i32, %c0_i32_0 : i32, i32
  }
  func.func @transform_14(%arg0: i32) -> (i32, i32) {
    %c0_i32 = arith.constant 0 : i32
    %c0_i32_0 = arith.constant 0 : i32
    %c0_i32_1 = arith.constant 0 : i32
    return %c0_i32, %c0_i32_0 : i32, i32
  }
  func.func @transform_15(%arg0: i32) -> (i32, i32) {
    %c0_i32 = arith.constant 0 : i32
    %c0_i32_0 = arith.constant 0 : i32
    %c0_i32_1 = arith.constant 0 : i32
    return %c0_i32, %c0_i32_0 : i32, i32
  }
  func.func @transform_16(%arg0: i32) -> (i32, i32) {
    %c0_i32 = arith.constant 0 : i32
    %c0_i32_0 = arith.constant 0 : i32
    %c0_i32_1 = arith.constant 0 : i32
    return %c0_i32, %c0_i32_0 : i32, i32
  }
  func.func @transform_17(%arg0: i32) -> (i32, i32) {
    %c0_i32 = arith.constant 0 : i32
    %c0_i32_0 = arith.constant 0 : i32
    %c0_i32_1 = arith.constant 0 : i32
    return %c0_i32, %c0_i32_0 : i32, i32
  }
  func.func @transform_18(%arg0: i32) -> (i32, i32) {
    %c0_i32 = arith.constant 0 : i32
    %c0_i32_0 = arith.constant 0 : i32
    %c0_i32_1 = arith.constant 0 : i32
    return %c0_i32, %c0_i32_0 : i32, i32
  }
  func.func @transform_19(%arg0: i32) -> (i32, i32) {
    %c0_i32 = arith.constant 0 : i32
    %c0_i32_0 = arith.constant 0 : i32
    %c0_i32_1 = arith.constant 0 : i32
    return %c0_i32, %c0_i32_0 : i32, i32
  }
  func.func @transform_20(%arg0: i32) -> (i32, i32, i32) {
    %c0_i32 = arith.constant 0 : i32
    %c0_i32_0 = arith.constant 0 : i32
    %c0_i32_1 = arith.constant 0 : i32
    return %arg0, %c0_i32, %c0_i32_0 : i32, i32, i32
  }
  func.func @transform_21(%arg0: i32) -> (i32, i32) {
    %c0_i32 = arith.constant 0 : i32
    %c0_i32_0 = arith.constant 0 : i32
    %c0_i32_1 = arith.constant 0 : i32
    return %c0_i32, %c0_i32_0 : i32, i32
  }
}

</mosaic_0001>

<bundles_post_ra>
// kernel: tpu_custom_call.1
= control target key start
LH: loop header
LB: loop body
LE: loop exit
PB: predicated region body
PF: predicated region fallthrough
CT: control target
= control target key end

     0   :  { %s11209_s0 = inlined_call_operand.hbm [shape: bf16[8,768], index: 0, kind: input, shape index: {}]   ;;  %s11210_s1 = inlined_call_operand.hbm [shape: bf16[2,768,768], index: 1, kind: input, shape index: {}]   ;;  %s11211_s2 = inlined_call_operand.hbm [shape: bf16[2,768,512], index: 2, kind: input, shape index: {}]   ;;  %s11212_s3 = inlined_call_operand.hbm [shape: f32[2,1,512], index: 3, kind: input, shape index: {}]   ;;  %s11213_s4 = inlined_call_operand.hbm [shape: bf16[2,512,256], index: 4, kind: input, shape index: {}]   ;;  %s11214_s5 = inlined_call_operand.hbm [shape: f32[2,1,256], index: 5, kind: input, shape index: {}]   ;;  %s11215_s6 = inlined_call_operand.hbm [shape: bf16[2,256,128], index: 6, kind: input, shape index: {}]   ;;  %s11216_s7 = inlined_call_operand.hbm [shape: f32[2,1,128], index: 7, kind: input, shape index: {}]   ;;  %s11217_s8 = inlined_call_operand.hbm [shape: bf16[2,128,128], index: 8, kind: input, shape index: {}]   ;;  %s11218_s9 = inlined_call_operand.hbm [shape: f32[2,1,128], index: 9, kind: input, shape index: {}]   ;;  %s11219_s10 = inlined_call_operand.hbm [shape: bf16[128,128], index: 10, kind: input, shape index: {}]   ;;  %s11220_s11 = inlined_call_operand.hbm [shape: f32[1,128], index: 11, kind: input, shape index: {}]   ;;  %s11221_s12 = inlined_call_operand.hbm [shape: bf16[128,128], index: 12, kind: input, shape index: {}]   ;;  %s11222_s13 = inlined_call_operand.hbm [shape: f32[1,128], index: 13, kind: input, shape index: {}]   ;;  %s11223_s14 = inlined_call_operand.hbm [shape: bf16[128,128], index: 14, kind: input, shape index: {}]   ;;  %s11224_s15 = inlined_call_operand.hbm [shape: f32[1,128], index: 15, kind: input, shape index: {}]   ;;  %s11225_s16 = inlined_call_operand.hbm [shape: bf16[128,128], index: 16, kind: input, shape index: {}]   ;;  %s11226_s17 = inlined_call_operand.hbm [shape: f32[1,128], index: 17, kind: input, shape index: {}]   ;;  %s11227_s18 = inlined_call_operand.hbm [shape: bf16[128,128], index: 18, kind: input, shape index: {}]   ;;  %s11228_s19 = inlined_call_operand.hbm [shape: f32[1,128], index: 19, kind: input, shape index: {}]   ;;  %s11229_s20 = inlined_call_operand.hbm [shape: f32[2,8,128], index: 20, kind: output, shape index: {0}]   ;;  %s11230_s21 = inlined_call_operand.hbm [shape: f32[1,128], index: 21, kind: output, shape index: {1}]  }
   0x1   :  { %11279 = sst [smem:[#allocation59_spill]] %s11209_s0 }
   0x2   :  { %11280 = sst [smem:[#allocation60_spill]] %s11210_s1 }
   0x3   :  { %11281 = sst [smem:[#allocation61_spill]] %s11211_s2 }
   0x4   :  { %11282 = sst [smem:[#allocation62_spill]] %s11212_s3 }
   0x5   :  { %11283 = sst [smem:[#allocation63_spill]] %s11213_s4 }
   0x6   :  { %11284 = sst [smem:[#allocation64_spill]] %s11214_s5 }
   0x7   :  { %11285 = sst [smem:[#allocation65_spill]] %s11215_s6 }
   0x8   :  { %11286 = sst [smem:[#allocation66_spill]] %s11216_s7 }
   0x9   :  { %11287 = sst [smem:[#allocation67_spill]] %s11217_s8 }
   0xa   :  { %11288 = sst [smem:[#allocation68_spill]] %s11219_s10 }
   0xb   :  { %11289 = sst [smem:[#allocation69_spill]] %s11220_s11 }
   0xc   :  { %11290 = sst [smem:[#allocation70_spill]] %s11221_s12 }
   0xd   :  { %11291 = sst [smem:[#allocation71_spill]] %s11222_s13 }
   0xe   :  { %11292 = sst [smem:[#allocation72_spill]] %s11224_s15 }
   0xf   :  { %11293 = sst [smem:[#allocation73_spill]] %s11226_s17 }
  0x10   :  { %11294 = sst [smem:[#allocation74_spill]] %s11227_s18 }
  0x11   :  { %11295 = sst [smem:[#allocation75_spill]] %s11228_s19 }
  0x12   :  { %11296 = sst [smem:[#allocation76_spill]] %s11229_s20 }
  0x13   :  { %11297 = sst [smem:[#allocation77_spill]] %s11230_s21 }
  0x14   :  { %27 = vsyncpa [#allocation4], 0 }
  0x15   :  { %28 = vsyncpa [#allocation7], 0 }
  0x16   :  { %30 = vsyncpa [#allocation7 + $0x1], 0 }
  0x17   :  { %31 = vsyncpa [#allocation10], 0 }
  0x18   :  { %33 = vsyncpa [#allocation10 + $0x1], 0 }
  0x19   :  { %34 = vsyncpa [#allocation13], 0 }
  0x1a   :  { %36 = vsyncpa [#allocation13 + $0x1], 0 }
  0x1b   :  { %37 = vsyncpa [#allocation16], 0 }
  0x1c   :  { %39 = vsyncpa [#allocation16 + $0x1], 0 }
  0x1d   :  { %40 = vsyncpa [#allocation19], 0 }
  0x1e   :  { %42 = vsyncpa [#allocation19 + $0x1], 0 }
  0x1f   :  { %43 = vsyncpa [#allocation22], 0 }
  0x20   :  { %44 = vsyncpa [#allocation25], 0 }
  0x21   :  { %45 = vsyncpa [#allocation28], 0 }
  0x22   :  { %46 = vsyncpa [#allocation31], 0 }
  0x23   :  { %47 = vsyncpa [#allocation34], 0 }
  0x24   :  { %48 = vsyncpa [#allocation5], 0 }
  0x25   :  { %50 = vsyncpa [#allocation5 + $0x1], 0 }
  0x26   :  { %51 = vsyncpa [#allocation37], 0  ;;  %s9679_s2 = smov 0   ;;  %s9681_s25 = smov 0  }
  0x27   :  { %s9683_s26 = smov 0   ;;  %s9685_s27 = smov 0  }
  0x28 LB: > { %11298 = sst [smem:[#allocation52_spill]] %s9520_s2  ;;  %s9534_s3 = smov [#allocation20]   ;;  %s9532_s27 = sphi %s9685_s27, %s11375_s27   ;;  %s9528_s26 = sphi %s9683_s26, %s11377_s26   ;;  %s9524_s25 = sphi %s9681_s25, %s11379_s25   ;;  %s9520_s2 = sphi %s9679_s2, %s11378_s2  }
  0x29   : > { %11299 = sst [smem:[#allocation53_spill]] %s9528_s26  ;;  %s597_s28 = sshll.u32 %s9534_s3, 4  ;;  %s9705_s28 = int_to_ptr.vmem [resolvable:$true] %s597_s28 }
  0x2a   : > { %s9700_s29 = sadd.s32 4294967295, %s9532_s27   ;;  %p6734_p0 = scmp.ge.s32.totalorder %s9532_s27, 1 }
  0x2b   : > { %p11246_p1 = scmp.eq.s32.totalorder %s9700_s29, 0  ;;  %p574_p2 = scmp.lt.s32.totalorder %s9532_s27, 3 }
  0x2c   : > { %s9535_s4 = smov [#allocation21]   ;;  %s9536_s22 = smov [#allocation24]  }
  0x2d   : > { %p9707_p3 = pnand %p6734_p0, %p574_p2  ;;  %s611_s30 = sshll.u32 %s9535_s4, 4  ;;  %s9720_s30 = int_to_ptr.vmem [resolvable:$true] %s611_s30 }
  0x2e   : > { %s635_s23 = sshll.u32 %s9536_s22, 4  ;;  %s11303_s10 = sld [smem:[#allocation68_spill]]  ;;  %s9722_s23 = int_to_ptr.vmem [resolvable:$true] %s635_s23 }
  0x2f   : > { %s11300_s0 = scalar_select %p9707_p3, 1, 0 }
  0x30   : > { %p7771_p5 = pneg %p9707_p3 }
  0x31   : > { %11301 = sst [smem:[#allocation54_spill]] %s11300_s0 }
  0x32   : > { %p9716_p6 = pnand %p7771_p5, %p11246_p1 }
  0x34   : > { %s11302_s5 = scalar_select %p9716_p6, 1, 0 }
  0x35   : > { %s8814_s3 = scalar_lea.hbm %s11303_s10, 1024  ;;  %p9732_p8 = pneg %p9716_p6 }
  0x36   : > { %p8815_p7 = scmp.ne.s32.totalorder %s11303_s10, %s8814_s3  ;;  %p8821_p11 = scmp.lt.u32.totalorder %s8814_s3, %s11303_s10 }
  0x37   : > { %s11304_s4 = scalar_select %p9732_p8, 1, 0 }
  0x38   : > { %p8817_p9 = pnand %p9732_p8, %p8815_p7 }
  0x3a   : > { %p8818_p10 = pneg %p8817_p9 }
  0x3c   : > { %p8823_p12 = pnand %p8821_p11, %p8818_p10 }
  0x3e   : > { %8826 = shalt.err (!%p8823_p12)
}
  0x3f   : > { %s8827_s20 = scalar_lea.vmem %s9705_s28, 1024  ;;  %p8835_p5 = scmp.lt.s32.totalorder %s9705_s28, %s9705_s28 }
  0x40   : > { %p8828_p13 = scmp.ne.s32.totalorder %s9705_s28, %s8827_s20  ;;  %p8836_p4 = scmp.lt.s32.totalorder %s8827_s20, %s8827_s20 }
  0x42   : > { %p8830_p0 = pnand %p8828_p13, %p9732_p8  ;;  %p8837_p7 = por %p8836_p4, %p8835_p5 }
  0x44   : > { %p8831_p2 = pneg %p8830_p0 }
  0x46   : > { %p8838_p9 = pnand %p8837_p7, %p8831_p2 }
  0x48   : > { %8841 = shalt.err (!%p8838_p9)
}
  0x49   : > { %s11244_s21 = smov 64   ;;  %s11248_s0 = smov 4  }
  0x4a   : > { %7777 = dma.hbm_to_vmem [thread:$0]  (!%p9716_p6), %s11303_s10, 1024, %s9705_s28, [#allocation19], %s11244_s21, %s11244_s21, %s11248_s0  }
  0x4b   : > { %s11305_s11 = sld [smem:[#allocation69_spill]] }
  0x51   : > { %s8842_s20 = scalar_lea.hbm %s11305_s11, 16 }
  0x52   : > { %p8843_p4 = scmp.ne.s32.totalorder %s11305_s11, %s8842_s20  ;;  %p8849_p12 = scmp.lt.u32.totalorder %s8842_s20, %s11305_s11 }
  0x54   : > { %p8845_p10 = pnand %p8843_p4, %p9732_p8 }
  0x56   : > { %p8846_p11 = pneg %p8845_p10 }
  0x58   : > { %p8851_p13 = pnand %p8849_p12, %p8846_p11 }
  0x5a   : > { %8854 = shalt.err (!%p8851_p13)
}
  0x5b   : > { %s8855_s28 = scalar_lea.vmem %s9720_s30, 16  ;;  %s8862_s6 = scalar_lea.vmem %s9720_s30, 32 }
  0x5c   : > { %p8856_p0 = scmp.ne.s32.totalorder %s9720_s30, %s8855_s28  ;;  %p8863_p7 = scmp.lt.s32.totalorder %s9720_s30, %s9720_s30 }
  0x5d   : > { %p8864_p9 = scmp.lt.s32.totalorder %s8862_s6, %s8855_s28 }
  0x5e   : > { %p8858_p2 = pnand %p8856_p0, %p9732_p8 }
  0x5f   : > { %p8865_p4 = por %p8864_p9, %p8863_p7 }
  0x60   : > { %p8859_p5 = pneg %p8858_p2 }
  0x62   : > { %p8866_p10 = pnand %p8865_p4, %p8859_p5 }
  0x64   : > { %8869 = shalt.err (!%p8866_p10)
}
  0x65   : > { %7780 = dma.hbm_to_vmem [thread:$0]  (!%p9716_p6), %s11305_s11, 16, %s9720_s30, [#allocation22]  }
  0x66   : > { %s11306_s13 = sld [smem:[#allocation71_spill]] }
  0x6c   : > { %s8870_s24 = scalar_lea.hbm %s11306_s13, 16 }
  0x6d   : > { %p8871_p11 = scmp.ne.s32.totalorder %s11306_s13, %s8870_s24  ;;  %p8877_p0 = scmp.lt.u32.totalorder %s8870_s24, %s11306_s13 }
  0x6f   : > { %p8873_p12 = pnand %p8871_p11, %p9732_p8 }
  0x71   : > { %p8874_p13 = pneg %p8873_p12 }
  0x73   : > { %p8879_p2 = pnand %p8877_p0, %p8874_p13 }
  0x75   : > { %8882 = shalt.err (!%p8879_p2)
}
  0x76   : > { %s8883_s30 = scalar_lea.vmem %s9722_s23, 16  ;;  %s8890_s6 = scalar_lea.vmem %s9722_s23, 32 }
  0x77   : > { %p8884_p5 = scmp.ne.s32.totalorder %s9722_s23, %s8883_s30  ;;  %p8891_p4 = scmp.lt.s32.totalorder %s9722_s23, %s9722_s23 }
  0x78   : > { %p8892_p10 = scmp.lt.s32.totalorder %s8890_s6, %s8883_s30 }
  0x79   : > { %p8886_p7 = pnand %p8884_p5, %p9732_p8 }
  0x7a   : > { %p8893_p11 = por %p8892_p10, %p8891_p4 }
  0x7b   : > { %p8887_p9 = pneg %p8886_p7 }
  0x7d   : > { %p8894_p12 = pnand %p8893_p11, %p8887_p9 }
  0x7f   : > { %8897 = shalt.err (!%p8894_p12)
}
  0x80   : > { %7786 = dma.hbm_to_vmem [thread:$0]  (!%p9716_p6), %s11306_s13, 16, %s9722_s23, [#allocation25]  }
  0x81   : > { %s9539_s19 = smov [#allocation27]   ;;  %s9540_s24 = smov [#allocation30]  }
  0x82   : > { %s659_s1 = sshll.u32 %s9539_s19, 4  ;;  %s683_s3 = sshll.u32 %s9540_s24, 4  ;;  %s660_s1 = int_to_ptr.vmem [resolvable:$true] %s659_s1  ;;  %s684_s3 = int_to_ptr.vmem [resolvable:$true] %s683_s3 }
  0x83   : > { %s11307_s15 = sld [smem:[#allocation72_spill]] }
  0x89   : > { %s8898_s28 = scalar_lea.hbm %s11307_s15, 16 }
  0x8a   : > { %p8899_p13 = scmp.ne.s32.totalorder %s11307_s15, %s8898_s28  ;;  %p8905_p5 = scmp.lt.u32.totalorder %s8898_s28, %s11307_s15 }
  0x8c   : > { %p8901_p0 = pnand %p8899_p13, %p9732_p8 }
  0x8e   : > { %p8902_p2 = pneg %p8901_p0 }
  0x90   : > { %p8907_p7 = pnand %p8905_p5, %p8902_p2 }
  0x92   : > { %8910 = shalt.err (!%p8907_p7)
}
  0x93   : > { %s8911_s23 = scalar_lea.vmem %s660_s1, 16  ;;  %s8918_s18 = scalar_lea.vmem %s660_s1, 32 }
  0x94   : > { %p8912_p9 = scmp.ne.s32.totalorder %s660_s1, %s8911_s23  ;;  %p8919_p11 = scmp.lt.s32.totalorder %s660_s1, %s660_s1 }
  0x95   : > { %p8920_p12 = scmp.lt.s32.totalorder %s8918_s18, %s8911_s23 }
  0x96   : > { %p8914_p4 = pnand %p8912_p9, %p9732_p8 }
  0x97   : > { %p8921_p1 = por %p8920_p12, %p8919_p11 }
  0x98   : > { %p8915_p10 = pneg %p8914_p4 }
  0x9a   : > { %p8922_p3 = pnand %p8921_p1, %p8915_p10 }
  0x9c   : > { %8925 = shalt.err (!%p8922_p3)
}
  0x9d   : > { %7792 = dma.hbm_to_vmem [thread:$0]  (!%p9716_p6), %s11307_s15, 16, %s660_s1, [#allocation28]  }
  0x9e   : > { %s11308_s17 = sld [smem:[#allocation73_spill]] }
  0xa4   : > { %s8926_s20 = scalar_lea.hbm %s11308_s17, 16 }
  0xa5   : > { %p8927_p13 = scmp.ne.s32.totalorder %s11308_s17, %s8926_s20  ;;  %p8933_p3 = scmp.lt.u32.totalorder %s8926_s20, %s11308_s17 }
  0xa7   : > { %p8929_p0 = pnand %p8927_p13, %p9732_p8 }
  0xa9   : > { %p8930_p1 = pneg %p8929_p0 }
  0xab   : > { %p8935_p2 = pnand %p8933_p3, %p8930_p1 }
  0xad   : > { %8938 = shalt.err (!%p8935_p2)
}
  0xae   : > { %s8939_s23 = scalar_lea.vmem %s684_s3, 16  ;;  %s8946_s1 = scalar_lea.vmem %s684_s3, 32 }
  0xaf   : > { %p8940_p5 = scmp.ne.s32.totalorder %s684_s3, %s8939_s23  ;;  %p8947_p4 = scmp.lt.s32.totalorder %s684_s3, %s684_s3 }
  0xb0   : > { %p8948_p10 = scmp.lt.s32.totalorder %s8946_s1, %s8939_s23 }
  0xb1   : > { %p8942_p7 = pnand %p8940_p5, %p9732_p8 }
  0xb2   : > { %p8949_p11 = por %p8948_p10, %p8947_p4 }
  0xb3   : > { %p8943_p9 = pneg %p8942_p7 }
  0xb5   : > { %p8950_p12 = pnand %p8949_p11, %p8943_p9 }
  0xb7   : > { %8953 = shalt.err (!%p8950_p12)
}
  0xb8   : > { %7798 = dma.hbm_to_vmem [thread:$0]  (!%p9716_p6), %s11308_s17, 16, %s684_s3, [#allocation31]  }
  0xb9   : > { %s6733_s24 = sadd.s32 4294967294, %s9532_s27   ;;  %s9842_s21 = sadd.s32 1, %s9532_s27  }
  0xba   : > { %11309 = sst [smem:[#allocation55_spill]] %s9842_s21  ;;  %s85_s22 = sadd.s32 1, %s9528_s26 }
  0xbb   : > { %s82_s20 = ssub.s32 %s9532_s27, %s9842_s21  ;;  %p92_p13 = scmp.ne.s32.totalorder %s9528_s26, %s9524_s25 }
  0xbc   : > { %p83_p0 = scmp.eq.s32.totalorder %s82_s20, 0  ;;  %p93_p1 = scmp.eq.s32.totalorder %s9532_s27, 0 }
  0xbd   : > { %p98_p3 = scmp.ne.s32.totalorder %s9524_s25, %s9520_s2  ;;  %p11250_p2 = scmp.eq.s32.totalorder %s9700_s29, 1 }
  0xbe   : > { %s9854_s28 = scalar_select %p83_p0, %s9528_s26, %s85_s22  }
  0xbf   : > { %p94_p5 = por %p93_p1, %p92_p13  ;;  %p11311_p7 = scmp.eq.s32.totalorder %s9700_s29, 0 }
  0xc0   : > { %11310 = sst [smem:[#allocation56_spill]] %s9854_s28  ;;  %p9864_p4 = por %p11250_p2, %p92_p13 }
  0xc1   : > { %p9858_p9 = por %p11311_p7, %p98_p3  ;;  %p546_p10 = scmp.eq.s32.totalorder %s6733_s24, 1 }
  0xc2   : > { %s11313_s30 = scalar_select %p9864_p4, 1, 0 }
  0xc3   : > { %s11312_s3 = scalar_select %p9858_p9, 1, 0 }
  0xc4   : > { %11314 = sst [smem:[#allocation57_spill]] %s11313_s30  ;;  %p7848_p11 = scmp.lt.s32.totalorder %s9532_s27, 2 }
  0xc5   : > { %s9870_s6 = sand.u32 1, %s9532_s27   ;;  %p9872_p12 = por %p546_p10, %p98_p3 }
  0xc6   : > { %s9877_s23 = sand.u32 1, %s9528_s26   ;;  %s7698_s1 = smul.u32 36864, %s9532_s27 }
  0xc7   : > { %s11315_s8 = scalar_select %p9872_p12, 1, 0 }
  0xc8   : > { %s7697_s18 = smul.u32 2304, %s9877_s23  ;;  %p9881_p0 = pnand %p7848_p11, %p94_p5 }
  0xc9   : > { %11316 = sst [smem:[#allocation58_spill]] %s11315_s8 }
  0xca   : > { %s11317_s19 = scalar_select %p9881_p0, 1, 0 }
  0xcb   : > { %s11318_s24 = sld [smem:[#allocation60_spill]]  ;;  %s722_s10 = scalar_lea.vmem [#allocation6], %s7697_s18 }
  0xcc   : > { %s729_s11 = sshll.u32 %s722_s10, 4  ;;  %p9897_p1 = pneg %p9881_p0  ;;  %s9890_s11 = int_to_ptr.vmem [resolvable:$true] %s729_s11 }
  0xce   : > { %s11319_s17 = scalar_select %p9897_p1, 1, 0 }
  0xd1   : > { %s9888_s0 = scalar_lea.hbm %s11318_s24, %s7698_s1  ;;  %s8959_s20 = scalar_lea.hbm %s11318_s24, 73728 }
  0xd2   : > { %s8954_s15 = scalar_lea.hbm %s9888_s0, 36864  ;;  %p8960_p7 = scmp.lt.u32.totalorder %s9888_s0, %s11318_s24 }
  0xd3   : > { %p8955_p13 = scmp.ne.s32.totalorder %s9888_s0, %s8954_s15  ;;  %p8961_p10 = scmp.lt.u32.totalorder %s8959_s20, %s8954_s15 }
  0xd4   : > { %p8963_p2 = scmp.lt.u32.totalorder %s8954_s15, %s9888_s0 }
  0xd5   : > { %p8957_p3 = pnand %p9897_p1, %p8955_p13  ;;  %p8962_p11 = por %p8961_p10, %p8960_p7 }
  0xd7   : > { %p8958_p5 = pneg %p8957_p3  ;;  %p8964_p12 = por %p8963_p2, %p8962_p11 }
  0xd9   : > { %p8965_p4 = pnand %p8964_p12, %p8958_p5 }
  0xdb   : > { %8968 = shalt.err (!%p8965_p4)
}
  0xdc   : > { %s8969_s13 = scalar_lea.vmem %s9890_s11, 36864  ;;  %s9541_s1 = smov [#allocation6]  }
  0xdd   : > { %p8970_p13 = scmp.ne.s32.totalorder %s9890_s11, %s8969_s13  ;;  %s8974_s22 = sshll.u32 %s9541_s1, 4  ;;  %s8975_s22 = int_to_ptr.vmem [resolvable:$false] %s8974_s22 }
  0xde   : > { %s8976_s18 = scalar_lea.vmem %s8975_s22, 73728  ;;  %p8977_p6 = scmp.lt.s32.totalorder %s9890_s11, %s8975_s22 }
  0xdf   : > { %p8972_p3 = pnand %p8970_p13, %p9897_p1  ;;  %p8978_p8 = scmp.lt.s32.totalorder %s8976_s18, %s8969_s13 }
  0xe1   : > { %p8973_p9 = pneg %p8972_p3  ;;  %p8979_p7 = por %p8978_p8, %p8977_p6 }
  0xe3   : > { %p8980_p10 = pnand %p8979_p7, %p8973_p9 }
  0xe5   : > { %8983 = shalt.err (!%p8980_p10)
}
  0xe6   : > { %s9542_s15 = smov 384   ;;  %s9543_s20 = smov 24  }
  0xe7   : > { %s11320_s10 = scalar_lea.sflag [#allocation7], %s9870_s6  ;;  %s6749_s1 = sshll.u32 %s9877_s23, 2 }
  0xe8   : > { %7808 = dma.hbm_to_vmem [thread:$0]  (!%p9881_p0), %s9888_s0, 36864, %s9890_s11, %s11320_s10, %s9542_s15, %s9542_s15, %s9543_s20  }
  0xe9   : > { %s7418_s22 = sshll.u32 %s9532_s27, 6  ;;  %s11321_s24 = sld [smem:[#allocation62_spill]] }
  0xea   : > { %s764_s26 = scalar_lea.vmem [#allocation9], %s6749_s1  ;;  %s6755_s8 = sshll.u32 %s9877_s23, 1 }
  0xeb   : > { %s772_s21 = sshll.u32 %s764_s26, 4  ;;  %s11268_s2 = scalar_lea.sflag [#allocation10], %s9870_s6  ;;  %s9929_s21 = int_to_ptr.vmem [resolvable:$true] %s772_s21 }
  0xef   : > { %s9927_s28 = scalar_lea.hbm %s11321_s24, %s7418_s22  ;;  %s8989_s15 = scalar_lea.hbm %s11321_s24, 128 }
  0xf0   : > { %s8984_s30 = scalar_lea.hbm %s9927_s28, 64  ;;  %p8990_p9 = scmp.lt.u32.totalorder %s9927_s28, %s11321_s24 }
  0xf1   : > { %p8985_p6 = scmp.ne.s32.totalorder %s9927_s28, %s8984_s30  ;;  %p8991_p4 = scmp.lt.u32.totalorder %s8989_s15, %s8984_s30 }
  0xf2   : > { %p8993_p5 = scmp.lt.u32.totalorder %s8984_s30, %s9927_s28 }
  0xf3   : > { %p8987_p8 = pnand %p8985_p6, %p9897_p1  ;;  %p8992_p12 = por %p8991_p4, %p8990_p9 }
  0xf5   : > { %p8988_p2 = pneg %p8987_p8  ;;  %p8994_p11 = por %p8993_p5, %p8992_p12 }
  0xf7   : > { %p8995_p13 = pnand %p8994_p11, %p8988_p2 }
  0xf9   : > { %8998 = shalt.err (!%p8995_p13)
}
  0xfa   : > { %s8999_s26 = scalar_lea.vmem %s9929_s21, 64  ;;  %s9544_s1 = smov [#allocation9]  }
  0xfb   : > { %p9000_p3 = scmp.ne.s32.totalorder %s9929_s21, %s8999_s26  ;;  %s9004_s22 = sshll.u32 %s9544_s1, 4  ;;  %s9005_s22 = int_to_ptr.vmem [resolvable:$false] %s9004_s22 }
  0xfc   : > { %s9006_s13 = scalar_lea.vmem %s9005_s22, 128  ;;  %p9007_p6 = scmp.lt.s32.totalorder %s9929_s21, %s9005_s22 }
  0xfd   : > { %p9002_p7 = pnand %p9000_p3, %p9897_p1  ;;  %p9008_p8 = scmp.lt.s32.totalorder %s9006_s13, %s8999_s26 }
  0xff   : > { %p9003_p10 = pneg %p9002_p7  ;;  %p9009_p9 = por %p9008_p8, %p9007_p6 }
 0x101   : > { %p9010_p4 = pnand %p9009_p9, %p9003_p10 }
 0x103   : > { %9013 = shalt.err (!%p9010_p4)
}
 0x104   : > { %7814 = dma.hbm_to_vmem [thread:$0]  (!%p9881_p0), %s9927_s28, 64, %s9929_s21, %s11268_s2  }
 0x105   : > { %s7420_s30 = sshll.u32 %s9532_s27, 5  ;;  %s11322_s0 = sld [smem:[#allocation64_spill]] }
 0x106   : > { %s804_s20 = scalar_lea.vmem [#allocation12], %s6755_s8  ;;  %s11267_s26 = scalar_lea.sflag [#allocation13], %s9870_s6 }
 0x107   : > { %s812_s10 = sshll.u32 %s804_s20, 4  ;;  %s813_s10 = int_to_ptr.vmem [resolvable:$true] %s812_s10 }
 0x10b   : > { %s9960_s15 = scalar_lea.hbm %s11322_s0, %s7420_s30  ;;  %s9019_s22 = scalar_lea.hbm %s11322_s0, 64 }
 0x10c   : > { %s9014_s1 = scalar_lea.hbm %s9960_s15, 32  ;;  %p9020_p11 = scmp.lt.u32.totalorder %s9960_s15, %s11322_s0 }
 0x10d   : > { %p9015_p2 = scmp.ne.s32.totalorder %s9960_s15, %s9014_s1  ;;  %p9021_p13 = scmp.lt.u32.totalorder %s9019_s22, %s9014_s1 }
 0x10e   : > { %p9023_p7 = scmp.lt.u32.totalorder %s9014_s1, %s9960_s15 }
 0x10f   : > { %p9017_p12 = pnand %p9015_p2, %p9897_p1  ;;  %p9022_p3 = por %p9021_p13, %p9020_p11 }
 0x111   : > { %p9018_p5 = pneg %p9017_p12  ;;  %p9024_p10 = por %p9023_p7, %p9022_p3 }
 0x113   : > { %p9025_p6 = pnand %p9024_p10, %p9018_p5 }
 0x115   : > { %9028 = shalt.err (!%p9025_p6)
}
 0x116   : > { %s9029_s8 = scalar_lea.vmem %s813_s10, 32  ;;  %s9545_s18 = smov [#allocation12]  }
 0x117   : > { %p9030_p8 = scmp.ne.s32.totalorder %s813_s10, %s9029_s8  ;;  %s9034_s11 = sshll.u32 %s9545_s18, 4  ;;  %s9035_s11 = int_to_ptr.vmem [resolvable:$false] %s9034_s11 }
 0x118   : > { %s9036_s20 = scalar_lea.vmem %s9035_s11, 64  ;;  %p9037_p2 = scmp.lt.s32.totalorder %s813_s10, %s9035_s11 }
 0x119   : > { %p9032_p9 = pnand %p9030_p8, %p9897_p1  ;;  %p9038_p12 = scmp.lt.s32.totalorder %s9036_s20, %s9029_s8 }
 0x11b   : > { %p9033_p4 = pneg %p9032_p9  ;;  %p9039_p0 = por %p9038_p12, %p9037_p2 }
 0x11d   : > { %p9040_p11 = pnand %p9039_p0, %p9033_p4 }
 0x11f   : > { %9043 = shalt.err (!%p9040_p11)
}
 0x120   : > { %p11323_p13 = scmp.ne.s32.totalorder %s11317_s19, 0  ;;  %s6761_s1 = sshll.u32 %s9532_s27, 4 }
 0x121   : > { %s11324_s7 = sld [smem:[#allocation66_spill]]  ;;  %s843_s13 = scalar_lea.vmem [#allocation15], %s9877_s23 }
 0x122   : > { %7820 = dma.hbm_to_vmem [thread:$0]  (!%p11323_p13), %s9960_s15, 32, %s813_s10, %s11267_s26  }
 0x123   : > { %s850_s30 = sshll.u32 %s843_s13, 4  ;;  %s9996_s11 = scalar_lea.hbm %s11218_s9, %s6761_s1  ;;  %s9991_s30 = int_to_ptr.vmem [resolvable:$true] %s850_s30 }
 0x124   : > { %s11271_s15 = scalar_lea.sflag [#allocation16], %s9870_s6 }
 0x127   : > { %s9988_s22 = scalar_lea.hbm %s11324_s7, %s6761_s1  ;;  %s9049_s28 = scalar_lea.hbm %s11324_s7, 32 }
 0x128   : > { %s9044_s10 = scalar_lea.hbm %s9988_s22, 16  ;;  %p9050_p7 = scmp.lt.u32.totalorder %s9988_s22, %s11324_s7 }
 0x129   : > { %p9045_p0 = scmp.ne.s32.totalorder %s9988_s22, %s9044_s10  ;;  %p9051_p10 = scmp.lt.u32.totalorder %s9049_s28, %s9044_s10 }
 0x12a   : > { %p9053_p8 = scmp.lt.u32.totalorder %s9044_s10, %s9988_s22 }
 0x12b   : > { %p9047_p5 = pnand %p9045_p0, %p9897_p1  ;;  %p9052_p6 = por %p9051_p10, %p9050_p7 }
 0x12d   : > { %p9048_p3 = pneg %p9047_p5  ;;  %p9054_p9 = por %p9053_p8, %p9052_p6 }
 0x12f   : > { %p9055_p4 = pnand %p9054_p9, %p9048_p3 }
 0x131   : > { %9058 = shalt.err (!%p9055_p4)
}
 0x132   : > { %s9059_s1 = scalar_lea.vmem %s9991_s30, 16  ;;  %s9546_s13 = smov [#allocation15]  }
 0x133   : > { %p9060_p2 = scmp.ne.s32.totalorder %s9991_s30, %s9059_s1  ;;  %s9064_s8 = sshll.u32 %s9546_s13, 4  ;;  %s9065_s8 = int_to_ptr.vmem [resolvable:$false] %s9064_s8 }
 0x134   : > { %s9066_s2 = scalar_lea.vmem %s9065_s8, 32  ;;  %p9067_p0 = scmp.lt.s32.totalorder %s9991_s30, %s9065_s8 }
 0x135   : > { %p9062_p12 = pnand %p9060_p2, %p9897_p1  ;;  %p9068_p5 = scmp.lt.s32.totalorder %s9066_s2, %s9059_s1 }
 0x137   : > { %p9063_p11 = pneg %p9062_p12  ;;  %p9069_p7 = por %p9068_p5, %p9067_p0 }
 0x139   : > { %p9070_p10 = pnand %p9069_p7, %p9063_p11 }
 0x13b   : > { %9073 = shalt.err (!%p9070_p10)
}
 0x13c   : > { %7826 = dma.hbm_to_vmem [thread:$0]  (!%p11323_p13), %s9988_s22, 16, %s9991_s30, %s11271_s15  }
 0x13d   : > { %s9547_s26 = smov [#allocation3]   ;;  %s9548_s10 = smov [#allocation23]  }
 0x13e   : > { %s587_s18 = sshll.u32 %s9547_s26, 4  ;;  %s621_s20 = sshll.u32 %s9548_s10, 4  ;;  %s588_s18 = int_to_ptr.vmem [resolvable:$true] %s587_s18  ;;  %s10022_s20 = int_to_ptr.vmem [resolvable:$true] %s621_s20 }
 0x13f   : > { %s11325_s1 = sld [smem:[#allocation59_spill]]  ;;  %p11326_p6 = scmp.ne.s32.totalorder %s11304_s4, 0 }
 0x145   : > { %s9074_s13 = scalar_lea.hbm %s11325_s1, 384 }
 0x146   : > { %p9075_p3 = scmp.ne.s32.totalorder %s11325_s1, %s9074_s13  ;;  %p9081_p4 = scmp.lt.u32.totalorder %s9074_s13, %s11325_s1 }
 0x148   : > { %p9077_p8 = pnand %p9075_p3, %p11326_p6 }
 0x14a   : > { %p9078_p9 = pneg %p9077_p8 }
 0x14c   : > { %p9083_p2 = pnand %p9081_p4, %p9078_p9 }
 0x14e   : > { %9086 = shalt.err (!%p9083_p2)
}
 0x14f   : > { %s9087_s30 = scalar_lea.vmem %s588_s18, 384  ;;  %p9095_p5 = scmp.lt.s32.totalorder %s588_s18, %s588_s18 }
 0x150   : > { %p9088_p12 = scmp.ne.s32.totalorder %s588_s18, %s9087_s30  ;;  %p9096_p7 = scmp.lt.s32.totalorder %s9087_s30, %s9087_s30 }
 0x152   : > { %p9090_p11 = pnand %p9088_p12, %p11326_p6  ;;  %p9097_p10 = por %p9096_p7, %p9095_p5 }
 0x154   : > { %p9091_p0 = pneg %p9090_p11 }
 0x156   : > { %p9098_p13 = pnand %p9097_p10, %p9091_p0 }
 0x158   : > { %9101 = shalt.err (!%p9098_p13)
}
 0x159   : > { %p11327_p3 = scmp.ne.s32.totalorder %s11302_s5, 0  ;;  %s11328_s12 = sld [smem:[#allocation70_spill]] }
 0x15b   : > { %7774 = dma.hbm_to_vmem [thread:$0]  (!%p11327_p3), %s11325_s1, 384, %s588_s18, [#allocation4]  }
 0x15f   : > { %s9102_s28 = scalar_lea.hbm %s11328_s12, 1024 }
 0x160   : > { %p9103_p8 = scmp.ne.s32.totalorder %s11328_s12, %s9102_s28  ;;  %p9109_p13 = scmp.lt.u32.totalorder %s9102_s28, %s11328_s12 }
 0x162   : > { %p9105_p9 = pnand %p9103_p8, %p11326_p6 }
 0x164   : > { %p9106_p4 = pneg %p9105_p9 }
 0x166   : > { %p9111_p2 = pnand %p9109_p13, %p9106_p4 }
 0x168   : > { %9114 = shalt.err (!%p9111_p2)
}
 0x169   : > { %s9115_s18 = scalar_lea.vmem %s10022_s20, 1024  ;;  %p9123_p5 = scmp.lt.s32.totalorder %s10022_s20, %s10022_s20 }
 0x16a   : > { %p9116_p12 = scmp.ne.s32.totalorder %s10022_s20, %s9115_s18  ;;  %p9124_p7 = scmp.lt.s32.totalorder %s9115_s18, %s9115_s18 }
 0x16c   : > { %p9118_p11 = pnand %p9116_p12, %p11326_p6  ;;  %p9125_p10 = por %p9124_p7, %p9123_p5 }
 0x16e   : > { %p9119_p0 = pneg %p9118_p11 }
 0x170   : > { %p9126_p8 = pnand %p9125_p10, %p9119_p0 }
 0x172   : > { %9129 = shalt.err (!%p9126_p8)
}
 0x173   : > { %s11329_s30 = smov 4   ;;  %s11330_s26 = smov 64  }
 0x174   : > { %7783 = dma.hbm_to_vmem [thread:$0]  (!%p11327_p3), %s11328_s12, 1024, %s10022_s20, [#allocation22], %s11330_s26, %s11330_s26, %s11329_s30  }
 0x175   : > { %s9549_s21 = smov [#allocation26]   ;;  %s9550_s13 = smov [#allocation29]  }
 0x176   : > { %s645_s28 = sshll.u32 %s9549_s21, 4  ;;  %s669_s8 = sshll.u32 %s9550_s13, 4  ;;  %s646_s28 = int_to_ptr.vmem [resolvable:$true] %s645_s28  ;;  %s10068_s8 = int_to_ptr.vmem [resolvable:$true] %s669_s8 }
 0x177   : > { %s9130_s18 = scalar_lea.hbm %s11223_s14, 1024 }
 0x178   : > { %p9131_p9 = scmp.ne.s32.totalorder %s11223_s14, %s9130_s18  ;;  %p9137_p2 = scmp.lt.u32.totalorder %s9130_s18, %s11223_s14 }
 0x17a   : > { %p9133_p4 = pnand %p9131_p9, %p11326_p6 }
 0x17c   : > { %p9134_p13 = pneg %p9133_p4 }
 0x17e   : > { %p9139_p12 = pnand %p9137_p2, %p9134_p13 }
 0x180   : > { %9142 = shalt.err (!%p9139_p12)
}
 0x181   : > { %s9143_s0 = scalar_lea.vmem %s646_s28, 1024  ;;  %p9151_p7 = scmp.lt.s32.totalorder %s646_s28, %s646_s28 }
 0x182   : > { %p9144_p11 = scmp.ne.s32.totalorder %s646_s28, %s9143_s0  ;;  %p9152_p10 = scmp.lt.s32.totalorder %s9143_s0, %s9143_s0 }
 0x184   : > { %p9146_p0 = pnand %p9144_p11, %p11326_p6  ;;  %p9153_p8 = por %p9152_p10, %p9151_p7 }
 0x186   : > { %p9147_p5 = pneg %p9146_p0 }
 0x188   : > { %p9154_p1 = pnand %p9153_p8, %p9147_p5 }
 0x18a   : > { %9157 = shalt.err (!%p9154_p1)
}
 0x18b   : > { %7789 = dma.hbm_to_vmem [thread:$0]  (!%p11327_p3), %s11223_s14, 1024, %s646_s28, [#allocation25], %s11330_s26, %s11330_s26, %s11329_s30  }
 0x18c   : > { %s9158_s2 = scalar_lea.hbm %s11225_s16, 1024 }
 0x18d   : > { %p9159_p9 = scmp.ne.s32.totalorder %s11225_s16, %s9158_s2  ;;  %p9165_p13 = scmp.lt.u32.totalorder %s9158_s2, %s11225_s16 }
 0x18f   : > { %p9161_p1 = pnand %p9159_p9, %p11326_p6 }
 0x191   : > { %p9162_p4 = pneg %p9161_p1 }
 0x193   : > { %p9167_p2 = pnand %p9165_p13, %p9162_p4 }
 0x195   : > { %9170 = shalt.err (!%p9167_p2)
}
 0x196   : > { %s9171_s28 = scalar_lea.vmem %s10068_s8, 1024  ;;  %p9179_p5 = scmp.lt.s32.totalorder %s10068_s8, %s10068_s8 }
 0x197   : > { %p9172_p12 = scmp.ne.s32.totalorder %s10068_s8, %s9171_s28  ;;  %p9180_p7 = scmp.lt.s32.totalorder %s9171_s28, %s9171_s28 }
 0x199   : > { %p9174_p11 = pnand %p9172_p12, %p11326_p6  ;;  %p9181_p10 = por %p9180_p7, %p9179_p5 }
 0x19b   : > { %p9175_p0 = pneg %p9174_p11 }
 0x19d   : > { %p9182_p8 = pnand %p9181_p10, %p9175_p0 }
 0x19f   : > { %9185 = shalt.err (!%p9182_p8)
}
 0x1a0   : > { %7795 = dma.hbm_to_vmem [thread:$0]  (!%p11327_p3), %s11225_s16, 1024, %s10068_s8, [#allocation28], %s11330_s26, %s11330_s26, %s11329_s30  }
 0x1a1   : > { %s9551_s1 = smov [#allocation32]   ;;  %s9552_s13 = smov [#allocation33]  }
 0x1a2   : > { %s693_s21 = sshll.u32 %s9551_s1, 4  ;;  %s707_s2 = sshll.u32 %s9552_s13, 4  ;;  %s694_s21 = int_to_ptr.vmem [resolvable:$true] %s693_s21  ;;  %s10117_s2 = int_to_ptr.vmem [resolvable:$true] %s707_s2 }
 0x1a3   : > { %s11331_s10 = sld [smem:[#allocation74_spill]] }
 0x1a9   : > { %s9186_s20 = scalar_lea.hbm %s11331_s10, 1024 }
 0x1aa   : > { %p9187_p9 = scmp.ne.s32.totalorder %s11331_s10, %s9186_s20  ;;  %p9193_p13 = scmp.lt.u32.totalorder %s9186_s20, %s11331_s10 }
 0x1ac   : > { %p9189_p1 = pnand %p9187_p9, %p11326_p6 }
 0x1ae   : > { %p9190_p4 = pneg %p9189_p1 }
 0x1b0   : > { %p9195_p2 = pnand %p9193_p13, %p9190_p4 }
 0x1b2   : > { %9198 = shalt.err (!%p9195_p2)
}
 0x1b3   : > { %s9199_s15 = scalar_lea.vmem %s694_s21, 1024  ;;  %p9207_p5 = scmp.lt.s32.totalorder %s694_s21, %s694_s21 }
 0x1b4   : > { %p9200_p12 = scmp.ne.s32.totalorder %s694_s21, %s9199_s15  ;;  %p9208_p7 = scmp.lt.s32.totalorder %s9199_s15, %s9199_s15 }
 0x1b6   : > { %p9202_p11 = pnand %p9200_p12, %p11326_p6  ;;  %p9209_p10 = por %p9208_p7, %p9207_p5 }
 0x1b8   : > { %p9203_p0 = pneg %p9202_p11 }
 0x1ba   : > { %p9210_p8 = pnand %p9209_p10, %p9203_p0 }
 0x1bc   : > { %9213 = shalt.err (!%p9210_p8)
}
 0x1bd   : > { %7801 = dma.hbm_to_vmem [thread:$0]  (!%p11327_p3), %s11331_s10, 1024, %s694_s21, [#allocation31], %s11330_s26, %s11330_s26, %s11329_s30  }
 0x1be   : > { %s11332_s18 = sld [smem:[#allocation75_spill]] }
 0x1c4   : > { %s9214_s20 = scalar_lea.hbm %s11332_s18, 16 }
 0x1c5   : > { %p9215_p9 = scmp.ne.s32.totalorder %s11332_s18, %s9214_s20  ;;  %p9221_p13 = scmp.lt.u32.totalorder %s9214_s20, %s11332_s18 }
 0x1c7   : > { %p9217_p1 = pnand %p9215_p9, %p11326_p6 }
 0x1c9   : > { %p9218_p4 = pneg %p9217_p1 }
 0x1cb   : > { %p9223_p2 = pnand %p9221_p13, %p9218_p4 }
 0x1cd   : > { %9226 = shalt.err (!%p9223_p2)
}
 0x1ce   : > { %s9227_s21 = scalar_lea.vmem %s10117_s2, 16  ;;  %s9234_s7 = scalar_lea.vmem %s10117_s2, 32 }
 0x1cf   : > { %p9228_p12 = scmp.ne.s32.totalorder %s10117_s2, %s9227_s21  ;;  %p9235_p5 = scmp.lt.s32.totalorder %s10117_s2, %s10117_s2 }
 0x1d0   : > { %p9236_p7 = scmp.lt.s32.totalorder %s9234_s7, %s9227_s21 }
 0x1d1   : > { %p9230_p11 = pnand %p9228_p12, %p11326_p6 }
 0x1d2   : > { %p9237_p10 = por %p9236_p7, %p9235_p5 }
 0x1d3   : > { %p9231_p0 = pneg %p9230_p11 }
 0x1d5   : > { %p9238_p8 = pnand %p9237_p10, %p9231_p0 }
 0x1d7   : > { %9241 = shalt.err (!%p9238_p8)
}
 0x1d8   : > { %7804 = dma.hbm_to_vmem [thread:$0]  (!%p11327_p3), %s11332_s18, 16, %s10117_s2, [#allocation34]  }
 0x1d9   : > { %s7699_s4 = smul.u32 1536, %s9877_s23  ;;  %s6752_s20 = sshll.u32 %s9877_s23, 9 }
 0x1da   : > { %s7700_s22 = smul.u32 24576, %s9532_s27  ;;  %s11333_s8 = sld [smem:[#allocation61_spill]] }
 0x1db   : > { %s743_s5 = scalar_lea.vmem [#allocation8], %s7699_s4  ;;  %p11334_p9 = scmp.ne.s32.totalorder %s11319_s17, 0 }
 0x1dc   : > { %s750_s21 = sshll.u32 %s743_s5, 4  ;;  %s10172_s21 = int_to_ptr.vmem [resolvable:$true] %s750_s21 }
 0x1e0   : > { %s10170_s15 = scalar_lea.hbm %s11333_s8, %s7700_s22  ;;  %s9247_s13 = scalar_lea.hbm %s11333_s8, 49152 }
 0x1e1   : > { %s9242_s7 = scalar_lea.hbm %s10170_s15, 24576  ;;  %p9248_p4 = scmp.lt.u32.totalorder %s10170_s15, %s11333_s8 }
 0x1e2   : > { %p9243_p6 = scmp.ne.s32.totalorder %s10170_s15, %s9242_s7  ;;  %p9249_p13 = scmp.lt.u32.totalorder %s9247_s13, %s9242_s7 }
 0x1e3   : > { %p9251_p12 = scmp.lt.u32.totalorder %s9242_s7, %s10170_s15 }
 0x1e4   : > { %p9245_p3 = pnand %p9243_p6, %p11334_p9  ;;  %p9250_p2 = por %p9249_p13, %p9248_p4 }
 0x1e6   : > { %p9246_p1 = pneg %p9245_p3  ;;  %p9252_p11 = por %p9251_p12, %p9250_p2 }
 0x1e8   : > { %p9253_p0 = pnand %p9252_p11, %p9246_p1 }
 0x1ea   : > { %9256 = shalt.err (!%p9253_p0)
}
 0x1eb   : > { %s9257_s4 = scalar_lea.vmem %s10172_s21, 24576  ;;  %s9553_s0 = smov [#allocation8]  }
 0x1ec   : > { %p9258_p5 = scmp.ne.s32.totalorder %s10172_s21, %s9257_s4  ;;  %s9262_s5 = sshll.u32 %s9553_s0, 4  ;;  %s9263_s5 = int_to_ptr.vmem [resolvable:$false] %s9262_s5 }
 0x1ed   : > { %s9264_s2 = scalar_lea.vmem %s9263_s5, 49152  ;;  %p9265_p8 = scmp.lt.s32.totalorder %s10172_s21, %s9263_s5 }
 0x1ee   : > { %p9260_p7 = pnand %p9258_p5, %p11334_p9  ;;  %p9266_p6 = scmp.lt.s32.totalorder %s9264_s2, %s9257_s4 }
 0x1f0   : > { %p9261_p10 = pneg %p9260_p7  ;;  %p9267_p3 = por %p9266_p6, %p9265_p8 }
 0x1f2   : > { %p9268_p4 = pnand %p9267_p3, %p9261_p10 }
 0x1f4   : > { %9271 = shalt.err (!%p9268_p4)
}
 0x1f5   : > { %s9554_s7 = smov 256   ;;  %s9555_s1 = smov 16  }
 0x1f6   : > { %p11335_p1 = scmp.ne.s32.totalorder %s11317_s19, 0  ;;  %s11336_s13 = scalar_lea.sflag [#allocation7], %s9870_s6 }
 0x1f7   : > { %s7419_s28 = sshll.u32 %s9532_s27, 13  ;;  %s783_s22 = scalar_lea.vmem [#allocation11], %s6752_s20 }
 0x1f8   : > { %7811 = dma.hbm_to_vmem [thread:$0]  (!%p11335_p1), %s10170_s15, 24576, %s10172_s21, %s11336_s13, %s9554_s7, %s9554_s7, %s9555_s1  }
 0x1f9   : > { %s790_s0 = sshll.u32 %s783_s22, 4  ;;  %s11337_s2 = sld [smem:[#allocation63_spill]]  ;;  %s10205_s0 = int_to_ptr.vmem [resolvable:$true] %s790_s0 }
 0x1ff   : > { %s11338_s8 = smov %s11337_s2  ;;  %s10203_s10 = scalar_lea.hbm %s11337_s2, %s7419_s28 }
 0x200   : > { %s9272_s12 = scalar_lea.hbm %s10203_s10, 8192  ;;  %s9277_s20 = scalar_lea.hbm %s11338_s8, 16384 }
 0x201   : > { %p9273_p13 = scmp.ne.s32.totalorder %s10203_s10, %s9272_s12  ;;  %p9278_p11 = scmp.lt.u32.totalorder %s10203_s10, %s11338_s8 }
 0x202   : > { %p9279_p0 = scmp.lt.u32.totalorder %s9277_s20, %s9272_s12  ;;  %p9281_p7 = scmp.lt.u32.totalorder %s9272_s12, %s10203_s10 }
 0x203   : > { %p9275_p2 = pnand %p9273_p13, %p11334_p9 }
 0x204   : > { %p9280_p5 = por %p9279_p0, %p9278_p11 }
 0x205   : > { %p9276_p12 = pneg %p9275_p2 }
 0x206   : > { %p9282_p10 = por %p9281_p7, %p9280_p5 }
 0x208   : > { %p9283_p8 = pnand %p9282_p10, %p9276_p12 }
 0x20a   : > { %9286 = shalt.err (!%p9283_p8)
}
 0x20b   : > { %s9287_s13 = scalar_lea.vmem %s10205_s0, 8192  ;;  %s9556_s28 = smov [#allocation11]  }
 0x20c   : > { %p9288_p6 = scmp.ne.s32.totalorder %s10205_s0, %s9287_s13  ;;  %s9292_s22 = sshll.u32 %s9556_s28, 4  ;;  %s9293_s22 = int_to_ptr.vmem [resolvable:$false] %s9292_s22 }
 0x20d   : > { %s9294_s4 = scalar_lea.vmem %s9293_s22, 16384  ;;  %p9295_p13 = scmp.lt.s32.totalorder %s10205_s0, %s9293_s22 }
 0x20e   : > { %p9290_p3 = pnand %p9288_p6, %p11334_p9  ;;  %p9296_p2 = scmp.lt.s32.totalorder %s9294_s4, %s9287_s13 }
 0x210   : > { %p9291_p4 = pneg %p9290_p3  ;;  %p9297_p11 = por %p9296_p2, %p9295_p13 }
 0x212   : > { %p9298_p0 = pnand %p9297_p11, %p9291_p4 }
 0x214   : > { %9301 = shalt.err (!%p9298_p0)
}
 0x215   : > { %s9557_s12 = smov 128   ;;  %s9558_s5 = smov 8  }
 0x216   : > { %s11339_s2 = scalar_lea.sflag [#allocation10], %s9870_s6  ;;  %s6758_s15 = sshll.u32 %s9877_s23, 7 }
 0x217   : > { %7817 = dma.hbm_to_vmem [thread:$0]  (!%p11335_p1), %s10203_s10, 8192, %s10205_s0, %s11339_s2, %s9557_s12, %s9557_s12, %s9558_s5  }
 0x218   : > { %s7421_s21 = sshll.u32 %s9532_s27, 11  ;;  %s11340_s1 = sld [smem:[#allocation65_spill]] }
 0x219   : > { %s823_s28 = scalar_lea.vmem [#allocation14], %s6758_s15  ;;  %s6762_s4 = sshll.u32 %s9877_s23, 6 }
 0x21a   : > { %s830_s22 = sshll.u32 %s823_s28, 4  ;;  %s10238_s22 = int_to_ptr.vmem [resolvable:$true] %s830_s22 }
 0x21e   : > { %s10235_s13 = scalar_lea.hbm %s11340_s1, %s7421_s21  ;;  %s9307_s12 = scalar_lea.hbm %s11340_s1, 4096 }
 0x21f   : > { %s9302_s8 = scalar_lea.hbm %s10235_s13, 2048  ;;  %p9308_p10 = scmp.lt.u32.totalorder %s10235_s13, %s11340_s1 }
 0x220   : > { %p9303_p12 = scmp.ne.s32.totalorder %s10235_s13, %s9302_s8  ;;  %p9309_p8 = scmp.lt.u32.totalorder %s9307_s12, %s9302_s8 }
 0x221   : > { %p9311_p3 = scmp.lt.u32.totalorder %s9302_s8, %s10235_s13 }
 0x222   : > { %p9305_p5 = pnand %p9303_p12, %p11334_p9  ;;  %p9310_p6 = por %p9309_p8, %p9308_p10 }
 0x224   : > { %p9306_p7 = pneg %p9305_p5  ;;  %p9312_p4 = por %p9311_p3, %p9310_p6 }
 0x226   : > { %p9313_p13 = pnand %p9312_p4, %p9306_p7 }
 0x228   : > { %9316 = shalt.err (!%p9313_p13)
}
 0x229   : > { %s9317_s15 = scalar_lea.vmem %s10238_s22, 2048  ;;  %s9559_s21 = smov [#allocation14]  }
 0x22a   : > { %p9318_p2 = scmp.ne.s32.totalorder %s10238_s22, %s9317_s15  ;;  %s9322_s20 = sshll.u32 %s9559_s21, 4  ;;  %s9323_s20 = int_to_ptr.vmem [resolvable:$false] %s9322_s20 }
 0x22b   : > { %s9324_s7 = scalar_lea.vmem %s9323_s20, 4096  ;;  %p9325_p12 = scmp.lt.s32.totalorder %s10238_s22, %s9323_s20 }
 0x22c   : > { %p9320_p11 = pnand %p9318_p2, %p11334_p9  ;;  %p9326_p5 = scmp.lt.s32.totalorder %s9324_s7, %s9317_s15 }
 0x22e   : > { %p9321_p0 = pneg %p9320_p11  ;;  %p9327_p10 = por %p9326_p5, %p9325_p12 }
 0x230   : > { %p9328_p8 = pnand %p9327_p10, %p9321_p0 }
 0x232   : > { %9331 = shalt.err (!%p9328_p8)
}
 0x233   : > { %s11341_s8 = scalar_lea.sflag [#allocation13], %s9870_s6  ;;  %s7422_s28 = sshll.u32 %s9532_s27, 10 }
 0x234   : > { %7823 = dma.hbm_to_vmem [thread:$0]  (!%p11335_p1), %s10235_s13, 2048, %s10238_s22, %s11341_s8, %s11330_s26, %s11330_s26, %s11329_s30  }
 0x235   : > { %s861_s10 = scalar_lea.vmem [#allocation17], %s6762_s4  ;;  %s11342_s2 = sld [smem:[#allocation67_spill]] }
 0x236   : > { %s868_s0 = sshll.u32 %s861_s10, 4  ;;  %s10274_s0 = int_to_ptr.vmem [resolvable:$true] %s868_s0 }
 0x23b   : > { %s11343_s15 = smov %s11342_s2  ;;  %s10272_s21 = scalar_lea.hbm %s11342_s2, %s7422_s28 }
 0x23c   : > { %s9332_s20 = scalar_lea.hbm %s10272_s21, 1024  ;;  %s9337_s4 = scalar_lea.hbm %s11343_s15, 2048 }
 0x23d   : > { %p9333_p7 = scmp.ne.s32.totalorder %s10272_s21, %s9332_s20  ;;  %p9338_p4 = scmp.lt.u32.totalorder %s10272_s21, %s11343_s15 }
 0x23e   : > { %p9339_p13 = scmp.lt.u32.totalorder %s9337_s4, %s9332_s20  ;;  %p9341_p11 = scmp.lt.u32.totalorder %s9332_s20, %s10272_s21 }
 0x23f   : > { %p9335_p6 = pnand %p9333_p7, %p11334_p9 }
 0x240   : > { %p9340_p2 = por %p9339_p13, %p9338_p4 }
 0x241   : > { %p9336_p3 = pneg %p9335_p6 }
 0x242   : > { %p9342_p0 = por %p9341_p11, %p9340_p2 }
 0x244   : > { %p9343_p12 = pnand %p9342_p0, %p9336_p3 }
 0x246   : > { %9346 = shalt.err (!%p9343_p12)
}
 0x247   : > { %s9347_s28 = scalar_lea.vmem %s10274_s0, 1024  ;;  %s9560_s10 = smov [#allocation17]  }
 0x248   : > { %p9348_p5 = scmp.ne.s32.totalorder %s10274_s0, %s9347_s28  ;;  %s9352_s12 = sshll.u32 %s9560_s10, 4  ;;  %s9353_s12 = int_to_ptr.vmem [resolvable:$false] %s9352_s12 }
 0x249   : > { %s9354_s5 = scalar_lea.vmem %s9353_s12, 2048  ;;  %p9355_p7 = scmp.lt.s32.totalorder %s10274_s0, %s9353_s12 }
 0x24a   : > { %p9350_p10 = pnand %p9348_p5, %p11334_p9  ;;  %p9356_p6 = scmp.lt.s32.totalorder %s9354_s5, %s9347_s28 }
 0x24c   : > { %p9351_p8 = pneg %p9350_p10  ;;  %p9357_p4 = por %p9356_p6, %p9355_p7 }
 0x24e   : > { %p9358_p13 = pnand %p9357_p4, %p9351_p8 }
 0x250   : > { %9361 = shalt.err (!%p9358_p13)
}
 0x251   : > { %s11344_s2 = scalar_lea.sflag [#allocation16], %s9870_s6  ;;  %s881_s20 = scalar_lea.vmem [#allocation18], %s9877_s23 }
 0x252   : > { %7829 = dma.hbm_to_vmem [thread:$0]  (!%p11335_p1), %s10272_s21, 1024, %s10274_s0, %s11344_s2, %s11330_s26, %s11330_s26, %s11329_s30  }
 0x253   : > { %s888_s13 = sshll.u32 %s881_s20, 4  ;;  %s879_s22 = scalar_lea.sflag [#allocation19], %s9870_s6  ;;  %s889_s13 = int_to_ptr.vmem [resolvable:$true] %s888_s13 }
 0x254   : > { %s9362_s4 = scalar_lea.hbm %s9996_s11, 16  ;;  %s9367_s28 = scalar_lea.hbm %s11218_s9, 32 }
 0x255   : > { %p9363_p3 = scmp.ne.s32.totalorder %s9996_s11, %s9362_s4  ;;  %p9368_p0 = scmp.lt.u32.totalorder %s9996_s11, %s11218_s9 }
 0x256   : > { %p9369_p12 = scmp.lt.u32.totalorder %s9367_s28, %s9362_s4  ;;  %p9371_p10 = scmp.lt.u32.totalorder %s9362_s4, %s9996_s11 }
 0x257   : > { %p9365_p2 = pnand %p9363_p3, %p11334_p9 }
 0x258   : > { %p9370_p5 = por %p9369_p12, %p9368_p0 }
 0x259   : > { %p9366_p11 = pneg %p9365_p2 }
 0x25a   : > { %p9372_p8 = por %p9371_p10, %p9370_p5 }
 0x25c   : > { %p9373_p7 = pnand %p9372_p8, %p9366_p11 }
 0x25e   : > { %9376 = shalt.err (!%p9373_p7)
}
 0x25f   : > { %s9377_s6 = scalar_lea.vmem %s889_s13, 16  ;;  %s9561_s23 = smov [#allocation18]  }
 0x260   : > { %p9378_p6 = scmp.ne.s32.totalorder %s889_s13, %s9377_s6  ;;  %s9382_s30 = sshll.u32 %s9561_s23, 4  ;;  %s9383_s30 = int_to_ptr.vmem [resolvable:$false] %s9382_s30 }
 0x261   : > { %s9384_s26 = scalar_lea.vmem %s9383_s30, 32  ;;  %p9385_p3 = scmp.lt.s32.totalorder %s889_s13, %s9383_s30 }
 0x262   : > { %p9380_p4 = pnand %p9378_p6, %p11334_p9  ;;  %p9386_p2 = scmp.lt.s32.totalorder %s9384_s26, %s9377_s6 }
 0x264   : > { %p9381_p13 = pneg %p9380_p4  ;;  %p9387_p1 = por %p9386_p2, %p9385_p3 }
 0x266   : > { %p9388_p0 = pnand %p9387_p1, %p9381_p13 }
 0x268   : > { %9391 = shalt.err (!%p9388_p0)
}
 0x269   : > { %p11345_p12 = scmp.ne.s32.totalorder %s11317_s19, 0  ;;  %s11346_s0 = sld [smem:[#allocation54_spill]] }
 0x26b   : > { %7832 = dma.hbm_to_vmem [thread:$0]  (!%p11345_p12), %s9996_s11, 16, %s889_s13, %s879_s22  }
 0x26f   : > { %p11347_p11 = scmp.ne.s32.totalorder %s11346_s0, 0 }
 0x270   : > { %p11348_p5 = scmp.eq.s32.totalorder (!%p11347_p11), %s9700_s29, 0 }
 0x271   : > { %897 = sbr.rel (%p11347_p11) target bundleno = 4142 (0x102e), region = 100 }
 0x278   : > { %9463 = dma.done.wait (%p11348_p5), [#allocation4], 384   ;;  %p11349_p9 = pmov %p11348_p5 }
 0x279   : > { %s10328_s17 = sand.u32 1, %s9700_s29   ;;  %s10331_s21 = sand.u32 1, %s9524_s25  }
 0x27a   : > { %9465 = vsyncadd (%p11349_p9), [#allocation4], 4294966912  ;;  %s7701_s19 = smul.u32 2304, %s10331_s21  ;;  %s904_s11 = scalar_lea.sflag [#allocation7], %s10328_s17 }
 0x27b   : > { %p11350_p1 = scmp.ne.s32.totalorder %s11312_s3, 0 }
 0x27c   : > { %s10335_s5 = scalar_lea.vmem [#allocation6], %s7701_s19 }
 0x27d   : > { %9467 = dma.done.wait (%p11350_p1), %s904_s11, 61440  }
 0x27e   : > { %9469 = vsyncadd (%p11350_p1), %s904_s11, 4294905856  ;;  %s7702_s2 = smul.u32 1536, %s10331_s21  ;;  %s6768_s20 = sshll.u32 %s10331_s21, 2 }
 0x27f   : > { %s922_s22 = scalar_lea.sflag [#allocation10], %s10328_s17  ;;  %s10346_s4 = scalar_lea.vmem [#allocation9], %s6768_s20 }
 0x280   : > { %s10343_s13 = scalar_lea.vmem [#allocation8], %s7702_s2 }
 0x281   : > { %9471 = dma.done.wait (%p11350_p1), %s922_s22, 8256  }
 0x282   : > { %9473 = vsyncadd (%p11350_p1), %s922_s22, 4294959040  ;;  %s6769_s7 = sshll.u32 %s10331_s21, 9  ;;  %s6770_s8 = sshll.u32 %s10331_s21, 1 }
 0x283   : > { %s10354_s28 = scalar_lea.vmem [#allocation11], %s6769_s7  ;;  %s940_s10 = scalar_lea.sflag [#allocation13], %s10328_s17 }
 0x284   : > { %s10357_s12 = scalar_lea.vmem [#allocation12], %s6770_s8 }
 0x285   : > { %9475 = dma.done.wait (%p11350_p1), %s940_s10, 2080  }
 0x286   : > { %9477 = vsyncadd (%p11350_p1), %s940_s10, 4294965216  ;;  %s6771_s6 = sshll.u32 %s10331_s21, 7  ;;  %s958_s30 = scalar_lea.sflag [#allocation16], %s10328_s17 }
 0x287   : > { %s10364_s23 = scalar_lea.vmem [#allocation14], %s6771_s6  ;;  %s960_s26 = scalar_lea.vmem [#allocation15], %s10331_s21 }
 0x288   : > { %9479 = dma.done.wait (%p11350_p1), %s958_s30, 1040  }
 0x289   : > { %9481 = vsyncadd (%p11350_p1), %s958_s30, 4294966256  ;;  %s6772_s0 = sshll.u32 %s10331_s21, 6  ;;  %s975_s11 = scalar_lea.sflag [#allocation19], %s10328_s17 }
 0x28a   : > { %s10373_s19 = scalar_lea.vmem [#allocation17], %s6772_s0  ;;  %s977_s2 = scalar_lea.vmem [#allocation18], %s10331_s21 }
 0x28b   : > { %9483 = dma.done.wait (%p11350_p1), %s975_s11, 16  }
 0x28c   : > { %9485 = vsyncadd (%p11350_p1), %s975_s11, 4294967280  ;;  %p11351_p10 = pmov %p11348_p5 }
 0x28d   : > { %p11352_p8 = pmov %p11348_p5 }
 0x28e   : > { %9487 = dma.done.wait (%p11351_p10), [#allocation19], 1024  }
 0x28f   : > { %9489 = vsyncadd (%p11352_p8), [#allocation19], 4294966272  ;;  %p11353_p7 = pmov %p11348_p5 }
 0x290   : > { %p11354_p6 = pmov %p11348_p5 }
 0x291   : > { %9491 = dma.done.wait (%p11353_p7), [#allocation22], 1040  }
 0x292   : > { %9493 = vsyncadd (%p11354_p6), [#allocation22], 4294966256  ;;  %p11355_p4 = pmov %p11348_p5 }
 0x294   : > { %9495 = dma.done.wait (%p11355_p4), [#allocation25], 1040   ;;  %p11356_p13 = pmov %p11355_p4 }
 0x295   : > { %p11357_p3 = pmov %p11355_p4 }
 0x296   : > { %9497 = vsyncadd (%p11356_p13), [#allocation25], 4294966256 }
 0x297   : > { %9499 = dma.done.wait (%p11357_p3), [#allocation28], 1040   ;;  %p11358_p2 = pmov %p11357_p3 }
 0x299   : > { %9501 = vsyncadd (%p11358_p2), [#allocation28], 4294966256  ;;  %p11359_p0 = pmov %p11358_p2 }
 0x29b   : > { %9503 = dma.done.wait (%p11359_p0), [#allocation31], 1040   ;;  %p11360_p12 = pmov %p11359_p0 }
 0x29c   : > { %p11361_p11 = pmov %p11359_p0 }
 0x29d   : > { %9505 = vsyncadd (%p11360_p12), [#allocation31], 4294966256 }
 0x29e   : > { %9507 = dma.done.wait (%p11361_p11), [#allocation34], 16   ;;  %p11362_p5 = pmov %p11359_p0 }
 0x29f   : > { %v7920_v0 = vld [vmem:[%s10335_s5 + $0x4] ss:$24 sps:$4 sm:$0xff]   ;;  %v7924_v2 = vld [vmem:[%s10335_s5] ss:$24 sps:$4 sm:$0xff]   ;;  %v7926_v4 = vld [vmem:[%s10335_s5 + $0x34] ss:$24 sps:$4 sm:$0xff]  }
 0x2a0   : > { %9509 = vsyncadd (%p11362_p5), [#allocation34], 4294967280  ;;  %v7922_v1 = vld [vmem:[%s10335_s5 + $0xc] ss:$24 sps:$4 sm:$0xff]   ;;  %2867 = vmatprep.subr.bf16.mxu0 %v7920_v0  ;;  %v7925_v3 = vld [vmem:[%s10335_s5 + $0x8] ss:$24 sps:$4 sm:$0xff]  }
 0x2a1   : > { %2990 = vmatprep.subr.bf16.mxu1 %v7922_v1  ;;  %2868 = vmatpush1.bf16.msra.mxu0 %v7924_v2  ;;  %v7928_v5 = vld [vmem:[%s10335_s5 + $0x3c] ss:$24 sps:$4 sm:$0xff]   ;;  %v7930_v6 = vld [vmem:[%s10335_s5 + $0x30] ss:$24 sps:$4 sm:$0xff]   ;;  %v7934_v9 = vld [vmem:[%s10335_s5 + $0x6c] ss:$24 sps:$4 sm:$0xff]  }
 0x2a2   : > { %2991 = vmatpush1.bf16.msra.mxu1 %v7925_v3  ;;  %2869 = vmatprep.subr.bf16.mxu0 %v7926_v4  ;;  %v7931_v7 = vld [vmem:[%s10335_s5 + $0x38] ss:$24 sps:$4 sm:$0xff]   ;;  %v7932_v8 = vld [vmem:[%s10335_s5 + $0x64] ss:$24 sps:$4 sm:$0xff]   ;;  %v7937_v11 = vld [vmem:[%s10335_s5 + $0x68] ss:$24 sps:$4 sm:$0xff]  }
 0x2a3   : > { %2992 = vmatprep.subr.bf16.mxu1 %v7928_v5  ;;  %v7936_v10 = vld [vmem:[%s10335_s5 + $0x60] ss:$24 sps:$4 sm:$0xff]   ;;  %v7938_v12 = vld [vmem:[%s10335_s5 + $0x94] ss:$24 sps:$4 sm:$0xff]   ;;  %v7942_v14 = vld [vmem:[%s10335_s5 + $0x90] ss:$24 sps:$4 sm:$0xff]  }
 0x2a4   : > { %v7940_v13 = vld [vmem:[%s10335_s5 + $0x9c] ss:$24 sps:$4 sm:$0xff]   ;;  %v7943_v15 = vld [vmem:[%s10335_s5 + $0x98] ss:$24 sps:$4 sm:$0xff]   ;;  %v7946_v17 = vld [vmem:[%s10335_s5 + $0xcc] ss:$24 sps:$4 sm:$0xff]  }
 0x2a5   : > { %2870 = vmatpush1.bf16.msra.mxu0 %v7930_v6  ;;  %v7944_v16 = vld [vmem:[%s10335_s5 + $0xc4] ss:$24 sps:$4 sm:$0xff]   ;;  %v7948_v18 = vld [vmem:[%s10335_s5 + $0xc0] ss:$24 sps:$4 sm:$0xff]   ;;  %v7950_v20 = vld [vmem:[%s10335_s5 + $0xf4] ss:$24 sps:$4 sm:$0xff]  }
 0x2a6   : > { %2993 = vmatpush1.bf16.msra.mxu1 %v7931_v7  ;;  %2871 = vmatprep.subr.bf16.mxu0 %v7932_v8  ;;  %v7949_v19 = vld [vmem:[%s10335_s5 + $0xc8] ss:$24 sps:$4 sm:$0xff]   ;;  %v7952_v21 = vld [vmem:[%s10335_s5 + $0xfc] ss:$24 sps:$4 sm:$0xff]   ;;  %v7955_v23 = vld [vmem:[%s10335_s5 + $0xf8] ss:$24 sps:$4 sm:$0xff]  }
 0x2a7   : > { %2994 = vmatprep.subr.bf16.mxu1 %v7934_v9  ;;  %v7954_v22 = vld [vmem:[%s10335_s5 + $0xf0] ss:$24 sps:$4 sm:$0xff]   ;;  %v7956_v24 = vld [vmem:[%s10335_s5 + $0x124] ss:$24 sps:$4 sm:$0xff]   ;;  %v7960_v26 = vld [vmem:[%s10335_s5 + $0x120] ss:$24 sps:$4 sm:$0xff]  }
 0x2a8   : > { %v7958_v25 = vld [vmem:[%s10335_s5 + $0x12c] ss:$24 sps:$4 sm:$0xff]   ;;  %v7961_v27 = vld [vmem:[%s10335_s5 + $0x128] ss:$24 sps:$4 sm:$0xff]   ;;  %v7964_v29 = vld [vmem:[%s10335_s5 + $0x15c] ss:$24 sps:$4 sm:$0xff]  }
 0x2a9   : > { %2872 = vmatpush1.bf16.msra.mxu0 %v7936_v10  ;;  %v7962_v28 = vld [vmem:[%s10335_s5 + $0x154] ss:$24 sps:$4 sm:$0xff]   ;;  %v7966_v30 = vld [vmem:[%s10335_s5 + $0x150] ss:$24 sps:$4 sm:$0xff]   ;;  %v7968_v32 = vld [vmem:[%s10335_s5 + $0x184] ss:$24 sps:$4 sm:$0xff]  }
 0x2aa   : > { %2995 = vmatpush1.bf16.msra.mxu1 %v7937_v11  ;;  %2873 = vmatprep.subr.bf16.mxu0 %v7938_v12  ;;  %v7967_v31 = vld [vmem:[%s10335_s5 + $0x158] ss:$24 sps:$4 sm:$0xff]   ;;  %v7970_v33 = vld [vmem:[%s10335_s5 + $0x18c] ss:$24 sps:$4 sm:$0xff]   ;;  %v7973_v35 = vld [vmem:[%s10335_s5 + $0x188] ss:$24 sps:$4 sm:$0xff]  }
 0x2ab   : > { %2996 = vmatprep.subr.bf16.mxu1 %v7940_v13  ;;  %v7972_v34 = vld [vmem:[%s10335_s5 + $0x180] ss:$24 sps:$4 sm:$0xff]   ;;  %v7974_v36 = vld [vmem:[%s10335_s5 + $0x1b4] ss:$24 sps:$4 sm:$0xff]   ;;  %v7978_v38 = vld [vmem:[%s10335_s5 + $0x1b0] ss:$24 sps:$4 sm:$0xff]  }
 0x2ac   : > { %v7976_v37 = vld [vmem:[%s10335_s5 + $0x1bc] ss:$24 sps:$4 sm:$0xff]   ;;  %v7979_v39 = vld [vmem:[%s10335_s5 + $0x1b8] ss:$24 sps:$4 sm:$0xff]   ;;  %v7982_v41 = vld [vmem:[%s10335_s5 + $0x1ec] ss:$24 sps:$4 sm:$0xff]  }
 0x2ad   : > { %2874 = vmatpush1.bf16.msra.mxu0 %v7942_v14  ;;  %v7980_v40 = vld [vmem:[%s10335_s5 + $0x1e4] ss:$24 sps:$4 sm:$0xff]   ;;  %v7984_v42 = vld [vmem:[%s10335_s5 + $0x1e0] ss:$24 sps:$4 sm:$0xff]   ;;  %v7986_v44 = vld [vmem:[%s10335_s5 + $0x214] ss:$24 sps:$4 sm:$0xff]  }
 0x2ae   : > { %2997 = vmatpush1.bf16.msra.mxu1 %v7943_v15  ;;  %2875 = vmatprep.subr.bf16.mxu0 %v7944_v16  ;;  %v7985_v43 = vld [vmem:[%s10335_s5 + $0x1e8] ss:$24 sps:$4 sm:$0xff]   ;;  %v7988_v45 = vld [vmem:[%s10335_s5 + $0x21c] ss:$24 sps:$4 sm:$0xff]   ;;  %v7991_v49 = vld [vmem:[%s10335_s5 + $0x218] ss:$24 sps:$4 sm:$0xff]  }
 0x2af   : > { %2998 = vmatprep.subr.bf16.mxu1 %v7946_v17  ;;  %v1115_v46 = vld [vmem:[#allocation3] sm:$0xff]  ;;  %v7992_v50 = vld [vmem:[%s10335_s5 + $0x244] ss:$24 sps:$4 sm:$0xff]   ;;  %v7996_v52 = vld [vmem:[%s10335_s5 + $0x240] ss:$24 sps:$4 sm:$0xff]   ;;  %vm9563_vm0 = vmmov 0  }
 0x2b0   : > { %v7990_v47 = vld [vmem:[%s10335_s5 + $0x210] ss:$24 sps:$4 sm:$0xff]   ;;  %v10452_v48 = vcombine.high %v1115_v46, %v1115_v46  ;;  %v7994_v51 = vld [vmem:[%s10335_s5 + $0x24c] ss:$24 sps:$4 sm:$0xff]   ;;  %v8000_v55 = vld [vmem:[%s10335_s5 + $0x27c] ss:$24 sps:$4 sm:$0xff]   ;;  %v10476_v5 = vcombine.low %v1115_v46, %v1115_v46 }
 0x2b1   : > { %2876 = vmatpush1.bf16.msra.mxu0 %v7948_v18  ;;  %v7997_v53 = vld [vmem:[%s10335_s5 + $0x248] ss:$24 sps:$4 sm:$0xff]   ;;  %v7998_v54 = vld [vmem:[%s10335_s5 + $0x274] ss:$24 sps:$4 sm:$0xff]   ;;  %v8003_v57 = vld [vmem:[%s10335_s5 + $0x278] ss:$24 sps:$4 sm:$0xff]  }
 0x2b2   : > { %2999 = vmatpush1.bf16.msra.mxu1 %v7949_v19  ;;  %2877 = vmatprep.subr.bf16.mxu0 %v7950_v20  ;;  %v8002_v56 = vld [vmem:[%s10335_s5 + $0x270] ss:$24 sps:$4 sm:$0xff]   ;;  %v8004_v58 = vld [vmem:[%s10335_s5 + $0x2a4] ss:$24 sps:$4 sm:$0xff]   ;;  %v8008_v60 = vld [vmem:[%s10335_s5 + $0x2a0] ss:$24 sps:$4 sm:$0xff]  }
 0x2b3   : > { %3000 = vmatprep.subr.bf16.mxu1 %v7952_v21  ;;  %2899 = vmatprep.mubr.bf16.mxu0 %v10452_v48  ;;  %v8006_v59 = vld [vmem:[%s10335_s5 + $0x2ac] ss:$24 sps:$4 sm:$0xff]   ;;  %v8009_v61 = vld [vmem:[%s10335_s5 + $0x2a8] ss:$24 sps:$4 sm:$0xff]   ;;  %v8012_v63 = vld [vmem:[%s10335_s5 + $0x2dc] ss:$24 sps:$4 sm:$0xff]  }
 0x2b4   : > { %3022 = vmatprep.mubr.bf16.mxu1 %v10452_v48  ;;  %v8010_v62 = vld [vmem:[%s10335_s5 + $0x2d4] ss:$24 sps:$4 sm:$0xff]   ;;  %v8014_v0 = vld [vmem:[%s10335_s5 + $0x2d0] ss:$24 sps:$4 sm:$0xff]   ;;  %v8019_v2 = vld [vmem:[%s10335_s5 + $0x304] ss:$24 sps:$4 sm:$0xff]  }
 0x2b5   : > { %2878 = vmatpush1.bf16.msra.mxu0 %v7954_v22  ;;  %v8015_v1 = vld [vmem:[%s10335_s5 + $0x2d8] ss:$24 sps:$4 sm:$0xff]   ;;  %v8022_v3 = vld [vmem:[%s10335_s5 + $0x30c] ss:$24 sps:$4 sm:$0xff]   ;;  %v8020_v6 = vld [vmem:[%s10335_s5 + $0x308] ss:$24 sps:$4 sm:$0xff]  }
 0x2b6   : > { %3001 = vmatpush1.bf16.msra.mxu1 %v7955_v23  ;;  %2879 = vmatprep.subr.bf16.mxu0 %v7956_v24  ;;  %v8017_v4 = vld [vmem:[%s10335_s5 + $0x300] ss:$24 sps:$4 sm:$0xff]   ;;  %v8026_v7 = vld [vmem:[%s10335_s5 + $0x334] ss:$24 sps:$4 sm:$0xff]   ;;  %v8024_v9 = vld [vmem:[%s10335_s5 + $0x330] ss:$24 sps:$4 sm:$0xff]  }
 0x2b7   : > { %3002 = vmatprep.subr.bf16.mxu1 %v7958_v25  ;;  %v8029_v8 = vld [vmem:[%s10335_s5 + $0x33c] ss:$24 sps:$4 sm:$0xff]   ;;  %v8027_v10 = vld [vmem:[%s10335_s5 + $0x338] ss:$24 sps:$4 sm:$0xff]   ;;  %v8035_v12 = vld [vmem:[%s10335_s5 + $0x36c] ss:$24 sps:$4 sm:$0xff]  }
 0x2b8   : > { %v8032_v11 = vld [vmem:[%s10335_s5 + $0x364] ss:$24 sps:$4 sm:$0xff]   ;;  %v8030_v13 = vld [vmem:[%s10335_s5 + $0x360] ss:$24 sps:$4 sm:$0xff]   ;;  %v8038_v15 = vld [vmem:[%s10335_s5 + $0x394] ss:$24 sps:$4 sm:$0xff]  }
 0x2b9   : > { %2880 = vmatpush1.bf16.msra.mxu0 %v7960_v26  ;;  %v8033_v14 = vld [vmem:[%s10335_s5 + $0x368] ss:$24 sps:$4 sm:$0xff]   ;;  %v8041_v16 = vld [vmem:[%s10335_s5 + $0x39c] ss:$24 sps:$4 sm:$0xff]   ;;  %v8039_v18 = vld [vmem:[%s10335_s5 + $0x398] ss:$24 sps:$4 sm:$0xff]  }
 0x2ba   : > { %3003 = vmatpush1.bf16.msra.mxu1 %v7961_v27  ;;  %2881 = vmatprep.subr.bf16.mxu0 %v7962_v28  ;;  %v8036_v17 = vld [vmem:[%s10335_s5 + $0x390] ss:$24 sps:$4 sm:$0xff]   ;;  %v8044_v19 = vld [vmem:[%s10335_s5 + $0x3c4] ss:$24 sps:$4 sm:$0xff]   ;;  %v8042_v21 = vld [vmem:[%s10335_s5 + $0x3c0] ss:$24 sps:$4 sm:$0xff]  }
 0x2bb   : > { %3004 = vmatprep.subr.bf16.mxu1 %v7964_v29  ;;  %v8047_v20 = vld [vmem:[%s10335_s5 + $0x3cc] ss:$24 sps:$4 sm:$0xff]   ;;  %v8045_v22 = vld [vmem:[%s10335_s5 + $0x3c8] ss:$24 sps:$4 sm:$0xff]   ;;  %v8053_v24 = vld [vmem:[%s10335_s5 + $0x3fc] ss:$24 sps:$4 sm:$0xff]  }
 0x2bc   : > { %v8050_v23 = vld [vmem:[%s10335_s5 + $0x3f4] ss:$24 sps:$4 sm:$0xff]   ;;  %v8048_v25 = vld [vmem:[%s10335_s5 + $0x3f0] ss:$24 sps:$4 sm:$0xff]   ;;  %v8056_v27 = vld [vmem:[%s10335_s5 + $0x424] ss:$24 sps:$4 sm:$0xff]  }
 0x2bd   : > { %2882 = vmatpush1.bf16.msra.mxu0 %v7966_v30  ;;  %v8051_v26 = vld [vmem:[%s10335_s5 + $0x3f8] ss:$24 sps:$4 sm:$0xff]   ;;  %v8059_v28 = vld [vmem:[%s10335_s5 + $0x42c] ss:$24 sps:$4 sm:$0xff]   ;;  %s7351_s3 = sshll.u32 %s9700_s29, 3  ;;  %p7361_p9 = scmp.ne.s32.totalorder %s9700_s29, 1 }
 0x2be   : > { %3005 = vmatpush1.bf16.msra.mxu1 %v7967_v31  ;;  %2883 = vmatprep.subr.bf16.mxu0 %v7968_v32  ;;  %v10503_v29 = vld [vmem:[#allocation3 + $0x8] sm:$0xff]  ;;  %v8054_v31 = vld [vmem:[%s10335_s5 + $0x420] ss:$24 sps:$4 sm:$0xff]   ;;  %v8083_v46 = vld [vmem:[%s10335_s5 + $0x4ec] ss:$24 sps:$4 sm:$0xff]   ;;  %s5328_s17 = scalar_lea.vmem [#allocation2], %s7351_s3 }
 0x2bf   : > { %3006 = vmatprep.subr.bf16.mxu1 %v7970_v33  ;;  %v10507_v30 = vcombine.high %v10503_v29, %v10503_v29  ;;  %v8057_v32 = vld [vmem:[%s10335_s5 + $0x428] ss:$24 sps:$4 sm:$0xff]   ;;  %v8062_v33 = vld [vmem:[%s10335_s5 + $0x454] ss:$24 sps:$4 sm:$0xff]   ;;  %vm9565_vm1 = vmmov (!%p7361_p9), 0   ;;  %vm5453_vm2 = vcmask (!%p7361_p9), 1043456  }
 0x2c0   : > { %vm5789_vm3 = vcmask (!%p7361_p9), 523264   ;;  %vm5867_vm4 = vcmask (!%p7361_p9), 64512  }
 0x2c1   : > { %2884 = vmatpush1.bf16.msra.mxu0 %v7972_v34  ;;  %v8065_v34 = vld [vmem:[%s10335_s5 + $0x45c] ss:$24 sps:$4 sm:$0xff]  }
 0x2c2   : > { %3007 = vmatpush1.bf16.msra.mxu1 %v7973_v35  ;;  %2885 = vmatprep.subr.bf16.mxu0 %v7974_v36  ;;  %v8060_v35 = vld [vmem:[%s10335_s5 + $0x450] ss:$24 sps:$4 sm:$0xff]  }
 0x2c3   : > { %3008 = vmatprep.subr.bf16.mxu1 %v7976_v37  ;;  %v8063_v36 = vld [vmem:[%s10335_s5 + $0x458] ss:$24 sps:$4 sm:$0xff]   ;;  %v8068_v37 = vld [vmem:[%s10335_s5 + $0x484] ss:$24 sps:$4 sm:$0xff]  }
 0x2c5   : > { %2886 = vmatpush1.bf16.msra.mxu0 %v7978_v38  ;;  %v8071_v38 = vld [vmem:[%s10335_s5 + $0x48c] ss:$24 sps:$4 sm:$0xff]  }
 0x2c6   : > { %3009 = vmatpush1.bf16.msra.mxu1 %v7979_v39  ;;  %2887 = vmatprep.subr.bf16.mxu0 %v7980_v40  ;;  %v8066_v39 = vld [vmem:[%s10335_s5 + $0x480] ss:$24 sps:$4 sm:$0xff]  }
 0x2c7   : > { %3010 = vmatprep.subr.bf16.mxu1 %v7982_v41  ;;  %v8069_v40 = vld [vmem:[%s10335_s5 + $0x488] ss:$24 sps:$4 sm:$0xff]   ;;  %v8074_v41 = vld [vmem:[%s10335_s5 + $0x4b4] ss:$24 sps:$4 sm:$0xff]  }
 0x2c9   : > { %2888 = vmatpush1.bf16.msra.mxu0 %v7984_v42  ;;  %v8077_v42 = vld [vmem:[%s10335_s5 + $0x4bc] ss:$24 sps:$4 sm:$0xff]  }
 0x2ca   : > { %3011 = vmatpush1.bf16.msra.mxu1 %v7985_v43  ;;  %2889 = vmatprep.subr.bf16.mxu0 %v7986_v44  ;;  %v8072_v43 = vld [vmem:[%s10335_s5 + $0x4b0] ss:$24 sps:$4 sm:$0xff]  }
 0x2cb   : > { %3012 = vmatprep.subr.bf16.mxu1 %v7988_v45  ;;  %v8075_v44 = vld [vmem:[%s10335_s5 + $0x4b8] ss:$24 sps:$4 sm:$0xff]   ;;  %v8080_v45 = vld [vmem:[%s10335_s5 + $0x4e4] ss:$24 sps:$4 sm:$0xff]  }
 0x2cd   : > { %2890 = vmatpush1.bf16.msra.mxu0 %v7990_v47  ;;  %v8078_v47 = vld [vmem:[%s10335_s5 + $0x4e0] ss:$24 sps:$4 sm:$0xff]  }
 0x2ce   : > { %3013 = vmatpush1.bf16.msra.mxu1 %v7991_v49  ;;  %2891 = vmatprep.subr.bf16.mxu0 %v7992_v50  ;;  %v8081_v49 = vld [vmem:[%s10335_s5 + $0x4e8] ss:$24 sps:$4 sm:$0xff]   ;;  %v8086_v50 = vld [vmem:[%s10335_s5 + $0x514] ss:$24 sps:$4 sm:$0xff]  }
 0x2cf   : > { %3014 = vmatprep.subr.bf16.mxu1 %v7994_v51  ;;  %v8089_v51 = vld [vmem:[%s10335_s5 + $0x51c] ss:$24 sps:$4 sm:$0xff]  }
 0x2d1   : > { %2892 = vmatpush1.bf16.msra.mxu0 %v7996_v52  ;;  %v8084_v52 = vld [vmem:[%s10335_s5 + $0x510] ss:$24 sps:$4 sm:$0xff]  }
 0x2d2   : > { %3015 = vmatpush1.bf16.msra.mxu1 %v7997_v53  ;;  %2893 = vmatprep.subr.bf16.mxu0 %v7998_v54  ;;  %v8087_v53 = vld [vmem:[%s10335_s5 + $0x518] ss:$24 sps:$4 sm:$0xff]   ;;  %v8092_v54 = vld [vmem:[%s10335_s5 + $0x544] ss:$24 sps:$4 sm:$0xff]  }
 0x2d3   : > { %3016 = vmatprep.subr.bf16.mxu1 %v8000_v55  ;;  %v8095_v55 = vld [vmem:[%s10335_s5 + $0x54c] ss:$24 sps:$4 sm:$0xff]  }
 0x2d5   : > { %2894 = vmatpush1.bf16.msra.mxu0 %v8002_v56  ;;  %v8090_v56 = vld [vmem:[%s10335_s5 + $0x540] ss:$24 sps:$4 sm:$0xff]  }
 0x2d6   : > { %3017 = vmatpush1.bf16.msra.mxu1 %v8003_v57  ;;  %2895 = vmatprep.subr.bf16.mxu0 %v8004_v58  ;;  %v8093_v57 = vld [vmem:[%s10335_s5 + $0x548] ss:$24 sps:$4 sm:$0xff]   ;;  %v8098_v58 = vld [vmem:[%s10335_s5 + $0x574] ss:$24 sps:$4 sm:$0xff]  }
 0x2d7   : > { %3018 = vmatprep.subr.bf16.mxu1 %v8006_v59  ;;  %v8101_v59 = vld [vmem:[%s10335_s5 + $0x57c] ss:$24 sps:$4 sm:$0xff]  }
 0x2d9   : > { %2896 = vmatpush1.bf16.msra.mxu0 %v8008_v60  ;;  %v8096_v60 = vld [vmem:[%s10335_s5 + $0x570] ss:$24 sps:$4 sm:$0xff]  }
 0x2da   : > { %3019 = vmatpush1.bf16.msra.mxu1 %v8009_v61  ;;  %2897 = vmatprep.subr.bf16.mxu0 %v8010_v62  ;;  %v8099_v61 = vld [vmem:[%s10335_s5 + $0x578] ss:$24 sps:$4 sm:$0xff]   ;;  %v8104_v62 = vld [vmem:[%s10335_s5 + $0x5a4] ss:$24 sps:$4 sm:$0xff]  }
 0x2db   : > { %3020 = vmatprep.subr.bf16.mxu1 %v8012_v63  ;;  %v8107_v63 = vld [vmem:[%s10335_s5 + $0x5ac] ss:$24 sps:$4 sm:$0xff]  }
 0x2dd   : > { %2898 = vmatpush1.bf16.msra.mxu0 %v8014_v0  ;;  %v8102_v0 = vld [vmem:[%s10335_s5 + $0x5a0] ss:$24 sps:$4 sm:$0xff]  }
 0x2de   : > { %3021 = vmatpush1.bf16.msra.mxu1 %v8015_v1  ;;  %2908 = vmatprep.subr.bf16.mxu0 %v8019_v2  ;;  %v8105_v1 = vld [vmem:[%s10335_s5 + $0x5a8] ss:$24 sps:$4 sm:$0xff]   ;;  %v8110_v2 = vld [vmem:[%s10335_s5 + $0x5d4] ss:$24 sps:$4 sm:$0xff]  }
 0x2df   : > { %3031 = vmatprep.subr.bf16.mxu1 %v8022_v3  ;;  %v8113_v3 = vld [vmem:[%s10335_s5 + $0x5dc] ss:$24 sps:$4 sm:$0xff]  }
 0x2e0   : > { %2900 = vmatmul.mubr.bf16.vlgmr.msra.gmra.mrb[0].mxu0 %v10476_v5 }
 0x2e1   : > { %3023 = vmatmul.mubr.bf16.vlgmr.msra.gmra.mrb[0].mxu1 %v10476_v5  ;;  %2909 = vmatpush1.bf16.msra.mxu0 %v8017_v4  ;;  %v8108_v4 = vld [vmem:[%s10335_s5 + $0x5d0] ss:$24 sps:$4 sm:$0xff]  }
 0x2e2   : > { %3032 = vmatpush1.bf16.msra.mxu1 %v8020_v6  ;;  %2910 = vmatprep.subr.bf16.mxu0 %v8026_v7  ;;  %v8111_v6 = vld [vmem:[%s10335_s5 + $0x5d8] ss:$24 sps:$4 sm:$0xff]   ;;  %v8118_v7 = vld [vmem:[%s10335_s5 + $0x604] ss:$24 sps:$4 sm:$0xff]  }
 0x2e3   : > { %3033 = vmatprep.subr.bf16.mxu1 %v8029_v8  ;;  %2940 = vmatprep.mubr.bf16.mxu0 %v10507_v30  ;;  %v8121_v8 = vld [vmem:[%s10335_s5 + $0x60c] ss:$24 sps:$4 sm:$0xff]  }
 0x2e4   : > { %3063 = vmatprep.mubr.bf16.mxu1 %v10507_v30 }
 0x2e5   : > { %2911 = vmatpush1.bf16.msra.mxu0 %v8024_v9  ;;  %v10553_v9 = vcombine.low %v10503_v29, %v10503_v29  ;;  %v8143_v29 = vld [vmem:[%s10335_s5 + $0x6c8] ss:$24 sps:$4 sm:$0xff]  }
 0x2e6   : > { %3034 = vmatpush1.bf16.msra.mxu1 %v8027_v10  ;;  %2912 = vmatprep.subr.bf16.mxu0 %v8032_v11  ;;  %v8116_v10 = vld [vmem:[%s10335_s5 + $0x600] ss:$24 sps:$4 sm:$0xff]  }
 0x2e7   : > { %3035 = vmatprep.subr.bf16.mxu1 %v8035_v12  ;;  %v8119_v11 = vld [vmem:[%s10335_s5 + $0x608] ss:$24 sps:$4 sm:$0xff]   ;;  %v8124_v12 = vld [vmem:[%s10335_s5 + $0x634] ss:$24 sps:$4 sm:$0xff]  }
 0x2e9   : > { %2913 = vmatpush1.bf16.msra.mxu0 %v8030_v13  ;;  %v10558_v13 = vld [vmem:[#allocation3 + $0x10] sm:$0xff] }
 0x2ea   : > { %3036 = vmatpush1.bf16.msra.mxu1 %v8033_v14  ;;  %2914 = vmatprep.subr.bf16.mxu0 %v8038_v15  ;;  %v8127_v14 = vld [vmem:[%s10335_s5 + $0x63c] ss:$24 sps:$4 sm:$0xff]   ;;  %v10563_v15 = vcombine.high %v10558_v13, %v10558_v13 }
 0x2eb   : > { %3037 = vmatprep.subr.bf16.mxu1 %v8041_v16  ;;  %v8122_v16 = vld [vmem:[%s10335_s5 + $0x630] ss:$24 sps:$4 sm:$0xff]  }
 0x2ed   : > { %2915 = vmatpush1.bf16.msra.mxu0 %v8036_v17  ;;  %v8125_v17 = vld [vmem:[%s10335_s5 + $0x638] ss:$24 sps:$4 sm:$0xff]  }
 0x2ee   : > { %3038 = vmatpush1.bf16.msra.mxu1 %v8039_v18  ;;  %2916 = vmatprep.subr.bf16.mxu0 %v8044_v19  ;;  %v8130_v18 = vld [vmem:[%s10335_s5 + $0x664] ss:$24 sps:$4 sm:$0xff]  }
 0x2ef   : > { %3039 = vmatprep.subr.bf16.mxu1 %v8047_v20  ;;  %v8133_v19 = vld [vmem:[%s10335_s5 + $0x66c] ss:$24 sps:$4 sm:$0xff]   ;;  %v8128_v20 = vld [vmem:[%s10335_s5 + $0x660] ss:$24 sps:$4 sm:$0xff]  }
 0x2f1   : > { %2917 = vmatpush1.bf16.msra.mxu0 %v8042_v21  ;;  %v8131_v21 = vld [vmem:[%s10335_s5 + $0x668] ss:$24 sps:$4 sm:$0xff]  }
 0x2f2   : > { %3040 = vmatpush1.bf16.msra.mxu1 %v8045_v22  ;;  %2918 = vmatprep.subr.bf16.mxu0 %v8050_v23  ;;  %v8136_v22 = vld [vmem:[%s10335_s5 + $0x694] ss:$24 sps:$4 sm:$0xff]  }
 0x2f3   : > { %3041 = vmatprep.subr.bf16.mxu1 %v8053_v24  ;;  %v8139_v23 = vld [vmem:[%s10335_s5 + $0x69c] ss:$24 sps:$4 sm:$0xff]   ;;  %v8134_v24 = vld [vmem:[%s10335_s5 + $0x690] ss:$24 sps:$4 sm:$0xff]  }
 0x2f5   : > { %2919 = vmatpush1.bf16.msra.mxu0 %v8048_v25  ;;  %v8137_v25 = vld [vmem:[%s10335_s5 + $0x698] ss:$24 sps:$4 sm:$0xff]  }
 0x2f6   : > { %3042 = vmatpush1.bf16.msra.mxu1 %v8051_v26  ;;  %2920 = vmatprep.subr.bf16.mxu0 %v8056_v27  ;;  %v8142_v26 = vld [vmem:[%s10335_s5 + $0x6c4] ss:$24 sps:$4 sm:$0xff]  }
 0x2f7   : > { %3043 = vmatprep.subr.bf16.mxu1 %v8059_v28  ;;  %v8145_v27 = vld [vmem:[%s10335_s5 + $0x6cc] ss:$24 sps:$4 sm:$0xff]   ;;  %v8140_v28 = vld [vmem:[%s10335_s5 + $0x6c0] ss:$24 sps:$4 sm:$0xff]  }
 0x2f9   : > { %2921 = vmatpush1.bf16.msra.mxu0 %v8054_v31  ;;  %v8148_v31 = vld [vmem:[%s10335_s5 + $0x6f4] ss:$24 sps:$4 sm:$0xff]  }
 0x2fa   : > { %3044 = vmatpush1.bf16.msra.mxu1 %v8057_v32  ;;  %2922 = vmatprep.subr.bf16.mxu0 %v8062_v33  ;;  %v8151_v32 = vld [vmem:[%s10335_s5 + $0x6fc] ss:$24 sps:$4 sm:$0xff]   ;;  %v8146_v33 = vld [vmem:[%s10335_s5 + $0x6f0] ss:$24 sps:$4 sm:$0xff]  }
 0x2fb   : > { %3045 = vmatprep.subr.bf16.mxu1 %v8065_v34  ;;  %v8149_v34 = vld [vmem:[%s10335_s5 + $0x6f8] ss:$24 sps:$4 sm:$0xff]  }
 0x2fd   : > { %2923 = vmatpush1.bf16.msra.mxu0 %v8060_v35  ;;  %v8154_v35 = vld [vmem:[%s10335_s5 + $0x724] ss:$24 sps:$4 sm:$0xff]  }
 0x2fe   : > { %3046 = vmatpush1.bf16.msra.mxu1 %v8063_v36  ;;  %2924 = vmatprep.subr.bf16.mxu0 %v8068_v37  ;;  %v8157_v36 = vld [vmem:[%s10335_s5 + $0x72c] ss:$24 sps:$4 sm:$0xff]   ;;  %v8152_v37 = vld [vmem:[%s10335_s5 + $0x720] ss:$24 sps:$4 sm:$0xff]  }
 0x2ff   : > { %3047 = vmatprep.subr.bf16.mxu1 %v8071_v38  ;;  %v8155_v38 = vld [vmem:[%s10335_s5 + $0x728] ss:$24 sps:$4 sm:$0xff]  }
 0x301   : > { %2925 = vmatpush1.bf16.msra.mxu0 %v8066_v39  ;;  %v8160_v39 = vld [vmem:[%s10335_s5 + $0x754] ss:$24 sps:$4 sm:$0xff]  }
 0x302   : > { %3048 = vmatpush1.bf16.msra.mxu1 %v8069_v40  ;;  %2926 = vmatprep.subr.bf16.mxu0 %v8074_v41  ;;  %v8163_v40 = vld [vmem:[%s10335_s5 + $0x75c] ss:$24 sps:$4 sm:$0xff]   ;;  %v8158_v41 = vld [vmem:[%s10335_s5 + $0x750] ss:$24 sps:$4 sm:$0xff]  }
 0x303   : > { %3049 = vmatprep.subr.bf16.mxu1 %v8077_v42  ;;  %v8161_v42 = vld [vmem:[%s10335_s5 + $0x758] ss:$24 sps:$4 sm:$0xff]  }
 0x305   : > { %2927 = vmatpush1.bf16.msra.mxu0 %v8072_v43  ;;  %v8166_v43 = vld [vmem:[%s10335_s5 + $0x784] ss:$24 sps:$4 sm:$0xff]  }
 0x306   : > { %3050 = vmatpush1.bf16.msra.mxu1 %v8075_v44  ;;  %2928 = vmatprep.subr.bf16.mxu0 %v8080_v45  ;;  %v8169_v44 = vld [vmem:[%s10335_s5 + $0x78c] ss:$24 sps:$4 sm:$0xff]   ;;  %v8164_v45 = vld [vmem:[%s10335_s5 + $0x780] ss:$24 sps:$4 sm:$0xff]  }
 0x307   : > { %3051 = vmatprep.subr.bf16.mxu1 %v8083_v46  ;;  %v8167_v46 = vld [vmem:[%s10335_s5 + $0x788] ss:$24 sps:$4 sm:$0xff]  }
 0x309   : > { %2929 = vmatpush1.bf16.msra.mxu0 %v8078_v47  ;;  %v8172_v47 = vld [vmem:[%s10335_s5 + $0x7b4] ss:$24 sps:$4 sm:$0xff]  }
 0x30a   : > { %3052 = vmatpush1.bf16.msra.mxu1 %v8081_v49  ;;  %2930 = vmatprep.subr.bf16.mxu0 %v8086_v50  ;;  %v8175_v49 = vld [vmem:[%s10335_s5 + $0x7bc] ss:$24 sps:$4 sm:$0xff]   ;;  %v8170_v50 = vld [vmem:[%s10335_s5 + $0x7b0] ss:$24 sps:$4 sm:$0xff]  }
 0x30b   : > { %3053 = vmatprep.subr.bf16.mxu1 %v8089_v51  ;;  %v8173_v51 = vld [vmem:[%s10335_s5 + $0x7b8] ss:$24 sps:$4 sm:$0xff]  }
 0x30d   : > { %2931 = vmatpush1.bf16.msra.mxu0 %v8084_v52  ;;  %v8178_v52 = vld [vmem:[%s10335_s5 + $0x7e4] ss:$24 sps:$4 sm:$0xff]  }
 0x30e   : > { %3054 = vmatpush1.bf16.msra.mxu1 %v8087_v53  ;;  %2932 = vmatprep.subr.bf16.mxu0 %v8092_v54  ;;  %v8181_v53 = vld [vmem:[%s10335_s5 + $0x7ec] ss:$24 sps:$4 sm:$0xff]   ;;  %v8176_v54 = vld [vmem:[%s10335_s5 + $0x7e0] ss:$24 sps:$4 sm:$0xff]  }
 0x30f   : > { %3055 = vmatprep.subr.bf16.mxu1 %v8095_v55  ;;  %v8179_v55 = vld [vmem:[%s10335_s5 + $0x7e8] ss:$24 sps:$4 sm:$0xff]  }
 0x311   : > { %2933 = vmatpush1.bf16.msra.mxu0 %v8090_v56  ;;  %v8184_v56 = vld [vmem:[%s10335_s5 + $0x814] ss:$24 sps:$4 sm:$0xff]  }
 0x312   : > { %3056 = vmatpush1.bf16.msra.mxu1 %v8093_v57  ;;  %2934 = vmatprep.subr.bf16.mxu0 %v8098_v58  ;;  %v8187_v57 = vld [vmem:[%s10335_s5 + $0x81c] ss:$24 sps:$4 sm:$0xff]   ;;  %v8182_v58 = vld [vmem:[%s10335_s5 + $0x810] ss:$24 sps:$4 sm:$0xff]  }
 0x313   : > { %3057 = vmatprep.subr.bf16.mxu1 %v8101_v59  ;;  %v8185_v59 = vld [vmem:[%s10335_s5 + $0x818] ss:$24 sps:$4 sm:$0xff]  }
 0x315   : > { %2935 = vmatpush1.bf16.msra.mxu0 %v8096_v60  ;;  %v8190_v60 = vld [vmem:[%s10335_s5 + $0x844] ss:$24 sps:$4 sm:$0xff]  }
 0x316   : > { %3058 = vmatpush1.bf16.msra.mxu1 %v8099_v61  ;;  %2936 = vmatprep.subr.bf16.mxu0 %v8104_v62  ;;  %v8193_v61 = vld [vmem:[%s10335_s5 + $0x84c] ss:$24 sps:$4 sm:$0xff]   ;;  %v8188_v62 = vld [vmem:[%s10335_s5 + $0x840] ss:$24 sps:$4 sm:$0xff]  }
 0x317   : > { %3059 = vmatprep.subr.bf16.mxu1 %v8107_v63  ;;  %v8191_v63 = vld [vmem:[%s10335_s5 + $0x848] ss:$24 sps:$4 sm:$0xff]  }
 0x319   : > { %2937 = vmatpush1.bf16.msra.mxu0 %v8102_v0  ;;  %v8196_v0 = vld [vmem:[%s10335_s5 + $0x874] ss:$24 sps:$4 sm:$0xff]  }
 0x31a   : > { %3060 = vmatpush1.bf16.msra.mxu1 %v8105_v1  ;;  %2938 = vmatprep.subr.bf16.mxu0 %v8110_v2  ;;  %v8199_v1 = vld [vmem:[%s10335_s5 + $0x87c] ss:$24 sps:$4 sm:$0xff]   ;;  %v8194_v2 = vld [vmem:[%s10335_s5 + $0x870] ss:$24 sps:$4 sm:$0xff]  }
 0x31b   : > { %3061 = vmatprep.subr.bf16.mxu1 %v8113_v3  ;;  %v8197_v3 = vld [vmem:[%s10335_s5 + $0x878] ss:$24 sps:$4 sm:$0xff]  }
 0x31d   : > { %2939 = vmatpush1.bf16.msra.mxu0 %v8108_v4  ;;  %v8202_v4 = vld [vmem:[%s10335_s5 + $0x8a4] ss:$24 sps:$4 sm:$0xff]  }
 0x31e   : > { %3062 = vmatpush1.bf16.msra.mxu1 %v8111_v6  ;;  %2949 = vmatprep.subr.bf16.mxu0 %v8118_v7  ;;  %v8205_v6 = vld [vmem:[%s10335_s5 + $0x8ac] ss:$24 sps:$4 sm:$0xff]   ;;  %v8200_v7 = vld [vmem:[%s10335_s5 + $0x8a0] ss:$24 sps:$4 sm:$0xff]  }
 0x31f   : > { %3072 = vmatprep.subr.bf16.mxu1 %v8121_v8  ;;  %v8203_v8 = vld [vmem:[%s10335_s5 + $0x8a8] ss:$24 sps:$4 sm:$0xff]  }
 0x320   : > { %2941 = vmatmul.mubr.bf16.vlgmr.msra.gmra.mrb[0].mxu0 %v10553_v9 }
 0x321   : > { %3064 = vmatmul.mubr.bf16.vlgmr.msra.gmra.mrb[0].mxu1 %v10553_v9  ;;  %2950 = vmatpush1.bf16.msra.mxu0 %v8116_v10  ;;  %v8208_v10 = vld [vmem:[%s10335_s5 + $0x8d4] ss:$24 sps:$4 sm:$0xff]  }
 0x322   : > { %3073 = vmatpush1.bf16.msra.mxu1 %v8119_v11  ;;  %2951 = vmatprep.subr.bf16.mxu0 %v8124_v12  ;;  %v8211_v11 = vld [vmem:[%s10335_s5 + $0x8dc] ss:$24 sps:$4 sm:$0xff]   ;;  %v8206_v12 = vld [vmem:[%s10335_s5 + $0x8d0] ss:$24 sps:$4 sm:$0xff]  }
 0x323   : > { %3074 = vmatprep.subr.bf16.mxu1 %v8127_v14  ;;  %2981 = vmatprep.mubr.bf16.mxu0 %v10563_v15  ;;  %v8209_v14 = vld [vmem:[%s10335_s5 + $0x8d8] ss:$24 sps:$4 sm:$0xff]  }
 0x324   : > { %3104 = vmatprep.mubr.bf16.mxu1 %v10563_v15 }
 0x325   : > { %2952 = vmatpush1.bf16.msra.mxu0 %v8122_v16  ;;  %v8216_v16 = vld [vmem:[%s10335_s5 + $0x14] ss:$24 sps:$4 sm:$0xff]  }
 0x326   : > { %3075 = vmatpush1.bf16.msra.mxu1 %v8125_v17  ;;  %2953 = vmatprep.subr.bf16.mxu0 %v8130_v18  ;;  %v10630_v17 = vcombine.low %v10558_v13, %v10558_v13  ;;  %v8214_v18 = vld [vmem:[%s10335_s5 + $0x10] ss:$24 sps:$4 sm:$0xff]  }
 0x327   : > { %3076 = vmatprep.subr.bf16.mxu1 %v8133_v19  ;;  %v8219_v19 = vld [vmem:[%s10335_s5 + $0x44] ss:$24 sps:$4 sm:$0xff]   ;;  %v8220_v13 = vld [vmem:[%s10335_s5 + $0x70] ss:$24 sps:$4 sm:$0xff]  }
 0x329   : > { %2954 = vmatpush1.bf16.msra.mxu0 %v8128_v20  ;;  %v8217_v20 = vld [vmem:[%s10335_s5 + $0x40] ss:$24 sps:$4 sm:$0xff]  }
 0x32a   : > { %3077 = vmatpush1.bf16.msra.mxu1 %v8131_v21  ;;  %2955 = vmatprep.subr.bf16.mxu0 %v8136_v22  ;;  %v8222_v21 = vld [vmem:[%s10335_s5 + $0x74] ss:$24 sps:$4 sm:$0xff]   ;;  %v8225_v22 = vld [vmem:[%s10335_s5 + $0xa4] ss:$24 sps:$4 sm:$0xff]  }
 0x32b   : > { %3078 = vmatprep.subr.bf16.mxu1 %v8139_v23  ;;  %v8223_v23 = vld [vmem:[%s10335_s5 + $0xa0] ss:$24 sps:$4 sm:$0xff]  }
 0x32d   : > { %2956 = vmatpush1.bf16.msra.mxu0 %v8134_v24  ;;  %v8228_v24 = vld [vmem:[%s10335_s5 + $0xd4] ss:$24 sps:$4 sm:$0xff]  }
 0x32e   : > { %3079 = vmatpush1.bf16.msra.mxu1 %v8137_v25  ;;  %2957 = vmatprep.subr.bf16.mxu0 %v8142_v26  ;;  %v8226_v25 = vld [vmem:[%s10335_s5 + $0xd0] ss:$24 sps:$4 sm:$0xff]   ;;  %v8231_v26 = vld [vmem:[%s10335_s5 + $0x104] ss:$24 sps:$4 sm:$0xff]  }
 0x32f   : > { %3080 = vmatprep.subr.bf16.mxu1 %v8145_v27  ;;  %v8234_v27 = vld [vmem:[%s10335_s5 + $0x134] ss:$24 sps:$4 sm:$0xff]  }
 0x331   : > { %2958 = vmatpush1.bf16.msra.mxu0 %v8140_v28  ;;  %v8232_v28 = vld [vmem:[%s10335_s5 + $0x130] ss:$24 sps:$4 sm:$0xff]  }
 0x332   : > { %3081 = vmatpush1.bf16.msra.mxu1 %v8143_v29  ;;  %2959 = vmatprep.subr.bf16.mxu0 %v8148_v31  ;;  %v8328_v29 = vld [vmem:[%s10343_s13] ss:$16 sps:$4 sm:$0xff]   ;;  %v8330_v31 = vld [vmem:[%s10343_s13 + $0x4] ss:$16 sps:$4 sm:$0xff]  }
 0x333   : > { %3082 = vmatprep.subr.bf16.mxu1 %v8151_v32  ;;  %v8237_v32 = vld [vmem:[%s10335_s5 + $0x164] ss:$24 sps:$4 sm:$0xff]  }
 0x335   : > { %2960 = vmatpush1.bf16.msra.mxu0 %v8146_v33  ;;  %v8235_v33 = vld [vmem:[%s10335_s5 + $0x160] ss:$24 sps:$4 sm:$0xff]  }
 0x336   : > { %3083 = vmatpush1.bf16.msra.mxu1 %v8149_v34  ;;  %2961 = vmatprep.subr.bf16.mxu0 %v8154_v35  ;;  %v8334_v34 = vld [vmem:[%s10343_s13 + $0x20] ss:$16 sps:$4 sm:$0xff]   ;;  %v8336_v35 = vld [vmem:[%s10343_s13 + $0x24] ss:$16 sps:$4 sm:$0xff]  }
 0x337   : > { %3084 = vmatprep.subr.bf16.mxu1 %v8157_v36  ;;  %v8240_v36 = vld [vmem:[%s10335_s5 + $0x194] ss:$24 sps:$4 sm:$0xff]  }
 0x339   : > { %2962 = vmatpush1.bf16.msra.mxu0 %v8152_v37  ;;  %v8238_v37 = vld [vmem:[%s10335_s5 + $0x190] ss:$24 sps:$4 sm:$0xff]  }
 0x33a   : > { %3085 = vmatpush1.bf16.msra.mxu1 %v8155_v38  ;;  %2963 = vmatprep.subr.bf16.mxu0 %v8160_v39  ;;  %v8340_v38 = vld [vmem:[%s10343_s13 + $0x40] ss:$16 sps:$4 sm:$0xff]   ;;  %v8342_v39 = vld [vmem:[%s10343_s13 + $0x44] ss:$16 sps:$4 sm:$0xff]  }
 0x33b   : > { %3086 = vmatprep.subr.bf16.mxu1 %v8163_v40  ;;  %v8243_v40 = vld [vmem:[%s10335_s5 + $0x1c4] ss:$24 sps:$4 sm:$0xff]  }
 0x33d   : > { %2964 = vmatpush1.bf16.msra.mxu0 %v8158_v41  ;;  %v8241_v41 = vld [vmem:[%s10335_s5 + $0x1c0] ss:$24 sps:$4 sm:$0xff]  }
 0x33e   : > { %3087 = vmatpush1.bf16.msra.mxu1 %v8161_v42  ;;  %2965 = vmatprep.subr.bf16.mxu0 %v8166_v43  ;;  %v8346_v42 = vld [vmem:[%s10343_s13 + $0x60] ss:$16 sps:$4 sm:$0xff]   ;;  %v8348_v43 = vld [vmem:[%s10343_s13 + $0x64] ss:$16 sps:$4 sm:$0xff]  }
 0x33f   : > { %3088 = vmatprep.subr.bf16.mxu1 %v8169_v44  ;;  %v8246_v44 = vld [vmem:[%s10335_s5 + $0x1f4] ss:$24 sps:$4 sm:$0xff]  }
 0x341   : > { %2966 = vmatpush1.bf16.msra.mxu0 %v8164_v45  ;;  %v8244_v45 = vld [vmem:[%s10335_s5 + $0x1f0] ss:$24 sps:$4 sm:$0xff]  }
 0x342   : > { %3089 = vmatpush1.bf16.msra.mxu1 %v8167_v46  ;;  %2967 = vmatprep.subr.bf16.mxu0 %v8172_v47  ;;  %v8352_v46 = vld [vmem:[%s10343_s13 + $0x80] ss:$16 sps:$4 sm:$0xff]   ;;  %v8354_v47 = vld [vmem:[%s10343_s13 + $0x84] ss:$16 sps:$4 sm:$0xff]  }
 0x343   : > { %3090 = vmatprep.subr.bf16.mxu1 %v8175_v49  ;;  %v8249_v49 = vld [vmem:[%s10335_s5 + $0x224] ss:$24 sps:$4 sm:$0xff]  }
 0x345   : > { %2968 = vmatpush1.bf16.msra.mxu0 %v8170_v50  ;;  %v8247_v50 = vld [vmem:[%s10335_s5 + $0x220] ss:$24 sps:$4 sm:$0xff]  }
 0x346   : > { %3091 = vmatpush1.bf16.msra.mxu1 %v8173_v51  ;;  %2969 = vmatprep.subr.bf16.mxu0 %v8178_v52  ;;  %v8358_v51 = vld [vmem:[%s10343_s13 + $0xa0] ss:$16 sps:$4 sm:$0xff]   ;;  %v8360_v52 = vld [vmem:[%s10343_s13 + $0xa4] ss:$16 sps:$4 sm:$0xff]  }
 0x347   : > { %3092 = vmatprep.subr.bf16.mxu1 %v8181_v53  ;;  %v8252_v53 = vld [vmem:[%s10335_s5 + $0x254] ss:$24 sps:$4 sm:$0xff]  }
 0x349   : > { %2970 = vmatpush1.bf16.msra.mxu0 %v8176_v54  ;;  %v8250_v54 = vld [vmem:[%s10335_s5 + $0x250] ss:$24 sps:$4 sm:$0xff]  }
 0x34a   : > { %3093 = vmatpush1.bf16.msra.mxu1 %v8179_v55  ;;  %2971 = vmatprep.subr.bf16.mxu0 %v8184_v56  ;;  %v8364_v55 = vld [vmem:[%s10343_s13 + $0xc0] ss:$16 sps:$4 sm:$0xff]   ;;  %v8366_v56 = vld [vmem:[%s10343_s13 + $0xc4] ss:$16 sps:$4 sm:$0xff]  }
 0x34b   : > { %3094 = vmatprep.subr.bf16.mxu1 %v8187_v57  ;;  %v8255_v57 = vld [vmem:[%s10335_s5 + $0x284] ss:$24 sps:$4 sm:$0xff]  }
 0x34d   : > { %2972 = vmatpush1.bf16.msra.mxu0 %v8182_v58  ;;  %v8253_v58 = vld [vmem:[%s10335_s5 + $0x280] ss:$24 sps:$4 sm:$0xff]  }
 0x34e   : > { %3095 = vmatpush1.bf16.msra.mxu1 %v8185_v59  ;;  %2973 = vmatprep.subr.bf16.mxu0 %v8190_v60  ;;  %v8370_v59 = vld [vmem:[%s10343_s13 + $0xe0] ss:$16 sps:$4 sm:$0xff]   ;;  %v8372_v60 = vld [vmem:[%s10343_s13 + $0xe4] ss:$16 sps:$4 sm:$0xff]  }
 0x34f   : > { %3096 = vmatprep.subr.bf16.mxu1 %v8193_v61  ;;  %v8258_v61 = vld [vmem:[%s10335_s5 + $0x2b4] ss:$24 sps:$4 sm:$0xff]  }
 0x351   : > { %2974 = vmatpush1.bf16.msra.mxu0 %v8188_v62  ;;  %v8256_v62 = vld [vmem:[%s10335_s5 + $0x2b0] ss:$24 sps:$4 sm:$0xff]  }
 0x352   : > { %3097 = vmatpush1.bf16.msra.mxu1 %v8191_v63  ;;  %2975 = vmatprep.subr.bf16.mxu0 %v8196_v0  ;;  %v8376_v63 = vld [vmem:[%s10343_s13 + $0x100] ss:$16 sps:$4 sm:$0xff]   ;;  %v8378_v0 = vld [vmem:[%s10343_s13 + $0x104] ss:$16 sps:$4 sm:$0xff]  }
 0x353   : > { %3098 = vmatprep.subr.bf16.mxu1 %v8199_v1  ;;  %v8261_v1 = vld [vmem:[%s10335_s5 + $0x2e4] ss:$24 sps:$4 sm:$0xff]  }
 0x355   : > { %2976 = vmatpush1.bf16.msra.mxu0 %v8194_v2  ;;  %v8259_v2 = vld [vmem:[%s10335_s5 + $0x2e0] ss:$24 sps:$4 sm:$0xff]  }
 0x356   : > { %3099 = vmatpush1.bf16.msra.mxu1 %v8197_v3  ;;  %2977 = vmatprep.subr.bf16.mxu0 %v8202_v4  ;;  %v8382_v3 = vld [vmem:[%s10343_s13 + $0x120] ss:$16 sps:$4 sm:$0xff]   ;;  %v8384_v4 = vld [vmem:[%s10343_s13 + $0x124] ss:$16 sps:$4 sm:$0xff]  }
 0x357   : > { %3100 = vmatprep.subr.bf16.mxu1 %v8205_v6  ;;  %v8264_v6 = vld [vmem:[%s10335_s5 + $0x314] ss:$24 sps:$4 sm:$0xff]  }
 0x359   : > { %2978 = vmatpush1.bf16.msra.mxu0 %v8200_v7  ;;  %v8262_v7 = vld [vmem:[%s10335_s5 + $0x310] ss:$24 sps:$4 sm:$0xff]  }
 0x35a   : > { %3101 = vmatpush1.bf16.msra.mxu1 %v8203_v8  ;;  %2979 = vmatprep.subr.bf16.mxu0 %v8208_v10  ;;  %v8388_v8 = vld [vmem:[%s10343_s13 + $0x140] ss:$16 sps:$4 sm:$0xff]   ;;  %v8390_v10 = vld [vmem:[%s10343_s13 + $0x144] ss:$16 sps:$4 sm:$0xff]  }
 0x35b   : > { %3102 = vmatprep.subr.bf16.mxu1 %v8211_v11  ;;  %v8267_v11 = vld [vmem:[%s10335_s5 + $0x344] ss:$24 sps:$4 sm:$0xff]  }
 0x35d   : > { %2980 = vmatpush1.bf16.msra.mxu0 %v8206_v12  ;;  %v8265_v12 = vld [vmem:[%s10335_s5 + $0x340] ss:$24 sps:$4 sm:$0xff]  }
 0x35e   : > { %3103 = vmatpush1.bf16.msra.mxu1 %v8209_v14  ;;  %3113 = vmatprep.subr.bf16.mxu0 %v8216_v16  ;;  %v8394_v14 = vld [vmem:[%s10343_s13 + $0x160] ss:$16 sps:$4 sm:$0xff]   ;;  %v8396_v16 = vld [vmem:[%s10343_s13 + $0x164] ss:$16 sps:$4 sm:$0xff]  }
 0x35f   : > { %4416 = vmatprep.subr.bf16.mxu1 %v8330_v31  ;;  %v8418_v31 = vld [vmem:[%s10343_s13 + $0x1e0] ss:$16 sps:$4 sm:$0xff]  }
 0x360   : > { %2982 = vmatmul.mubr.bf16.vlgmr.msra.gmra.mrb[0].mxu0 %v10630_v17 }
 0x361   : > { %3105 = vmatmul.mubr.bf16.vlgmr.msra.gmra.mrb[0].mxu1 %v10630_v17  ;;  %3114 = vmatpush1.bf16.msra.mxu0 %v8214_v18  ;;  %v8270_v18 = vld [vmem:[%s10335_s5 + $0x374] ss:$24 sps:$4 sm:$0xff]  }
 0x362   : > { %3145 = vmatprep.mubr.bf16.mxu0 %v10452_v48  ;;  %3115 = vmatprep.subr.bf16.mxu0 %v8219_v19  ;;  %v8229_v48 = vld [vmem:[%s10335_s5 + $0x100] ss:$24 sps:$4 sm:$0xff]   ;;  %v8268_v19 = vld [vmem:[%s10335_s5 + $0x370] ss:$24 sps:$4 sm:$0xff]  }
 0x363   : > { %4417 = vmatpush1.bf16.msra.mxu1 %v8328_v29  ;;  %v8282_v29 = vld [vmem:[%s10335_s5 + $0x434] ss:$24 sps:$4 sm:$0xff]  }
 0x364   : > { %4418 = vmatprep.subr.bf16.mxu1 %v8336_v35  ;;  %v8283_v35 = vld [vmem:[%s10335_s5 + $0x460] ss:$24 sps:$4 sm:$0xff]  }
 0x365   : > { %3116 = vmatpush1.bf16.msra.mxu0 %v8217_v20  ;;  %v8402_v20 = vld [vmem:[%s10343_s13 + $0x184] ss:$16 sps:$4 sm:$0xff]  }
 0x366   : > { %3117 = vmatprep.subr.bf16.mxu0 %v8222_v21  ;;  %v8273_v21 = vld [vmem:[%s10335_s5 + $0x3a4] ss:$24 sps:$4 sm:$0xff]  }
 0x367   : > { %4419 = vmatpush1.bf16.msra.mxu1 %v8334_v34  ;;  %v8285_v34 = vld [vmem:[%s10335_s5 + $0x464] ss:$24 sps:$4 sm:$0xff]  }
 0x368   : > { %4420 = vmatprep.subr.bf16.mxu1 %v8342_v39  ;;  %v8289_v39 = vld [vmem:[%s10335_s5 + $0x4c0] ss:$24 sps:$4 sm:$0xff]  }
 0x369   : > { %3118 = vmatpush1.bf16.msra.mxu0 %v8220_v13  ;;  %v8406_v13 = vld [vmem:[%s10343_s13 + $0x1a0] ss:$16 sps:$4 sm:$0xff]  }
 0x36a   : > { %3119 = vmatprep.subr.bf16.mxu0 %v8225_v22  ;;  %v8408_v22 = vld [vmem:[%s10343_s13 + $0x1a4] ss:$16 sps:$4 sm:$0xff]  }
 0x36b   : > { %4421 = vmatpush1.bf16.msra.mxu1 %v8340_v38  ;;  %v8291_v38 = vld [vmem:[%s10335_s5 + $0x4c4] ss:$24 sps:$4 sm:$0xff]  }
 0x36c   : > { %4422 = vmatprep.subr.bf16.mxu1 %v8348_v43  ;;  %v8295_v43 = vld [vmem:[%s10335_s5 + $0x520] ss:$24 sps:$4 sm:$0xff]  }
 0x36d   : > { %3120 = vmatpush1.bf16.msra.mxu0 %v8223_v23  ;;  %v8276_v23 = vld [vmem:[%s10335_s5 + $0x3d4] ss:$24 sps:$4 sm:$0xff]  }
 0x36e   : > { %3121 = vmatprep.subr.bf16.mxu0 %v8228_v24  ;;  %v8274_v24 = vld [vmem:[%s10335_s5 + $0x3d0] ss:$24 sps:$4 sm:$0xff]  }
 0x36f   : > { %4423 = vmatpush1.bf16.msra.mxu1 %v8346_v42  ;;  %v8297_v42 = vld [vmem:[%s10335_s5 + $0x524] ss:$24 sps:$4 sm:$0xff]  }
 0x370   : > { %4424 = vmatprep.subr.bf16.mxu1 %v8354_v47  ;;  %v8301_v47 = vld [vmem:[%s10335_s5 + $0x580] ss:$24 sps:$4 sm:$0xff]  }
 0x371   : > { %3122 = vmatpush1.bf16.msra.mxu0 %v8226_v25  ;;  %v8412_v25 = vld [vmem:[%s10343_s13 + $0x1c0] ss:$16 sps:$4 sm:$0xff]  }
 0x372   : > { %3123 = vmatprep.subr.bf16.mxu0 %v8231_v26  ;;  %v8414_v26 = vld [vmem:[%s10343_s13 + $0x1c4] ss:$16 sps:$4 sm:$0xff]  }
 0x373   : > { %4425 = vmatpush1.bf16.msra.mxu1 %v8352_v46  ;;  %v8303_v46 = vld [vmem:[%s10335_s5 + $0x584] ss:$24 sps:$4 sm:$0xff]  }
 0x374   : > { %4426 = vmatprep.subr.bf16.mxu1 %v8360_v52  ;;  %v8307_v52 = vld [vmem:[%s10335_s5 + $0x5e0] ss:$24 sps:$4 sm:$0xff]  }
 0x375   : > { %3124 = vmatpush1.bf16.msra.mxu0 %v8229_v48  ;;  %v8279_v48 = vld [vmem:[%s10335_s5 + $0x404] ss:$24 sps:$4 sm:$0xff]  }
 0x376   : > { %3125 = vmatprep.subr.bf16.mxu0 %v8234_v27  ;;  %v8277_v27 = vld [vmem:[%s10335_s5 + $0x400] ss:$24 sps:$4 sm:$0xff]  }
 0x377   : > { %4427 = vmatpush1.bf16.msra.mxu1 %v8358_v51  ;;  %v8309_v51 = vld [vmem:[%s10335_s5 + $0x5e4] ss:$24 sps:$4 sm:$0xff]  }
 0x378   : > { %4428 = vmatprep.subr.bf16.mxu1 %v8366_v56  ;;  %v8313_v56 = vld [vmem:[%s10335_s5 + $0x640] ss:$24 sps:$4 sm:$0xff]  }
 0x379   : > { %3126 = vmatpush1.bf16.msra.mxu0 %v8232_v28  ;;  %v8420_v28 = vld [vmem:[%s10343_s13 + $0x1e4] ss:$16 sps:$4 sm:$0xff]  }
 0x37a   : > { %3127 = vmatprep.subr.bf16.mxu0 %v8237_v32  ;;  %v8280_v32 = vld [vmem:[%s10335_s5 + $0x430] ss:$24 sps:$4 sm:$0xff]  }
 0x37b   : > { %4429 = vmatpush1.bf16.msra.mxu1 %v8364_v55  ;;  %v8315_v55 = vld [vmem:[%s10335_s5 + $0x644] ss:$24 sps:$4 sm:$0xff]  }
 0x37c   : > { %4430 = vmatprep.subr.bf16.mxu1 %v8372_v60  ;;  %v8319_v60 = vld [vmem:[%s10335_s5 + $0x6a0] ss:$24 sps:$4 sm:$0xff]  }
 0x37d   : > { %3128 = vmatpush1.bf16.msra.mxu0 %v8235_v33  ;;  %v8426_v33 = vld [vmem:[%s10343_s13 + $0x204] ss:$16 sps:$4 sm:$0xff]  }
 0x37e   : > { %3129 = vmatprep.subr.bf16.mxu0 %v8240_v36  ;;  %v8288_v36 = vld [vmem:[%s10335_s5 + $0x494] ss:$24 sps:$4 sm:$0xff]  }
 0x37f   : > { %4431 = vmatpush1.bf16.msra.mxu1 %v8370_v59  ;;  %v8321_v59 = vld [vmem:[%s10335_s5 + $0x6a4] ss:$24 sps:$4 sm:$0xff]  }
 0x380   : > { %4432 = vmatprep.subr.bf16.mxu1 %v8378_v0  ;;  %v8331_v0 = vld [vmem:[%s10335_s5 + $0x730] ss:$24 sps:$4 sm:$0xff]  }
 0x381   : > { %3130 = vmatpush1.bf16.msra.mxu0 %v8238_v37  ;;  %v8286_v37 = vld [vmem:[%s10335_s5 + $0x490] ss:$24 sps:$4 sm:$0xff]  }
 0x382   : > { %3131 = vmatprep.subr.bf16.mxu0 %v8243_v40  ;;  %v8294_v40 = vld [vmem:[%s10335_s5 + $0x4f4] ss:$24 sps:$4 sm:$0xff]  }
 0x383   : > { %4433 = vmatpush1.bf16.msra.mxu1 %v8376_v63  ;;  %v8333_v63 = vld [vmem:[%s10335_s5 + $0x734] ss:$24 sps:$4 sm:$0xff]  }
 0x384   : > { %4434 = vmatprep.subr.bf16.mxu1 %v8384_v4  ;;  %v8343_v4 = vld [vmem:[%s10335_s5 + $0x790] ss:$24 sps:$4 sm:$0xff]  }
 0x385   : > { %3132 = vmatpush1.bf16.msra.mxu0 %v8241_v41  ;;  %v8292_v41 = vld [vmem:[%s10335_s5 + $0x4f0] ss:$24 sps:$4 sm:$0xff]  }
 0x386   : > { %3133 = vmatprep.subr.bf16.mxu0 %v8246_v44  ;;  %v8300_v44 = vld [vmem:[%s10335_s5 + $0x554] ss:$24 sps:$4 sm:$0xff]  }
 0x387   : > { %4435 = vmatpush1.bf16.msra.mxu1 %v8382_v3  ;;  %v8345_v3 = vld [vmem:[%s10335_s5 + $0x794] ss:$24 sps:$4 sm:$0xff]  }
 0x388   : > { %4436 = vmatprep.subr.bf16.mxu1 %v8390_v10  ;;  %v8355_v10 = vld [vmem:[%s10335_s5 + $0x7f0] ss:$24 sps:$4 sm:$0xff]  }
 0x389   : > { %3134 = vmatpush1.bf16.msra.mxu0 %v8244_v45  ;;  %v8298_v45 = vld [vmem:[%s10335_s5 + $0x550] ss:$24 sps:$4 sm:$0xff]  }
 0x38a   : > { %3135 = vmatprep.subr.bf16.mxu0 %v8249_v49  ;;  %v8306_v49 = vld [vmem:[%s10335_s5 + $0x5b4] ss:$24 sps:$4 sm:$0xff]  }
 0x38b   : > { %4437 = vmatpush1.bf16.msra.mxu1 %v8388_v8  ;;  %v8357_v8 = vld [vmem:[%s10335_s5 + $0x7f4] ss:$24 sps:$4 sm:$0xff]  }
 0x38c   : > { %4438 = vmatprep.subr.bf16.mxu1 %v8396_v16  ;;  %v8367_v16 = vld [vmem:[%s10335_s5 + $0x850] ss:$24 sps:$4 sm:$0xff]  }
 0x38d   : > { %3136 = vmatpush1.bf16.msra.mxu0 %v8247_v50  ;;  %v8304_v50 = vld [vmem:[%s10335_s5 + $0x5b0] ss:$24 sps:$4 sm:$0xff]  }
 0x38e   : > { %3137 = vmatprep.subr.bf16.mxu0 %v8252_v53  ;;  %v8312_v53 = vld [vmem:[%s10335_s5 + $0x614] ss:$24 sps:$4 sm:$0xff]  }
 0x38f   : > { %4439 = vmatpush1.bf16.msra.mxu1 %v8394_v14  ;;  %v8369_v14 = vld [vmem:[%s10335_s5 + $0x854] ss:$24 sps:$4 sm:$0xff]  }
 0x390   : > { %4440 = vmatprep.subr.bf16.mxu1 %v8402_v20  ;;  %v8379_v20 = vld [vmem:[%s10335_s5 + $0x8b0] ss:$24 sps:$4 sm:$0xff]  }
 0x391   : > { %3138 = vmatpush1.bf16.msra.mxu0 %v8250_v54  ;;  %v8310_v54 = vld [vmem:[%s10335_s5 + $0x610] ss:$24 sps:$4 sm:$0xff]  }
 0x392   : > { %3139 = vmatprep.subr.bf16.mxu0 %v8255_v57  ;;  %v8318_v57 = vld [vmem:[%s10335_s5 + $0x674] ss:$24 sps:$4 sm:$0xff]  }
 0x395   : > { %3140 = vmatpush1.bf16.msra.mxu0 %v8253_v58  ;;  %v8316_v58 = vld [vmem:[%s10335_s5 + $0x670] ss:$24 sps:$4 sm:$0xff]  }
 0x396   : > { %3141 = vmatprep.subr.bf16.mxu0 %v8258_v61  ;;  %v8322_v61 = vld [vmem:[%s10335_s5 + $0x6d0] ss:$24 sps:$4 sm:$0xff]  }
 0x399   : > { %3142 = vmatpush1.bf16.msra.mxu0 %v8256_v62  ;;  %v8325_v62 = vld [vmem:[%s10335_s5 + $0x700] ss:$24 sps:$4 sm:$0xff]  }
 0x39a   : > { %3143 = vmatprep.subr.bf16.mxu0 %v8261_v1  ;;  %v8339_v1 = vld [vmem:[%s10335_s5 + $0x764] ss:$24 sps:$4 sm:$0xff]  }
 0x39d   : > { %3144 = vmatpush1.bf16.msra.mxu0 %v8259_v2  ;;  %v8337_v2 = vld [vmem:[%s10335_s5 + $0x760] ss:$24 sps:$4 sm:$0xff]  }
 0x39e   : > { %3154 = vmatprep.subr.bf16.mxu0 %v8264_v6  ;;  %v8351_v6 = vld [vmem:[%s10335_s5 + $0x7c4] ss:$24 sps:$4 sm:$0xff]  }
 0x3a0   : > { %3146 = vmatmul.mubr.bf16.vlgmr.msra.gmra.mrb[4].mxu0 %v10476_v5  ;;  %v8400_v5 = vld [vmem:[%s10343_s13 + $0x180] ss:$16 sps:$4 sm:$0xff]  }
 0x3a1   : > { %3155 = vmatpush1.bf16.msra.mxu0 %v8262_v7  ;;  %3186 = vmatprep.mubr.bf16.mxu0 %v10507_v30  ;;  %v8271_v30 = vld [vmem:[%s10335_s5 + $0x3a0] ss:$24 sps:$4 sm:$0xff]  }
 0x3a2   : > { %3156 = vmatprep.subr.bf16.mxu0 %v8267_v11  ;;  %4441 = vmatpush1.bf16.msra.mxu1 %v8400_v5  ;;  %v8349_v7 = vld [vmem:[%s10335_s5 + $0x7c0] ss:$24 sps:$4 sm:$0xff]   ;;  %v8363_v11 = vld [vmem:[%s10335_s5 + $0x824] ss:$24 sps:$4 sm:$0xff]   ;;  %v8381_v5 = vld [vmem:[%s10335_s5 + $0x8b4] ss:$24 sps:$4 sm:$0xff]  }
 0x3a3   : > { %4442 = vmatprep.subr.bf16.mxu1 %v8408_v22  ;;  %v8391_v22 = vld [vmem:[%s10343_s13 + $0x8] ss:$16 sps:$4 sm:$0xff]  }
 0x3a5   : > { %3157 = vmatpush1.bf16.msra.mxu0 %v8265_v12  ;;  %v8361_v12 = vld [vmem:[%s10335_s5 + $0x820] ss:$24 sps:$4 sm:$0xff]  }
 0x3a6   : > { %3158 = vmatprep.subr.bf16.mxu0 %v8270_v18  ;;  %4443 = vmatpush1.bf16.msra.mxu1 %v8406_v13  ;;  %v8375_v18 = vld [vmem:[%s10335_s5 + $0x884] ss:$24 sps:$4 sm:$0xff]  }
 0x3a7   : > { %4444 = vmatprep.subr.bf16.mxu1 %v8414_v26  ;;  %v8393_v13 = vld [vmem:[%s10343_s13 + $0xc] ss:$16 sps:$4 sm:$0xff]   ;;  %v8403_v26 = vld [vmem:[%s10343_s13 + $0x48] ss:$16 sps:$4 sm:$0xff]  }
 0x3a9   : > { %3159 = vmatpush1.bf16.msra.mxu0 %v8268_v19  ;;  %v8373_v19 = vld [vmem:[%s10335_s5 + $0x880] ss:$24 sps:$4 sm:$0xff]  }
 0x3aa   : > { %3160 = vmatprep.subr.bf16.mxu0 %v8273_v21  ;;  %4445 = vmatpush1.bf16.msra.mxu1 %v8412_v25  ;;  %v8387_v21 = vld [vmem:[%s10335_s5 + $0x8e4] ss:$24 sps:$4 sm:$0xff]  }
 0x3ab   : > { %4446 = vmatprep.subr.bf16.mxu1 %v8420_v28  ;;  %v8405_v25 = vld [vmem:[%s10343_s13 + $0x4c] ss:$16 sps:$4 sm:$0xff]  }
 0x3ac   : > { %v8417_v28 = vld [vmem:[%s10343_s13 + $0x8c] ss:$16 sps:$4 sm:$0xff]  }
 0x3ad   : > { %3161 = vmatpush1.bf16.msra.mxu0 %v8271_v30  ;;  %v8385_v30 = vld [vmem:[%s10335_s5 + $0x8e0] ss:$24 sps:$4 sm:$0xff]  }
 0x3ae   : > { %3162 = vmatprep.subr.bf16.mxu0 %v8276_v23  ;;  %4447 = vmatpush1.bf16.msra.mxu1 %v8418_v31  ;;  %v8399_v23 = vld [vmem:[%s10343_s13 + $0x2c] ss:$16 sps:$4 sm:$0xff]   ;;  %v8421_v31 = vld [vmem:[%s10343_s13 + $0xa8] ss:$16 sps:$4 sm:$0xff]  }
 0x3af   : > { %4457 = vmatprep.subr.bf16.mxu1 %v8426_v33 }
 0x3b1   : > { %3163 = vmatpush1.bf16.msra.mxu0 %v8274_v24  ;;  %v8397_v24 = vld [vmem:[%s10343_s13 + $0x28] ss:$16 sps:$4 sm:$0xff]  }
 0x3b2   : > { %3164 = vmatprep.subr.bf16.mxu0 %v8279_v48  ;;  %v8411_v48 = vld [vmem:[%s10343_s13 + $0x6c] ss:$16 sps:$4 sm:$0xff]  }
 0x3b5   : > { %3165 = vmatpush1.bf16.msra.mxu0 %v8277_v27  ;;  %v8409_v27 = vld [vmem:[%s10343_s13 + $0x68] ss:$16 sps:$4 sm:$0xff]  }
 0x3b6   : > { %3166 = vmatprep.subr.bf16.mxu0 %v8282_v29  ;;  %v8415_v29 = vld [vmem:[%s10343_s13 + $0x88] ss:$16 sps:$4 sm:$0xff]  }
 0x3b9   : > { %3167 = vmatpush1.bf16.msra.mxu0 %v8280_v32  ;;  %v8429_v32 = vld [vmem:[%s10343_s13 + $0xcc] ss:$16 sps:$4 sm:$0xff]  }
 0x3ba   : > { %3168 = vmatprep.subr.bf16.mxu0 %v8285_v34 }
 0x3bd   : > { %3169 = vmatpush1.bf16.msra.mxu0 %v8283_v35 }
 0x3be   : > { %3170 = vmatprep.subr.bf16.mxu0 %v8288_v36 }
 0x3c1   : > { %3171 = vmatpush1.bf16.msra.mxu0 %v8286_v37 }
 0x3c2   : > { %3172 = vmatprep.subr.bf16.mxu0 %v8291_v38 }
 0x3c5   : > { %3173 = vmatpush1.bf16.msra.mxu0 %v8289_v39 }
 0x3c6   : > { %3174 = vmatprep.subr.bf16.mxu0 %v8294_v40 }
 0x3c9   : > { %3175 = vmatpush1.bf16.msra.mxu0 %v8292_v41  ;;  %v8424_v41 = vld [vmem:[%s10343_s13 + $0x200] ss:$16 sps:$4 sm:$0xff]  }
 0x3ca   : > { %3176 = vmatprep.subr.bf16.mxu0 %v8297_v42 }
 0x3cd   : > { %3177 = vmatpush1.bf16.msra.mxu0 %v8295_v43 }
 0x3ce   : > { %3178 = vmatprep.subr.bf16.mxu0 %v8300_v44 }
 0x3d1   : > { %3179 = vmatpush1.bf16.msra.mxu0 %v8298_v45  ;;  %v8427_v45 = vld [vmem:[%s10343_s13 + $0xc8] ss:$16 sps:$4 sm:$0xff]  }
 0x3d2   : > { %3180 = vmatprep.subr.bf16.mxu0 %v8303_v46  ;;  %v8432_v46 = vld [vmem:[%s10343_s13 + $0x224] ss:$16 sps:$4 sm:$0xff]  }
 0x3d5   : > { %3181 = vmatpush1.bf16.msra.mxu0 %v8301_v47  ;;  %v8435_v47 = vld [vmem:[%s10343_s13 + $0xec] ss:$16 sps:$4 sm:$0xff]  }
 0x3d6   : > { %3182 = vmatprep.subr.bf16.mxu0 %v8306_v49  ;;  %v8430_v49 = vld [vmem:[%s10343_s13 + $0x220] ss:$16 sps:$4 sm:$0xff]  }
 0x3d9   : > { %3183 = vmatpush1.bf16.msra.mxu0 %v8304_v50  ;;  %v8433_v50 = vld [vmem:[%s10343_s13 + $0xe8] ss:$16 sps:$4 sm:$0xff]  }
 0x3da   : > { %3184 = vmatprep.subr.bf16.mxu0 %v8309_v51  ;;  %v8438_v51 = vld [vmem:[%s10343_s13 + $0x244] ss:$16 sps:$4 sm:$0xff]  }
 0x3dd   : > { %3185 = vmatpush1.bf16.msra.mxu0 %v8307_v52  ;;  %v8441_v52 = vld [vmem:[%s10343_s13 + $0x10c] ss:$16 sps:$4 sm:$0xff]  }
 0x3de   : > { %3195 = vmatprep.subr.bf16.mxu0 %v8312_v53  ;;  %v8436_v53 = vld [vmem:[%s10343_s13 + $0x240] ss:$16 sps:$4 sm:$0xff]  }
 0x3e0   : > { %3187 = vmatmul.mubr.bf16.vlgmr.msra.gmra.mrb[4].mxu0 %v10553_v9  ;;  %v8324_v9 = vld [vmem:[%s10335_s5 + $0x6d4] ss:$24 sps:$4 sm:$0xff]  }
 0x3e1   : > { %3196 = vmatpush1.bf16.msra.mxu0 %v8310_v54  ;;  %3227 = vmatprep.mubr.bf16.mxu0 %v10563_v15  ;;  %v8327_v15 = vld [vmem:[%s10335_s5 + $0x704] ss:$24 sps:$4 sm:$0xff]   ;;  %v8439_v54 = vld [vmem:[%s10343_s13 + $0x108] ss:$16 sps:$4 sm:$0xff]   ;;  %s6783_s5 = sshll.u32 %s10331_s21, 3 }
 0x3e2   : > { %3197 = vmatprep.subr.bf16.mxu0 %v8315_v55  ;;  %v8444_v55 = vld [vmem:[%s10343_s13 + $0x264] ss:$16 sps:$4 sm:$0xff]   ;;  %s11062_s20 = scalar_lea.vmem [#allocation35], %s6783_s5 }
 0x3e5   : > { %3198 = vmatpush1.bf16.msra.mxu0 %v8313_v56  ;;  %v8447_v56 = vld [vmem:[%s10343_s13 + $0x12c] ss:$16 sps:$4 sm:$0xff]  }
 0x3e6   : > { %3199 = vmatprep.subr.bf16.mxu0 %v8318_v57  ;;  %v8442_v57 = vld [vmem:[%s10343_s13 + $0x260] ss:$16 sps:$4 sm:$0xff]  }
 0x3e9   : > { %3200 = vmatpush1.bf16.msra.mxu0 %v8316_v58  ;;  %v8445_v58 = vld [vmem:[%s10343_s13 + $0x128] ss:$16 sps:$4 sm:$0xff]  }
 0x3ea   : > { %3201 = vmatprep.subr.bf16.mxu0 %v8321_v59  ;;  %v8450_v59 = vld [vmem:[%s10343_s13 + $0x284] ss:$16 sps:$4 sm:$0xff]  }
 0x3ed   : > { %3202 = vmatpush1.bf16.msra.mxu0 %v8319_v60  ;;  %v8453_v60 = vld [vmem:[%s10343_s13 + $0x14c] ss:$16 sps:$4 sm:$0xff]  }
 0x3ee   : > { %3203 = vmatprep.subr.bf16.mxu0 %v8324_v9  ;;  %v8448_v9 = vld [vmem:[%s10343_s13 + $0x280] ss:$16 sps:$4 sm:$0xff]  }
 0x3f1   : > { %3204 = vmatpush1.bf16.msra.mxu0 %v8322_v61  ;;  %v8451_v61 = vld [vmem:[%s10343_s13 + $0x148] ss:$16 sps:$4 sm:$0xff]  }
 0x3f2   : > { %3205 = vmatprep.subr.bf16.mxu0 %v8327_v15  ;;  %v8456_v15 = vld [vmem:[%s10343_s13 + $0x2a4] ss:$16 sps:$4 sm:$0xff]  }
 0x3f5   : > { %3206 = vmatpush1.bf16.msra.mxu0 %v8325_v62  ;;  %v8459_v62 = vld [vmem:[%s10343_s13 + $0x16c] ss:$16 sps:$4 sm:$0xff]  }
 0x3f6   : > { %3207 = vmatprep.subr.bf16.mxu0 %v8333_v63  ;;  %v8454_v63 = vld [vmem:[%s10343_s13 + $0x2a0] ss:$16 sps:$4 sm:$0xff]  }
 0x3f9   : > { %3208 = vmatpush1.bf16.msra.mxu0 %v8331_v0  ;;  %v8457_v0 = vld [vmem:[%s10343_s13 + $0x168] ss:$16 sps:$4 sm:$0xff]  }
 0x3fa   : > { %3209 = vmatprep.subr.bf16.mxu0 %v8339_v1  ;;  %v8462_v1 = vld [vmem:[%s10343_s13 + $0x2c4] ss:$16 sps:$4 sm:$0xff]  }
 0x3fd   : > { %3210 = vmatpush1.bf16.msra.mxu0 %v8337_v2  ;;  %v8465_v2 = vld [vmem:[%s10343_s13 + $0x18c] ss:$16 sps:$4 sm:$0xff]  }
 0x3fe   : > { %3211 = vmatprep.subr.bf16.mxu0 %v8345_v3  ;;  %v8460_v3 = vld [vmem:[%s10343_s13 + $0x2c0] ss:$16 sps:$4 sm:$0xff]  }
 0x401   : > { %3212 = vmatpush1.bf16.msra.mxu0 %v8343_v4  ;;  %v8463_v4 = vld [vmem:[%s10343_s13 + $0x188] ss:$16 sps:$4 sm:$0xff]  }
 0x402   : > { %3213 = vmatprep.subr.bf16.mxu0 %v8351_v6  ;;  %v8468_v6 = vld [vmem:[%s10343_s13 + $0x2e4] ss:$16 sps:$4 sm:$0xff]  }
 0x405   : > { %3214 = vmatpush1.bf16.msra.mxu0 %v8349_v7  ;;  %v8471_v7 = vld [vmem:[%s10343_s13 + $0x1ac] ss:$16 sps:$4 sm:$0xff]  }
 0x406   : > { %3215 = vmatprep.subr.bf16.mxu0 %v8357_v8  ;;  %v8466_v8 = vld [vmem:[%s10343_s13 + $0x2e0] ss:$16 sps:$4 sm:$0xff]  }
 0x409   : > { %3216 = vmatpush1.bf16.msra.mxu0 %v8355_v10  ;;  %v8469_v10 = vld [vmem:[%s10343_s13 + $0x1a8] ss:$16 sps:$4 sm:$0xff]  }
 0x40a   : > { %3217 = vmatprep.subr.bf16.mxu0 %v8363_v11  ;;  %v8474_v11 = vld [vmem:[%s10343_s13 + $0x304] ss:$16 sps:$4 sm:$0xff]  }
 0x40d   : > { %3218 = vmatpush1.bf16.msra.mxu0 %v8361_v12  ;;  %v8477_v12 = vld [vmem:[%s10343_s13 + $0x1cc] ss:$16 sps:$4 sm:$0xff]  }
 0x40e   : > { %3219 = vmatprep.subr.bf16.mxu0 %v8369_v14  ;;  %v8472_v14 = vld [vmem:[%s10343_s13 + $0x300] ss:$16 sps:$4 sm:$0xff]  }
 0x411   : > { %3220 = vmatpush1.bf16.msra.mxu0 %v8367_v16  ;;  %v8475_v16 = vld [vmem:[%s10343_s13 + $0x1c8] ss:$16 sps:$4 sm:$0xff]  }
 0x412   : > { %3221 = vmatprep.subr.bf16.mxu0 %v8375_v18  ;;  %v8480_v18 = vld [vmem:[%s10343_s13 + $0x324] ss:$16 sps:$4 sm:$0xff]  }
 0x415   : > { %3222 = vmatpush1.bf16.msra.mxu0 %v8373_v19  ;;  %v8483_v19 = vld [vmem:[%s10343_s13 + $0x1ec] ss:$16 sps:$4 sm:$0xff]  }
 0x416   : > { %3223 = vmatprep.subr.bf16.mxu0 %v8381_v5  ;;  %v8478_v5 = vld [vmem:[%s10343_s13 + $0x320] ss:$16 sps:$4 sm:$0xff]  }
 0x419   : > { %3224 = vmatpush1.bf16.msra.mxu0 %v8379_v20  ;;  %v8481_v20 = vld [vmem:[%s10343_s13 + $0x1e8] ss:$16 sps:$4 sm:$0xff]  }
 0x41a   : > { %3225 = vmatprep.subr.bf16.mxu0 %v8387_v21  ;;  %v8486_v21 = vld [vmem:[%s10343_s13 + $0x344] ss:$16 sps:$4 sm:$0xff]  }
 0x41d   : > { %3226 = vmatpush1.bf16.msra.mxu0 %v8385_v30  ;;  %v8489_v30 = vld [vmem:[%s10343_s13 + $0x20c] ss:$16 sps:$4 sm:$0xff]  }
 0x41e   : > { %4539 = vmatprep.subr.bf16.mxu0 %v8393_v13  ;;  %v8484_v13 = vld [vmem:[%s10343_s13 + $0x340] ss:$16 sps:$4 sm:$0xff]  }
 0x420   : > { %3228 = vmatmul.mubr.bf16.vlgmr.msra.gmra.mrb[4].mxu0 %v10630_v17  ;;  %v8423_v17 = vld [vmem:[%s10343_s13 + $0xac] ss:$16 sps:$4 sm:$0xff]  }
 0x421   : > { %4540 = vmatpush1.bf16.msra.mxu0 %v8391_v22  ;;  %v8487_v22 = vld [vmem:[%s10343_s13 + $0x208] ss:$16 sps:$4 sm:$0xff]  }
 0x422   : > { %4541 = vmatprep.subr.bf16.mxu0 %v8399_v23  ;;  %v8492_v23 = vld [vmem:[%s10343_s13 + $0x364] ss:$16 sps:$4 sm:$0xff]  }
 0x425   : > { %4542 = vmatpush1.bf16.msra.mxu0 %v8397_v24  ;;  %v8495_v24 = vld [vmem:[%s10343_s13 + $0x22c] ss:$16 sps:$4 sm:$0xff]  }
 0x426   : > { %4543 = vmatprep.subr.bf16.mxu0 %v8405_v25  ;;  %v8490_v25 = vld [vmem:[%s10343_s13 + $0x360] ss:$16 sps:$4 sm:$0xff]  }
 0x429   : > { %4544 = vmatpush1.bf16.msra.mxu0 %v8403_v26  ;;  %v8493_v26 = vld [vmem:[%s10343_s13 + $0x228] ss:$16 sps:$4 sm:$0xff]  }
 0x42a   : > { %4545 = vmatprep.subr.bf16.mxu0 %v8411_v48  ;;  %v8498_v48 = vld [vmem:[%s10343_s13 + $0x384] ss:$16 sps:$4 sm:$0xff]  }
 0x42d   : > { %4546 = vmatpush1.bf16.msra.mxu0 %v8409_v27  ;;  %v8501_v27 = vld [vmem:[%s10343_s13 + $0x24c] ss:$16 sps:$4 sm:$0xff]  }
 0x42e   : > { %4547 = vmatprep.subr.bf16.mxu0 %v8417_v28  ;;  %v8496_v28 = vld [vmem:[%s10343_s13 + $0x380] ss:$16 sps:$4 sm:$0xff]  }
 0x431   : > { %4548 = vmatpush1.bf16.msra.mxu0 %v8415_v29  ;;  %v8499_v29 = vld [vmem:[%s10343_s13 + $0x248] ss:$16 sps:$4 sm:$0xff]  }
 0x432   : > { %4549 = vmatprep.subr.bf16.mxu0 %v8423_v17  ;;  %v8504_v17 = vld [vmem:[%s10343_s13 + $0x3a4] ss:$16 sps:$4 sm:$0xff]  }
 0x433   : > { %v2983_v33 = vpop.f32.mrb[0].mxu0 }
 0x434   : > { %v10781_v34 = vpop.f32.mrb[0].mxu1  ;;  %v2985_v35 = vpop.f32.mrb[1].mxu0  ;;  %v10786_v42 = vpack.c.bf16 %v2983_v33, %v2983_v33  ;;  %v8505_v33 = vld [vmem:[%s10343_s13 + $0x268] ss:$16 sps:$4 sm:$0xff]  }
 0x435   : > { %v3108_v36 = vpop.f32.mrb[1].mxu1  ;;  %v3237_v37 = vpack.c.bf16 %v2985_v35, %v2985_v35  ;;  %v2987_v39 = vpop.f32.mrb[2].mxu0  ;;  %4550 = vmatpush1.bf16.msra.mxu0 %v8421_v31  ;;  %v8507_v31 = vld [vmem:[%s10343_s13 + $0x26c] ss:$16 sps:$4 sm:$0xff]   ;;  %v8510_v35 = vld [vmem:[%s10343_s13 + $0x3c4] ss:$16 sps:$4 sm:$0xff]  }
 0x436   : > { %v10783_v38 = vpack.c.bf16 %v3108_v36, %v3108_v36  ;;  %v3110_v40 = vpop.f32.mrb[2].mxu1  ;;  %v2988_v43 = vpop.f32.mrb[3].mxu0  ;;  %4551 = vmatprep.subr.bf16.mxu0 %v8429_v32  ;;  %v8502_v32 = vld [vmem:[%s10343_s13 + $0x3a0] ss:$16 sps:$4 sm:$0xff]   ;;  %v8513_v36 = vld [vmem:[%s10343_s13 + $0x28c] ss:$16 sps:$4 sm:$0xff]  }
 0x437   : > { %v3111_v44 = vpop.f32.mrb[3].mxu1  ;;  %4448 = vmatprep.mubr.bf16.mxu1 %v3237_v37  ;;  %4571 = vmatprep.mubr.bf16.mxu0 %v3237_v37  ;;  %v8508_v37 = vld [vmem:[%s10343_s13 + $0x3c0] ss:$16 sps:$4 sm:$0xff]   ;;  %v8516_v39 = vld [vmem:[%s10343_s13 + $0x3e4] ss:$16 sps:$4 sm:$0xff]  }
 0x438   : > { %4449 = vmatmul.mubr.bf16.vlgmr.msra.gmra.mrb[4].mxu1 %v10786_v42  ;;  %v8519_v40 = vld [vmem:[%s10343_s13 + $0x2ac] ss:$16 sps:$4 sm:$0xff]   ;;  %v8552_v43 = vld [vmem:[%s10343_s13 + $0x404] ss:$16 sps:$4 sm:$0xff]  }
 0x439   : > { %4458 = vmatpush1.bf16.msra.mxu1 %v8424_v41  ;;  %4489 = vmatprep.mubr.bf16.mxu1 %v10783_v38  ;;  %v8514_v41 = vld [vmem:[%s10343_s13 + $0x3e0] ss:$16 sps:$4 sm:$0xff]   ;;  %v8522_v44 = vld [vmem:[%s10343_s13 + $0x2cc] ss:$16 sps:$4 sm:$0xff]  }
 0x43a   : > { %4552 = vmatpush1.bf16.msra.mxu0 %v8427_v45  ;;  %4459 = vmatprep.subr.bf16.mxu1 %v8432_v46  ;;  %v8550_v45 = vld [vmem:[%s10343_s13 + $0x400] ss:$16 sps:$4 sm:$0xff]   ;;  %v10858_v46 = vpack.c.bf16 %v10781_v34, %v10781_v34  ;;  %v8564_v34 = vld [vmem:[%s10343_s13 + $0x444] ss:$16 sps:$4 sm:$0xff]  }
 0x43b   : > { %4553 = vmatprep.subr.bf16.mxu0 %v8435_v47  ;;  %v8520_v47 = vld [vmem:[%s10343_s13 + $0x2c8] ss:$16 sps:$4 sm:$0xff]  }
 0x43d   : > { %4460 = vmatpush1.bf16.msra.mxu1 %v8430_v49  ;;  %v8558_v49 = vld [vmem:[%s10343_s13 + $0x424] ss:$16 sps:$4 sm:$0xff]  }
 0x43e   : > { %4554 = vmatpush1.bf16.msra.mxu0 %v8433_v50  ;;  %4461 = vmatprep.subr.bf16.mxu1 %v8438_v51  ;;  %v8525_v50 = vld [vmem:[%s10343_s13 + $0x2ec] ss:$16 sps:$4 sm:$0xff]   ;;  %v8556_v51 = vld [vmem:[%s10343_s13 + $0x420] ss:$16 sps:$4 sm:$0xff]  }
 0x43f   : > { %4555 = vmatprep.subr.bf16.mxu0 %v8441_v52  ;;  %v8523_v52 = vld [vmem:[%s10343_s13 + $0x2e8] ss:$16 sps:$4 sm:$0xff]  }
 0x441   : > { %4462 = vmatpush1.bf16.msra.mxu1 %v8436_v53  ;;  %v8528_v53 = vld [vmem:[%s10343_s13 + $0x30c] ss:$16 sps:$4 sm:$0xff]  }
 0x442   : > { %4556 = vmatpush1.bf16.msra.mxu0 %v8439_v54  ;;  %4463 = vmatprep.subr.bf16.mxu1 %v8444_v55  ;;  %v8562_v54 = vld [vmem:[%s10343_s13 + $0x440] ss:$16 sps:$4 sm:$0xff]   ;;  %v8526_v55 = vld [vmem:[%s10343_s13 + $0x308] ss:$16 sps:$4 sm:$0xff]  }
 0x443   : > { %4557 = vmatprep.subr.bf16.mxu0 %v8447_v56  ;;  %v8570_v56 = vld [vmem:[%s10343_s13 + $0x464] ss:$16 sps:$4 sm:$0xff]  }
 0x445   : > { %4464 = vmatpush1.bf16.msra.mxu1 %v8442_v57  ;;  %v8531_v57 = vld [vmem:[%s10343_s13 + $0x32c] ss:$16 sps:$4 sm:$0xff]  }
 0x446   : > { %4558 = vmatpush1.bf16.msra.mxu0 %v8445_v58  ;;  %4465 = vmatprep.subr.bf16.mxu1 %v8450_v59  ;;  %v8568_v58 = vld [vmem:[%s10343_s13 + $0x460] ss:$16 sps:$4 sm:$0xff]   ;;  %v8529_v59 = vld [vmem:[%s10343_s13 + $0x328] ss:$16 sps:$4 sm:$0xff]  }
 0x447   : > { %4559 = vmatprep.subr.bf16.mxu0 %v8453_v60  ;;  %v8576_v60 = vld [vmem:[%s10343_s13 + $0x484] ss:$16 sps:$4 sm:$0xff]  }
 0x449   : > { %4466 = vmatpush1.bf16.msra.mxu1 %v8448_v9  ;;  %v8534_v9 = vld [vmem:[%s10343_s13 + $0x34c] ss:$16 sps:$4 sm:$0xff]  }
 0x44a   : > { %4560 = vmatpush1.bf16.msra.mxu0 %v8451_v61  ;;  %4467 = vmatprep.subr.bf16.mxu1 %v8456_v15  ;;  %v8574_v61 = vld [vmem:[%s10343_s13 + $0x480] ss:$16 sps:$4 sm:$0xff]   ;;  %v8532_v15 = vld [vmem:[%s10343_s13 + $0x348] ss:$16 sps:$4 sm:$0xff]  }
 0x44b   : > { %4561 = vmatprep.subr.bf16.mxu0 %v8459_v62  ;;  %v8582_v62 = vld [vmem:[%s10343_s13 + $0x4a4] ss:$16 sps:$4 sm:$0xff]  }
 0x44d   : > { %4468 = vmatpush1.bf16.msra.mxu1 %v8454_v63  ;;  %v8537_v63 = vld [vmem:[%s10343_s13 + $0x36c] ss:$16 sps:$4 sm:$0xff]  }
 0x44e   : > { %4562 = vmatpush1.bf16.msra.mxu0 %v8457_v0  ;;  %4469 = vmatprep.subr.bf16.mxu1 %v8462_v1  ;;  %v8580_v0 = vld [vmem:[%s10343_s13 + $0x4a0] ss:$16 sps:$4 sm:$0xff]   ;;  %v8535_v1 = vld [vmem:[%s10343_s13 + $0x368] ss:$16 sps:$4 sm:$0xff]  }
 0x44f   : > { %4563 = vmatprep.subr.bf16.mxu0 %v8465_v2  ;;  %v8588_v2 = vld [vmem:[%s10343_s13 + $0x4c4] ss:$16 sps:$4 sm:$0xff]  }
 0x451   : > { %4470 = vmatpush1.bf16.msra.mxu1 %v8460_v3  ;;  %v8540_v3 = vld [vmem:[%s10343_s13 + $0x38c] ss:$16 sps:$4 sm:$0xff]  }
 0x452   : > { %4564 = vmatpush1.bf16.msra.mxu0 %v8463_v4  ;;  %4471 = vmatprep.subr.bf16.mxu1 %v8468_v6  ;;  %v8586_v4 = vld [vmem:[%s10343_s13 + $0x4c0] ss:$16 sps:$4 sm:$0xff]   ;;  %v8538_v6 = vld [vmem:[%s10343_s13 + $0x388] ss:$16 sps:$4 sm:$0xff]  }
 0x453   : > { %4565 = vmatprep.subr.bf16.mxu0 %v8471_v7  ;;  %v8594_v7 = vld [vmem:[%s10343_s13 + $0x4e4] ss:$16 sps:$4 sm:$0xff]  }
 0x455   : > { %4472 = vmatpush1.bf16.msra.mxu1 %v8466_v8  ;;  %v8543_v8 = vld [vmem:[%s10343_s13 + $0x3ac] ss:$16 sps:$4 sm:$0xff]  }
 0x456   : > { %4566 = vmatpush1.bf16.msra.mxu0 %v8469_v10  ;;  %4473 = vmatprep.subr.bf16.mxu1 %v8474_v11  ;;  %v8592_v10 = vld [vmem:[%s10343_s13 + $0x4e0] ss:$16 sps:$4 sm:$0xff]   ;;  %v8541_v11 = vld [vmem:[%s10343_s13 + $0x3a8] ss:$16 sps:$4 sm:$0xff]  }
 0x457   : > { %4567 = vmatprep.subr.bf16.mxu0 %v8477_v12  ;;  %v8600_v12 = vld [vmem:[%s10343_s13 + $0x504] ss:$16 sps:$4 sm:$0xff]  }
 0x459   : > { %4474 = vmatpush1.bf16.msra.mxu1 %v8472_v14  ;;  %v8546_v14 = vld [vmem:[%s10343_s13 + $0x3cc] ss:$16 sps:$4 sm:$0xff]  }
 0x45a   : > { %4568 = vmatpush1.bf16.msra.mxu0 %v8475_v16  ;;  %4475 = vmatprep.subr.bf16.mxu1 %v8480_v18  ;;  %v8598_v16 = vld [vmem:[%s10343_s13 + $0x500] ss:$16 sps:$4 sm:$0xff]   ;;  %v8544_v18 = vld [vmem:[%s10343_s13 + $0x3c8] ss:$16 sps:$4 sm:$0xff]  }
 0x45b   : > { %4569 = vmatprep.subr.bf16.mxu0 %v8483_v19  ;;  %v8606_v19 = vld [vmem:[%s10343_s13 + $0x524] ss:$16 sps:$4 sm:$0xff]  }
 0x45d   : > { %4476 = vmatpush1.bf16.msra.mxu1 %v8478_v5  ;;  %v8549_v5 = vld [vmem:[%s10343_s13 + $0x3ec] ss:$16 sps:$4 sm:$0xff]  }
 0x45e   : > { %4570 = vmatpush1.bf16.msra.mxu0 %v8481_v20  ;;  %4477 = vmatprep.subr.bf16.mxu1 %v8486_v21  ;;  %v8604_v20 = vld [vmem:[%s10343_s13 + $0x520] ss:$16 sps:$4 sm:$0xff]   ;;  %v8547_v21 = vld [vmem:[%s10343_s13 + $0x3e8] ss:$16 sps:$4 sm:$0xff]  }
 0x45f   : > { %4580 = vmatprep.subr.bf16.mxu0 %v8489_v30  ;;  %v8612_v30 = vld [vmem:[%s10343_s13 + $0x544] ss:$16 sps:$4 sm:$0xff]  }
 0x461   : > { %4478 = vmatpush1.bf16.msra.mxu1 %v8484_v13  ;;  %4572 = vmatmul.mubr.bf16.vlgmr.msra.gmra.mrb[8].mxu0 %v10786_v42  ;;  %v8517_v42 = vld [vmem:[%s10343_s13 + $0x2a8] ss:$16 sps:$4 sm:$0xff]   ;;  %v8555_v13 = vld [vmem:[%s10343_s13 + $0x40c] ss:$16 sps:$4 sm:$0xff]  }
 0x462   : > { %4581 = vmatpush1.bf16.msra.mxu0 %v8487_v22  ;;  %4612 = vmatprep.mubr.bf16.mxu0 %v10783_v38  ;;  %v8511_v38 = vld [vmem:[%s10343_s13 + $0x288] ss:$16 sps:$4 sm:$0xff]   ;;  %v8610_v22 = vld [vmem:[%s10343_s13 + $0x540] ss:$16 sps:$4 sm:$0xff]  }
 0x463   : > { %4479 = vmatprep.subr.bf16.mxu1 %v8492_v23  ;;  %4582 = vmatprep.subr.bf16.mxu0 %v8495_v24  ;;  %v8553_v23 = vld [vmem:[%s10343_s13 + $0x408] ss:$16 sps:$4 sm:$0xff]   ;;  %v8618_v24 = vld [vmem:[%s10343_s13 + $0x564] ss:$16 sps:$4 sm:$0xff]  }
 0x465   : > { %4480 = vmatpush1.bf16.msra.mxu1 %v8490_v25  ;;  %v8561_v25 = vld [vmem:[%s10343_s13 + $0x42c] ss:$16 sps:$4 sm:$0xff]  }
 0x466   : > { %4583 = vmatpush1.bf16.msra.mxu0 %v8493_v26  ;;  %4481 = vmatprep.subr.bf16.mxu1 %v8498_v48  ;;  %v8616_v26 = vld [vmem:[%s10343_s13 + $0x560] ss:$16 sps:$4 sm:$0xff]   ;;  %v8559_v48 = vld [vmem:[%s10343_s13 + $0x428] ss:$16 sps:$4 sm:$0xff]  }
 0x467   : > { %4584 = vmatprep.subr.bf16.mxu0 %v8501_v27  ;;  %v8624_v27 = vld [vmem:[%s10343_s13 + $0x584] ss:$16 sps:$4 sm:$0xff]  }
 0x469   : > { %4482 = vmatpush1.bf16.msra.mxu1 %v8496_v28  ;;  %v8567_v28 = vld [vmem:[%s10343_s13 + $0x44c] ss:$16 sps:$4 sm:$0xff]  }
 0x46a   : > { %4585 = vmatpush1.bf16.msra.mxu0 %v8499_v29  ;;  %4483 = vmatprep.subr.bf16.mxu1 %v8504_v17  ;;  %v8622_v29 = vld [vmem:[%s10343_s13 + $0x580] ss:$16 sps:$4 sm:$0xff]   ;;  %v8565_v17 = vld [vmem:[%s10343_s13 + $0x448] ss:$16 sps:$4 sm:$0xff]  }
 0x46b   : > { %4586 = vmatprep.subr.bf16.mxu0 %v8507_v31  ;;  %v8630_v31 = vld [vmem:[%s10343_s13 + $0x5a4] ss:$16 sps:$4 sm:$0xff]  }
 0x46d   : > { %4484 = vmatpush1.bf16.msra.mxu1 %v8502_v32  ;;  %v8573_v32 = vld [vmem:[%s10343_s13 + $0x46c] ss:$16 sps:$4 sm:$0xff]  }
 0x46e   : > { %4587 = vmatpush1.bf16.msra.mxu0 %v8505_v33  ;;  %4485 = vmatprep.subr.bf16.mxu1 %v8510_v35  ;;  %v8628_v33 = vld [vmem:[%s10343_s13 + $0x5a0] ss:$16 sps:$4 sm:$0xff]   ;;  %v8571_v35 = vld [vmem:[%s10343_s13 + $0x468] ss:$16 sps:$4 sm:$0xff]  }
 0x46f   : > { %4588 = vmatprep.subr.bf16.mxu0 %v8513_v36  ;;  %v8636_v36 = vld [vmem:[%s10343_s13 + $0x5c4] ss:$16 sps:$4 sm:$0xff]  }
 0x471   : > { %4486 = vmatpush1.bf16.msra.mxu1 %v8508_v37  ;;  %v8579_v37 = vld [vmem:[%s10343_s13 + $0x48c] ss:$16 sps:$4 sm:$0xff]  }
 0x472   : > { %4589 = vmatpush1.bf16.msra.mxu0 %v8511_v38  ;;  %4487 = vmatprep.subr.bf16.mxu1 %v8516_v39  ;;  %v8634_v38 = vld [vmem:[%s10343_s13 + $0x5c0] ss:$16 sps:$4 sm:$0xff]   ;;  %v8577_v39 = vld [vmem:[%s10343_s13 + $0x488] ss:$16 sps:$4 sm:$0xff]  }
 0x473   : > { %4590 = vmatprep.subr.bf16.mxu0 %v8519_v40  ;;  %v8642_v40 = vld [vmem:[%s10343_s13 + $0x5e4] ss:$16 sps:$4 sm:$0xff]  }
 0x475   : > { %4488 = vmatpush1.bf16.msra.mxu1 %v8514_v41  ;;  %v8585_v41 = vld [vmem:[%s10343_s13 + $0x4ac] ss:$16 sps:$4 sm:$0xff]  }
 0x476   : > { %4591 = vmatpush1.bf16.msra.mxu0 %v8517_v42  ;;  %4498 = vmatprep.subr.bf16.mxu1 %v8552_v43  ;;  %v8640_v42 = vld [vmem:[%s10343_s13 + $0x5e0] ss:$16 sps:$4 sm:$0xff]   ;;  %v8583_v43 = vld [vmem:[%s10343_s13 + $0x4a8] ss:$16 sps:$4 sm:$0xff]  }
 0x477   : > { %4592 = vmatprep.subr.bf16.mxu0 %v8522_v44  ;;  %v8648_v44 = vld [vmem:[%s10354_s28 + $0x4] ss:$8 sps:$4 sm:$0xff]  }
 0x478   : > { %4490 = vmatmul.mubr.bf16.vlgmr.msra.gmra.mrb[4].mxu1 %v10858_v46 }
 0x479   : > { %4499 = vmatpush1.bf16.msra.mxu1 %v8550_v45  ;;  %v8591_v45 = vld [vmem:[%s10343_s13 + $0x4cc] ss:$16 sps:$4 sm:$0xff]  }
 0x47a   : > { %4593 = vmatpush1.bf16.msra.mxu0 %v8520_v47  ;;  %4500 = vmatprep.subr.bf16.mxu1 %v8558_v49  ;;  %v8597_v47 = vld [vmem:[%s10343_s13 + $0x4ec] ss:$16 sps:$4 sm:$0xff]   ;;  %v8595_v49 = vld [vmem:[%s10343_s13 + $0x4e8] ss:$16 sps:$4 sm:$0xff]  }
 0x47b   : > { %4594 = vmatprep.subr.bf16.mxu0 %v8525_v50  ;;  %v8603_v50 = vld [vmem:[%s10343_s13 + $0x50c] ss:$16 sps:$4 sm:$0xff]  }
 0x47d   : > { %4501 = vmatpush1.bf16.msra.mxu1 %v8556_v51  ;;  %v8601_v51 = vld [vmem:[%s10343_s13 + $0x508] ss:$16 sps:$4 sm:$0xff]  }
 0x47e   : > { %4595 = vmatpush1.bf16.msra.mxu0 %v8523_v52  ;;  %4502 = vmatprep.subr.bf16.mxu1 %v8564_v34  ;;  %v8609_v52 = vld [vmem:[%s10343_s13 + $0x52c] ss:$16 sps:$4 sm:$0xff]   ;;  %v8607_v34 = vld [vmem:[%s10343_s13 + $0x528] ss:$16 sps:$4 sm:$0xff]  }
 0x47f   : > { %4596 = vmatprep.subr.bf16.mxu0 %v8528_v53  ;;  %v8615_v53 = vld [vmem:[%s10343_s13 + $0x54c] ss:$16 sps:$4 sm:$0xff]  }
 0x481   : > { %4503 = vmatpush1.bf16.msra.mxu1 %v8562_v54  ;;  %v8613_v54 = vld [vmem:[%s10343_s13 + $0x548] ss:$16 sps:$4 sm:$0xff]  }
 0x482   : > { %4597 = vmatpush1.bf16.msra.mxu0 %v8526_v55  ;;  %4504 = vmatprep.subr.bf16.mxu1 %v8570_v56  ;;  %v8621_v55 = vld [vmem:[%s10343_s13 + $0x56c] ss:$16 sps:$4 sm:$0xff]   ;;  %v8619_v56 = vld [vmem:[%s10343_s13 + $0x568] ss:$16 sps:$4 sm:$0xff]  }
 0x483   : > { %4598 = vmatprep.subr.bf16.mxu0 %v8531_v57  ;;  %v8627_v57 = vld [vmem:[%s10343_s13 + $0x58c] ss:$16 sps:$4 sm:$0xff]  }
 0x485   : > { %4505 = vmatpush1.bf16.msra.mxu1 %v8568_v58  ;;  %v8625_v58 = vld [vmem:[%s10343_s13 + $0x588] ss:$16 sps:$4 sm:$0xff]  }
 0x486   : > { %4599 = vmatpush1.bf16.msra.mxu0 %v8529_v59  ;;  %4506 = vmatprep.subr.bf16.mxu1 %v8576_v60  ;;  %v8633_v59 = vld [vmem:[%s10343_s13 + $0x5ac] ss:$16 sps:$4 sm:$0xff]   ;;  %v8631_v60 = vld [vmem:[%s10343_s13 + $0x5a8] ss:$16 sps:$4 sm:$0xff]  }
 0x487   : > { %4600 = vmatprep.subr.bf16.mxu0 %v8534_v9  ;;  %v8639_v9 = vld [vmem:[%s10343_s13 + $0x5cc] ss:$16 sps:$4 sm:$0xff]  }
 0x489   : > { %4507 = vmatpush1.bf16.msra.mxu1 %v8574_v61  ;;  %v8637_v61 = vld [vmem:[%s10343_s13 + $0x5c8] ss:$16 sps:$4 sm:$0xff]  }
 0x48a   : > { %4601 = vmatpush1.bf16.msra.mxu0 %v8532_v15  ;;  %4508 = vmatprep.subr.bf16.mxu1 %v8582_v62  ;;  %v8645_v15 = vld [vmem:[%s10343_s13 + $0x5ec] ss:$16 sps:$4 sm:$0xff]   ;;  %v8643_v62 = vld [vmem:[%s10343_s13 + $0x5e8] ss:$16 sps:$4 sm:$0xff]  }
 0x48b   : > { %4602 = vmatprep.subr.bf16.mxu0 %v8537_v63 }
 0x48d   : > { %4509 = vmatpush1.bf16.msra.mxu1 %v8580_v0 }
 0x48e   : > { %4603 = vmatpush1.bf16.msra.mxu0 %v8535_v1  ;;  %4510 = vmatprep.subr.bf16.mxu1 %v8588_v2 }
 0x48f   : > { %4604 = vmatprep.subr.bf16.mxu0 %v8540_v3  ;;  %v8646_v3 = vld [vmem:[%s10354_s28] ss:$8 sps:$4 sm:$0xff]  }
 0x491   : > { %4511 = vmatpush1.bf16.msra.mxu1 %v8586_v4 }
 0x492   : > { %4605 = vmatpush1.bf16.msra.mxu0 %v8538_v6  ;;  %4512 = vmatprep.subr.bf16.mxu1 %v8594_v7  ;;  %v8651_v7 = vld [vmem:[%s10354_s28 + $0x14] ss:$8 sps:$4 sm:$0xff]  }
 0x493   : > { %4606 = vmatprep.subr.bf16.mxu0 %v8543_v8  ;;  %v8649_v8 = vld [vmem:[%s10354_s28 + $0x10] ss:$8 sps:$4 sm:$0xff]  }
 0x495   : > { %4513 = vmatpush1.bf16.msra.mxu1 %v8592_v10  ;;  %v8654_v10 = vld [vmem:[%s10354_s28 + $0x24] ss:$8 sps:$4 sm:$0xff]  }
 0x496   : > { %4607 = vmatpush1.bf16.msra.mxu0 %v8541_v11  ;;  %4514 = vmatprep.subr.bf16.mxu1 %v8600_v12  ;;  %v8652_v11 = vld [vmem:[%s10354_s28 + $0x20] ss:$8 sps:$4 sm:$0xff]   ;;  %v8657_v12 = vld [vmem:[%s10354_s28 + $0x34] ss:$8 sps:$4 sm:$0xff]  }
 0x497   : > { %4608 = vmatprep.subr.bf16.mxu0 %v8546_v14  ;;  %v8655_v14 = vld [vmem:[%s10354_s28 + $0x30] ss:$8 sps:$4 sm:$0xff]  }
 0x499   : > { %4515 = vmatpush1.bf16.msra.mxu1 %v8598_v16  ;;  %v8660_v16 = vld [vmem:[%s10354_s28 + $0x44] ss:$8 sps:$4 sm:$0xff]  }
 0x49a   : > { %4609 = vmatpush1.bf16.msra.mxu0 %v8544_v18  ;;  %4516 = vmatprep.subr.bf16.mxu1 %v8606_v19  ;;  %v8658_v18 = vld [vmem:[%s10354_s28 + $0x40] ss:$8 sps:$4 sm:$0xff]   ;;  %v8663_v19 = vld [vmem:[%s10354_s28 + $0x54] ss:$8 sps:$4 sm:$0xff]  }
 0x49b   : > { %4610 = vmatprep.subr.bf16.mxu0 %v8549_v5  ;;  %v8661_v5 = vld [vmem:[%s10354_s28 + $0x50] ss:$8 sps:$4 sm:$0xff]  }
 0x49d   : > { %4517 = vmatpush1.bf16.msra.mxu1 %v8604_v20  ;;  %v8666_v20 = vld [vmem:[%s10354_s28 + $0x64] ss:$8 sps:$4 sm:$0xff]  }
 0x49e   : > { %4611 = vmatpush1.bf16.msra.mxu0 %v8547_v21  ;;  %4518 = vmatprep.subr.bf16.mxu1 %v8612_v30  ;;  %v8664_v21 = vld [vmem:[%s10354_s28 + $0x60] ss:$8 sps:$4 sm:$0xff]   ;;  %v8669_v30 = vld [vmem:[%s10354_s28 + $0x74] ss:$8 sps:$4 sm:$0xff]  }
 0x49f   : > { %4621 = vmatprep.subr.bf16.mxu0 %v8555_v13  ;;  %v8667_v13 = vld [vmem:[%s10354_s28 + $0x70] ss:$8 sps:$4 sm:$0xff]  }
 0x4a1   : > { %4613 = vmatmul.mubr.bf16.vlgmr.msra.gmra.mrb[8].mxu0 %v10858_v46  ;;  %4519 = vmatpush1.bf16.msra.mxu1 %v8610_v22  ;;  %v8589_v46 = vld [vmem:[%s10343_s13 + $0x4c8] ss:$16 sps:$4 sm:$0xff]   ;;  %v8672_v22 = vld [vmem:[%s10354_s28 + $0x84] ss:$8 sps:$4 sm:$0xff]   ;;  %s9566_s13 = smov (!%p7361_p9), 64  }
 0x4a2   : > { %4622 = vmatpush1.bf16.msra.mxu0 %v8553_v23  ;;  %4520 = vmatprep.subr.bf16.mxu1 %v8618_v24  ;;  %v8670_v23 = vld [vmem:[%s10354_s28 + $0x80] ss:$8 sps:$4 sm:$0xff]   ;;  %v8675_v24 = vld [vmem:[%s10354_s28 + $0x94] ss:$8 sps:$4 sm:$0xff]  }
 0x4a3   : > { %4623 = vmatprep.subr.bf16.mxu0 %v8561_v25  ;;  %v8673_v25 = vld [vmem:[%s10354_s28 + $0x90] ss:$8 sps:$4 sm:$0xff]  }
 0x4a5   : > { %4521 = vmatpush1.bf16.msra.mxu1 %v8616_v26  ;;  %v8678_v26 = vld [vmem:[%s10354_s28 + $0xa4] ss:$8 sps:$4 sm:$0xff]  }
 0x4a6   : > { %4624 = vmatpush1.bf16.msra.mxu0 %v8559_v48  ;;  %4522 = vmatprep.subr.bf16.mxu1 %v8624_v27  ;;  %v8676_v48 = vld [vmem:[%s10354_s28 + $0xa0] ss:$8 sps:$4 sm:$0xff]   ;;  %v8681_v27 = vld [vmem:[%s10354_s28 + $0xb4] ss:$8 sps:$4 sm:$0xff]  }
 0x4a7   : > { %4625 = vmatprep.subr.bf16.mxu0 %v8567_v28  ;;  %v8679_v28 = vld [vmem:[%s10354_s28 + $0xb0] ss:$8 sps:$4 sm:$0xff]  }
 0x4a9   : > { %4523 = vmatpush1.bf16.msra.mxu1 %v8622_v29  ;;  %v8684_v29 = vld [vmem:[%s10354_s28 + $0xc4] ss:$8 sps:$4 sm:$0xff]  }
 0x4aa   : > { %4626 = vmatpush1.bf16.msra.mxu0 %v8565_v17  ;;  %4524 = vmatprep.subr.bf16.mxu1 %v8630_v31  ;;  %v8682_v17 = vld [vmem:[%s10354_s28 + $0xc0] ss:$8 sps:$4 sm:$0xff]   ;;  %v8687_v31 = vld [vmem:[%s10354_s28 + $0xd4] ss:$8 sps:$4 sm:$0xff]  }
 0x4ab   : > { %4627 = vmatprep.subr.bf16.mxu0 %v8573_v32  ;;  %v8685_v32 = vld [vmem:[%s10354_s28 + $0xd0] ss:$8 sps:$4 sm:$0xff]  }
 0x4ad   : > { %4525 = vmatpush1.bf16.msra.mxu1 %v8628_v33  ;;  %v8690_v33 = vld [vmem:[%s10354_s28 + $0xe4] ss:$8 sps:$4 sm:$0xff]  }
 0x4ae   : > { %4628 = vmatpush1.bf16.msra.mxu0 %v8571_v35  ;;  %4526 = vmatprep.subr.bf16.mxu1 %v8636_v36  ;;  %v8688_v35 = vld [vmem:[%s10354_s28 + $0xe0] ss:$8 sps:$4 sm:$0xff]   ;;  %v8693_v36 = vld [vmem:[%s10354_s28 + $0xf4] ss:$8 sps:$4 sm:$0xff]  }
 0x4af   : > { %4629 = vmatprep.subr.bf16.mxu0 %v8579_v37  ;;  %v8691_v37 = vld [vmem:[%s10354_s28 + $0xf0] ss:$8 sps:$4 sm:$0xff]  }
 0x4b1   : > { %4527 = vmatpush1.bf16.msra.mxu1 %v8634_v38  ;;  %v8696_v38 = vld [vmem:[%s10354_s28 + $0x104] ss:$8 sps:$4 sm:$0xff]  }
 0x4b2   : > { %4630 = vmatpush1.bf16.msra.mxu0 %v8577_v39  ;;  %4528 = vmatprep.subr.bf16.mxu1 %v8642_v40  ;;  %v3436_v39 = vlaneseq }
 0x4b3   : > { %4631 = vmatprep.subr.bf16.mxu0 %v8585_v41 }
 0x4b4   : > { %v10976_v40 = vshrl.u32 %v3436_v39, 7  ;;  %v8744_v39 = vld [vmem:[%s10364_s23 + $0x48] sm:$0xff]  }
 0x4b5   : > { %4529 = vmatpush1.bf16.msra.mxu1 %v8640_v42  ;;  %v10980_v42 = vld [vmem:[%s10346_s4] sm:$0xf] }
 0x4b6   : > { %4632 = vmatpush1.bf16.msra.mxu0 %v8583_v43  ;;  %5066 = vmatprep.subr.bf16.mxu1 %v8648_v44  ;;  %v3438_v41 = vsub.s32 0, %v10976_v40  ;;  %v3442_v43 = vsub.s32 1, %v10976_v40  ;;  %v3450_v44 = vsub.s32 3, %v10976_v40 }
 0x4b7   : > { %4633 = vmatprep.subr.bf16.mxu0 %v8591_v45 }
 0x4b8   : > { %v3439_v45 = vrot.slane %v10980_v42, %v3438_v41 }
 0x4ba   : > { %4634 = vmatpush1.bf16.msra.mxu0 %v8589_v46  ;;  %v3443_v46 = vrot.slane %v10980_v42, %v3442_v43 }
 0x4bb   : > { %4635 = vmatprep.subr.bf16.mxu0 %v8597_v47  ;;  %v3451_v47 = vrot.slane %v10980_v42, %v3450_v44  ;;  %v8746_v44 = vld [vmem:[%s10364_s23 + $0x50] sm:$0xff]  }
 0x4be   : > { %4636 = vmatpush1.bf16.msra.mxu0 %v8595_v49 }
 0x4bf   : > { %4637 = vmatprep.subr.bf16.mxu0 %v8603_v50 }
 0x4c2   : > { %4638 = vmatpush1.bf16.msra.mxu0 %v8601_v51 }
 0x4c3   : > { %4639 = vmatprep.subr.bf16.mxu0 %v8609_v52 }
 0x4c6   : > { %4640 = vmatpush1.bf16.msra.mxu0 %v8607_v34 }
 0x4c7   : > { %4641 = vmatprep.subr.bf16.mxu0 %v8615_v53 }
 0x4ca   : > { %4642 = vmatpush1.bf16.msra.mxu0 %v8613_v54 }
 0x4cb   : > { %4643 = vmatprep.subr.bf16.mxu0 %v8621_v55 }
 0x4ce   : > { %4644 = vmatpush1.bf16.msra.mxu0 %v8619_v56 }
 0x4cf   : > { %4645 = vmatprep.subr.bf16.mxu0 %v8627_v57 }
 0x4d2   : > { %4646 = vmatpush1.bf16.msra.mxu0 %v8625_v58 }
 0x4d3   : > { %4647 = vmatprep.subr.bf16.mxu0 %v8633_v59 }
 0x4d6   : > { %4648 = vmatpush1.bf16.msra.mxu0 %v8631_v60 }
 0x4d7   : > { %4649 = vmatprep.subr.bf16.mxu0 %v8639_v9 }
 0x4da   : > { %4650 = vmatpush1.bf16.msra.mxu0 %v8637_v61 }
 0x4db   : > { %4651 = vmatprep.subr.bf16.mxu0 %v8645_v15  ;;  %v8694_v15 = vld [vmem:[%s10354_s28 + $0x100] ss:$8 sps:$4 sm:$0xff]  }
 0x4de   : > { %4652 = vmatpush1.bf16.msra.mxu0 %v8643_v62 }
 0x4f3   : > { %v3229_v63 = vpop.f32.mrb[4].mxu0 }
 0x4f4   : > { %v3231_v0 = vpop.f32.mrb[5].mxu0  ;;  %v3240_v4 = vpack.c.bf16 %v3229_v63, %v3229_v63  ;;  %v8699_v63 = vld [vmem:[%s10354_s28 + $0x114] ss:$8 sps:$4 sm:$0xff]  }
 0x4f5   : > { %v3241_v1 = vpack.c.bf16 %v3231_v0, %v3231_v0  ;;  %v3233_v2 = vpop.f32.mrb[6].mxu0 }
 0x4f6   : > { %v3234_v6 = vpop.f32.mrb[7].mxu0  ;;  %v8702_v2 = vld [vmem:[%s10354_s28 + $0x124] ss:$8 sps:$4 sm:$0xff]  }
 0x4f7   : > { %4530 = vmatprep.mubr.bf16.mxu1 %v3241_v1  ;;  %4653 = vmatprep.mubr.bf16.mxu0 %v3241_v1  ;;  %v8697_v1 = vld [vmem:[%s10354_s28 + $0x110] ss:$8 sps:$4 sm:$0xff]  }
 0x4f8   : > { %4531 = vmatmul.mubr.bf16.vlgmr.msra.gmra.mrb[4].mxu1 %v3240_v4  ;;  %4654 = vmatmul.mubr.bf16.vlgmr.msra.gmra.mrb[8].mxu0 %v3240_v4  ;;  %v8705_v4 = vld [vmem:[%s10354_s28 + $0x134] ss:$8 sps:$4 sm:$0xff]   ;;  %v8703_v6 = vld [vmem:[%s10354_s28 + $0x130] ss:$8 sps:$4 sm:$0xff]  }
 0x4f9   : > { %5067 = vmatpush1.bf16.msra.mxu1 %v8646_v3  ;;  %v8700_v3 = vld [vmem:[%s10354_s28 + $0x120] ss:$8 sps:$4 sm:$0xff]  }
 0x4fa   : > { %5068 = vmatprep.subr.bf16.mxu1 %v8651_v7  ;;  %v8708_v7 = vld [vmem:[%s10354_s28 + $0x144] ss:$8 sps:$4 sm:$0xff]  }
 0x4fd   : > { %5069 = vmatpush1.bf16.msra.mxu1 %v8649_v8  ;;  %v8706_v8 = vld [vmem:[%s10354_s28 + $0x140] ss:$8 sps:$4 sm:$0xff]  }
 0x4fe   : > { %5070 = vmatprep.subr.bf16.mxu1 %v8654_v10  ;;  %v8711_v10 = vld [vmem:[%s10354_s28 + $0x154] ss:$8 sps:$4 sm:$0xff]  }
 0x501   : > { %5071 = vmatpush1.bf16.msra.mxu1 %v8652_v11  ;;  %v8709_v11 = vld [vmem:[%s10354_s28 + $0x150] ss:$8 sps:$4 sm:$0xff]  }
 0x502   : > { %5072 = vmatprep.subr.bf16.mxu1 %v8657_v12  ;;  %v8714_v12 = vld [vmem:[%s10354_s28 + $0x164] ss:$8 sps:$4 sm:$0xff]  }
 0x505   : > { %5073 = vmatpush1.bf16.msra.mxu1 %v8655_v14  ;;  %v8712_v14 = vld [vmem:[%s10354_s28 + $0x160] ss:$8 sps:$4 sm:$0xff]  }
 0x506   : > { %5074 = vmatprep.subr.bf16.mxu1 %v8660_v16  ;;  %v8717_v16 = vld [vmem:[%s10354_s28 + $0x174] ss:$8 sps:$4 sm:$0xff]  }
 0x509   : > { %5075 = vmatpush1.bf16.msra.mxu1 %v8658_v18  ;;  %v8715_v18 = vld [vmem:[%s10354_s28 + $0x170] ss:$8 sps:$4 sm:$0xff]  }
 0x50a   : > { %5076 = vmatprep.subr.bf16.mxu1 %v8663_v19  ;;  %v8720_v19 = vld [vmem:[%s10354_s28 + $0x184] ss:$8 sps:$4 sm:$0xff]  }
 0x50d   : > { %5077 = vmatpush1.bf16.msra.mxu1 %v8661_v5  ;;  %v8718_v5 = vld [vmem:[%s10354_s28 + $0x180] ss:$8 sps:$4 sm:$0xff]  }
 0x50e   : > { %5078 = vmatprep.subr.bf16.mxu1 %v8666_v20  ;;  %v8723_v20 = vld [vmem:[%s10354_s28 + $0x194] ss:$8 sps:$4 sm:$0xff]  }
 0x511   : > { %5079 = vmatpush1.bf16.msra.mxu1 %v8664_v21  ;;  %v8721_v21 = vld [vmem:[%s10354_s28 + $0x190] ss:$8 sps:$4 sm:$0xff]  }
 0x512   : > { %5080 = vmatprep.subr.bf16.mxu1 %v8669_v30  ;;  %v8726_v30 = vld [vmem:[%s10354_s28 + $0x1a4] ss:$8 sps:$4 sm:$0xff]  }
 0x515   : > { %5081 = vmatpush1.bf16.msra.mxu1 %v8667_v13  ;;  %v8724_v13 = vld [vmem:[%s10354_s28 + $0x1a0] ss:$8 sps:$4 sm:$0xff]  }
 0x516   : > { %5082 = vmatprep.subr.bf16.mxu1 %v8672_v22  ;;  %v8729_v22 = vld [vmem:[%s10354_s28 + $0x1b4] ss:$8 sps:$4 sm:$0xff]  }
 0x519   : > { %5083 = vmatpush1.bf16.msra.mxu1 %v8670_v23  ;;  %v8727_v23 = vld [vmem:[%s10354_s28 + $0x1b0] ss:$8 sps:$4 sm:$0xff]  }
 0x51a   : > { %5084 = vmatprep.subr.bf16.mxu1 %v8675_v24  ;;  %v8732_v24 = vld [vmem:[%s10354_s28 + $0x1c4] ss:$8 sps:$4 sm:$0xff]  }
 0x51d   : > { %5085 = vmatpush1.bf16.msra.mxu1 %v8673_v25  ;;  %v8730_v25 = vld [vmem:[%s10354_s28 + $0x1c0] ss:$8 sps:$4 sm:$0xff]  }
 0x51e   : > { %5086 = vmatprep.subr.bf16.mxu1 %v8678_v26  ;;  %v3446_v26 = vsub.s32 2, %v10976_v40  ;;  %v8759_v40 = vld [vmem:[%s10373_s19 + $0x8] sm:$0xff]  }
 0x521   : > { %5087 = vmatpush1.bf16.msra.mxu1 %v8676_v48  ;;  %v8735_v48 = vld [vmem:[%s10354_s28 + $0x1d4] ss:$8 sps:$4 sm:$0xff]  }
 0x522   : > { %5088 = vmatprep.subr.bf16.mxu1 %v8681_v27  ;;  %v8733_v27 = vld [vmem:[%s10354_s28 + $0x1d0] ss:$8 sps:$4 sm:$0xff]  }
 0x525   : > { %5089 = vmatpush1.bf16.msra.mxu1 %v8679_v28  ;;  %v3447_v28 = vrot.slane %v10980_v42, %v3446_v26  ;;  %v8745_v42 = vld [vmem:[%s10364_s23 + $0x8] sm:$0xff]   ;;  %v9564_v26 = vmov (!%p7361_p9), 0.0  }
 0x526   : > { %5090 = vmatprep.subr.bf16.mxu1 %v8684_v29  ;;  %v8738_v29 = vld [vmem:[%s10354_s28 + $0x1e4] ss:$8 sps:$4 sm:$0xff]   ;;  %7527 = vmatprep.subr.bf16.mxu0 (!%p7361_p9), %v9564_v26 }
 0x527   : > { %7543 = vmatprep.mubr.msk.bf16.mxu0 (!%p7361_p9), %vm9565_vm1, %v9564_v26 }
 0x529   : > { %5091 = vmatpush1.bf16.msra.mxu1 %v8682_v17  ;;  %v8736_v17 = vld [vmem:[%s10354_s28 + $0x1e0] ss:$8 sps:$4 sm:$0xff]  }
 0x52a   : > { %5092 = vmatprep.subr.bf16.mxu1 %v8687_v31 }
 0x52d   : > { %5093 = vmatpush1.bf16.msra.mxu1 %v8685_v32  ;;  %v8741_v32 = vld [vmem:[%s10354_s28 + $0x1f4] ss:$8 sps:$4 sm:$0xff]  }
 0x52e   : > { %5094 = vmatprep.subr.bf16.mxu1 %v8690_v33  ;;  %v8739_v33 = vld [vmem:[%s10354_s28 + $0x1f0] ss:$8 sps:$4 sm:$0xff]  }
 0x531   : > { %5095 = vmatpush1.bf16.msra.mxu1 %v8688_v35 }
 0x532   : > { %5096 = vmatprep.subr.bf16.mxu1 %v8693_v36  ;;  %v8742_v36 = vld [vmem:[%s10364_s23 + $0x40] sm:$0xff]  }
 0x535   : > { %5097 = vmatpush1.bf16.msra.mxu1 %v8691_v37  ;;  %v8743_v37 = vld [vmem:[%s10364_s23] sm:$0xff]  }
 0x536   : > { %5107 = vmatprep.subr.bf16.mxu1 %v8696_v38 }
 0x5cb   : > { %v4532_v49 = vpop.f32.mrb[4].mxu1  ;;  %v10991_v50 = vpop.f32.mrb[8].mxu0 }
 0x5cc   : > { %v7647_v51 = vadd.f32 %v4532_v49, %v3439_v45  ;;  %v4534_v52 = vpop.f32.mrb[5].mxu1  ;;  %v4657_v34 = vpop.f32.mrb[9].mxu0  ;;  %v7649_v31 = vadd.f32 %v10991_v50, %v3447_v28  ;;  %v8747_v45 = vld [vmem:[%s10364_s23 + $0x10] sm:$0xff]   ;;  %v8750_v49 = vld [vmem:[%s10364_s23 + $0x60] sm:$0xff]  }
 0x5cd   : > { %v7648_v53 = vadd.f32 %v4534_v52, %v3443_v46  ;;  %v7650_v54 = vadd.f32 %v4657_v34, %v3451_v47  ;;  %v4536_v55 = vpop.f32.mrb[6].mxu1  ;;  %v4659_v56 = vpop.f32.mrb[10].mxu0  ;;  %v8748_v46 = vld [vmem:[%s10364_s23 + $0x58] sm:$0xff]   ;;  %v8751_v50 = vld [vmem:[%s10364_s23 + $0x20] sm:$0xff]   ;;  %v8753_v52 = vld [vmem:[%s10364_s23 + $0x28] sm:$0xff]  }
 0x5ce   : > { %v4662_v57 = vmax.f32 %v7647_v51, 0.0  ;;  %v4537_v58 = vpop.f32.mrb[7].mxu1  ;;  %v4660_v59 = vpop.f32.mrb[11].mxu0  ;;  %v4664_v35 = vmax.f32 %v7649_v31, 0.0  ;;  %v8749_v47 = vld [vmem:[%s10364_s23 + $0x18] sm:$0xff]   ;;  %v8752_v51 = vld [vmem:[%s10364_s23 + $0x68] sm:$0xff]  }
 0x5cf   : > { %v4663_v60 = vmax.f32 %v7648_v53, 0.0  ;;  %v4665_v9 = vmax.f32 %v7650_v54, 0.0  ;;  %v8754_v34 = vld [vmem:[%s10364_s23 + $0x70] sm:$0xff]   ;;  %v8756_v54 = vld [vmem:[%s10364_s23 + $0x78] sm:$0xff]   ;;  %v9562_v56 = vmov 0.0  }
 0x5d0   : > { %v4666_v62 = vpack.c.bf16 %v4662_v57, %v4662_v57  ;;  %v4668_v38 = vpack.c.bf16 %v4664_v35, %v4664_v35  ;;  %v8755_v53 = vld [vmem:[%s10364_s23 + $0x30] sm:$0xff]   ;;  %v8757_v55 = vld [vmem:[%s10364_s23 + $0x38] sm:$0xff]   ;;  %v8775_v35 = vld [vmem:[#allocation20 + $0x20] sm:$0xff] (!%p7361_p9)  }
 0x5d1   : > { %v4667_v61 = vpack.c.bf16 %v4663_v60, %v4663_v60  ;;  %v4669_v0 = vpack.c.bf16 %v4665_v9, %v4665_v9  ;;  %v4734_v57 = vld [vmem:[%s10357_s12] sm:$0x3]  ;;  %v8769_v28 = vld [vmem:[#allocation20 + $0x8] sm:$0xff] (!%p7361_p9)  }
 0x5d2   : > { %v4739_v58 = vrot.slane %v4734_v57, %v3438_v41  ;;  %v4743_v59 = vrot.slane %v4734_v57, %v3442_v43  ;;  %v8760_v41 = vld [vmem:[%s10373_s19 + $0x10] sm:$0xff]   ;;  %v8761_v43 = vld [vmem:[%s10373_s19 + $0x18] sm:$0xff]  }
 0x5d3   : > { %5098 = vmatprep.mubr.bf16.mxu1 %v4667_v61  ;;  %v8772_v31 = vld [vmem:[#allocation23 + $0x18] sm:$0xff] (!%p7361_p9)  }
 0x5d4   : > { %5099 = vmatmul.mubr.bf16.vlgmr.msra.gmra.mrb[8].mxu1 %v4666_v62 }
 0x5d5   : > { %5108 = vmatpush1.bf16.msra.mxu1 %v8694_v15  ;;  %5139 = vmatprep.mubr.bf16.mxu1 %v4669_v0 }
 0x5d6   : > { %5109 = vmatprep.subr.bf16.mxu1 %v8699_v63 }
 0x5d9   : > { %5110 = vmatpush1.bf16.msra.mxu1 %v8697_v1 }
 0x5da   : > { %5111 = vmatprep.subr.bf16.mxu1 %v8702_v2 }
 0x5dd   : > { %5112 = vmatpush1.bf16.msra.mxu1 %v8700_v3  ;;  %v8758_v3 = vld [vmem:[%s10373_s19] sm:$0xff]  }
 0x5de   : > { %5113 = vmatprep.subr.bf16.mxu1 %v8705_v4 }
 0x5e1   : > { %5114 = vmatpush1.bf16.msra.mxu1 %v8703_v6  ;;  %v8762_v6 = vld [vmem:[%s10373_s19 + $0x20] sm:$0xff]  }
 0x5e2   : > { %5115 = vmatprep.subr.bf16.mxu1 %v8708_v7  ;;  %v8763_v7 = vld [vmem:[%s10373_s19 + $0x28] sm:$0xff]  }
 0x5e5   : > { %5116 = vmatpush1.bf16.msra.mxu1 %v8706_v8  ;;  %v8764_v8 = vld [vmem:[%s10373_s19 + $0x30] sm:$0xff]  }
 0x5e6   : > { %5117 = vmatprep.subr.bf16.mxu1 %v8711_v10  ;;  %v8765_v10 = vld [vmem:[%s10373_s19 + $0x38] sm:$0xff]  }
 0x5e9   : > { %5118 = vmatpush1.bf16.msra.mxu1 %v8709_v11 }
 0x5ea   : > { %5119 = vmatprep.subr.bf16.mxu1 %v8714_v12  ;;  %v7334_v12 = vld [vmem:[%s960_s26] ss:$0 sm:$0xff] }
 0x5ed   : > { %5120 = vmatpush1.bf16.msra.mxu1 %v8712_v14 }
 0x5ee   : > { %5121 = vmatprep.subr.bf16.mxu1 %v8717_v16 }
 0x5f1   : > { %5122 = vmatpush1.bf16.msra.mxu1 %v8715_v18 }
 0x5f2   : > { %5123 = vmatprep.subr.bf16.mxu1 %v8720_v19 }
 0x5f5   : > { %5124 = vmatpush1.bf16.msra.mxu1 %v8718_v5 }
 0x5f6   : > { %5125 = vmatprep.subr.bf16.mxu1 %v8723_v20 }
 0x5f9   : > { %5126 = vmatpush1.bf16.msra.mxu1 %v8721_v21  ;;  %v7352_v21 = vld [vmem:[%s977_s2] ss:$0 sm:$0xff] }
 0x5fa   : > { %5127 = vmatprep.subr.bf16.mxu1 %v8726_v30 }
 0x5fd   : > { %5128 = vmatpush1.bf16.msra.mxu1 %v8724_v13 }
 0x5fe   : > { %5129 = vmatprep.subr.bf16.mxu1 %v8729_v22 }
 0x601   : > { %5130 = vmatpush1.bf16.msra.mxu1 %v8727_v23 }
 0x602   : > { %5131 = vmatprep.subr.bf16.mxu1 %v8732_v24 }
 0x605   : > { %5132 = vmatpush1.bf16.msra.mxu1 %v8730_v25  ;;  %v8766_v25 = vld [vmem:[#allocation23] sm:$0xff] (!%p7361_p9)  }
 0x606   : > { %5133 = vmatprep.subr.bf16.mxu1 %v8735_v48  ;;  %v8767_v48 = vld [vmem:[#allocation20] sm:$0xff] (!%p7361_p9)  }
 0x607   : > { %7528 = vmatpush3.bf16.msra.mxu0 (!%p7361_p9), %v8767_v48 }
 0x608   : > { %7529 = vmatprep.subr.bf16.mxu0 (!%p7361_p9), %v9564_v26 }
 0x609   : > { %5134 = vmatpush1.bf16.msra.mxu1 %v8733_v27  ;;  %v8768_v27 = vld [vmem:[#allocation23 + $0x8] sm:$0xff] (!%p7361_p9)  }
 0x60a   : > { %5135 = vmatprep.subr.bf16.mxu1 %v8738_v29  ;;  %v8770_v29 = vld [vmem:[#allocation23 + $0x10] sm:$0xff] (!%p7361_p9)  }
 0x60b   : > { %7530 = vmatpush3.bf16.msra.mxu0 (!%p7361_p9), %v8769_v28 }
 0x60c   : > { %7531 = vmatprep.subr.bf16.mxu0 (!%p7361_p9), %v9564_v26 }
 0x60d   : > { %5136 = vmatpush1.bf16.msra.mxu1 %v8736_v17  ;;  %v8771_v17 = vld [vmem:[#allocation20 + $0x10] sm:$0xff] (!%p7361_p9)  }
 0x60e   : > { %5137 = vmatprep.subr.bf16.mxu1 %v8741_v32  ;;  %v8773_v32 = vld [vmem:[#allocation20 + $0x18] sm:$0xff] (!%p7361_p9)  }
 0x60f   : > { %7532 = vmatpush3.bf16.msra.mxu0 (!%p7361_p9), %v8771_v17 }
 0x610   : > { %7533 = vmatprep.subr.bf16.mxu0 (!%p7361_p9), %v9564_v26 }
 0x611   : > { %5138 = vmatpush1.bf16.msra.mxu1 %v8739_v33  ;;  %v8774_v33 = vld [vmem:[#allocation23 + $0x20] sm:$0xff] (!%p7361_p9)  }
 0x612   : > { %7423 = vmatprep.subr.bf16.mxu1 %v8742_v36  ;;  %v8776_v36 = vld [vmem:[#allocation23 + $0x28] sm:$0xff] (!%p7361_p9)  }
 0x613   : > { %7534 = vmatpush3.bf16.msra.mxu0 (!%p7361_p9), %v8773_v32 }
 0x614   : > { %5140 = vmatmul.mubr.bf16.vlgmr.msra.gmra.mrb[8].mxu1 %v4668_v38  ;;  %7535 = vmatprep.subr.bf16.mxu0 (!%p7361_p9), %v9564_v26  ;;  %v8777_v38 = vld [vmem:[#allocation20 + $0x28] sm:$0xff] (!%p7361_p9)  }
 0x615   : > { %7424 = vmatpush3.bf16.msra.mxu1 %v8743_v37 }
 0x616   : > { %7425 = vmatprep.subr.bf16.mxu1 %v8744_v39 }
 0x617   : > { %7536 = vmatpush3.bf16.msra.mxu0 (!%p7361_p9), %v8775_v35 }
 0x618   : > { %7537 = vmatprep.subr.bf16.mxu0 (!%p7361_p9), %v9564_v26 }
 0x619   : > { %7426 = vmatpush3.bf16.msra.mxu1 %v8745_v42  ;;  %v8778_v42 = vld [vmem:[#allocation23 + $0x30] sm:$0xff] (!%p7361_p9)  }
 0x61a   : > { %7427 = vmatprep.subr.bf16.mxu1 %v8746_v44  ;;  %v8779_v44 = vld [vmem:[#allocation20 + $0x30] sm:$0xff] (!%p7361_p9)  }
 0x61b   : > { %7538 = vmatpush3.bf16.msra.mxu0 (!%p7361_p9), %v8777_v38 }
 0x61c   : > { %7539 = vmatprep.subr.bf16.mxu0 (!%p7361_p9), %v9564_v26 }
 0x61d   : > { %7428 = vmatpush3.bf16.msra.mxu1 %v8747_v45 }
 0x61e   : > { %7429 = vmatprep.subr.bf16.mxu1 %v8748_v46  ;;  %v8780_v46 = vld [vmem:[#allocation23 + $0x38] sm:$0xff] (!%p7361_p9)  }
 0x61f   : > { %7540 = vmatpush3.bf16.msra.mxu0 (!%p7361_p9), %v8779_v44  ;;  %v8792_v44 = vld [vmem:[#allocation29 + $0x10] sm:$0xff] (!%p7361_p9)  }
 0x620   : > { %7541 = vmatprep.subr.bf16.mxu0 (!%p7361_p9), %v9564_v26 }
 0x621   : > { %7430 = vmatpush3.bf16.msra.mxu1 %v8749_v47  ;;  %v8781_v47 = vld [vmem:[#allocation20 + $0x38] sm:$0xff] (!%p7361_p9)  }
 0x622   : > { %7431 = vmatprep.subr.bf16.mxu1 %v8750_v49 }
 0x623   : > { %7542 = vmatpush3.bf16.msra.mxu0 (!%p7361_p9), %v8781_v47  ;;  %v8795_v47 = vld [vmem:[#allocation29 + $0x28] sm:$0xff] (!%p7361_p9)  }
 0x624   : > { %7567 = vmatprep.subr.bf16.mxu0 (!%p7361_p9), %v9564_v26 }
 0x625   : > { %7432 = vmatpush3.bf16.msra.mxu1 %v8751_v50 }
 0x626   : > { %7433 = vmatprep.subr.bf16.mxu1 %v8752_v51  ;;  %v7371_v51 = vld [vmem:[#allocation24] ss:$0 sm:$0xff] (!%p7361_p9) }
 0x629   : > { %7434 = vmatpush3.bf16.msra.mxu1 %v8753_v52  ;;  %v7362_v52 = vld [vmem:[#allocation21] ss:$0 sm:$0xff] (!%p7361_p9) }
 0x62a   : > { %7435 = vmatprep.subr.bf16.mxu1 %v8754_v34 }
 0x62d   : > { %7436 = vmatpush3.bf16.msra.mxu1 %v8755_v53 }
 0x62e   : > { %7437 = vmatprep.subr.bf16.mxu1 %v8756_v54 }
 0x631   : > { %7438 = vmatpush3.bf16.msra.mxu1 %v8757_v55 }
 0x632   : > { %7507 = vmatprep.subr.bf16.mxu1 %v9562_v56 }
 0x6e7   : > { %v5141_v60 = vpop.f32.mrb[8].mxu1 }
 0x6e8   : > { %v7651_v9 = vadd.f32 %v5141_v60, %v4739_v58  ;;  %v5143_v61 = vpop.f32.mrb[9].mxu1 }
 0x6e9   : > { %v7652_v15 = vadd.f32 %v5143_v61, %v4743_v59  ;;  %v5145_v62 = vpop.f32.mrb[10].mxu1  ;;  %v8782_v61 = vld [vmem:[#allocation26] sm:$0xff] (!%p7361_p9)  }
 0x6ea   : > { %v5148_v63 = vmax.f32 %v7651_v9, 0.0  ;;  %v5146_v0 = vpop.f32.mrb[11].mxu1  ;;  %v8784_v62 = vld [vmem:[#allocation26 + $0x10] sm:$0xff] (!%p7361_p9)  }
 0x6eb   : > { %v5149_v1 = vmax.f32 %v7652_v15, 0.0  ;;  %v8783_v15 = vld [vmem:[#allocation26 + $0x8] sm:$0xff] (!%p7361_p9)   ;;  %v8786_v0 = vld [vmem:[#allocation26 + $0x20] sm:$0xff] (!%p7361_p9)  }
 0x6ec   : > { %v5150_v4 = vpack.c.bf16 %v5148_v63, %v5148_v63  ;;  %v8785_v63 = vld [vmem:[#allocation26 + $0x18] sm:$0xff] (!%p7361_p9)  }
 0x6ed   : > { %v5151_v2 = vpack.c.bf16 %v5149_v1, %v5149_v1  ;;  %v8787_v1 = vld [vmem:[#allocation26 + $0x28] sm:$0xff] (!%p7361_p9)  }
 0x6ef   : > { %5319 = vmatprep.mubr.bf16.mxu1 %v5151_v2  ;;  %v8788_v2 = vld [vmem:[#allocation26 + $0x30] sm:$0xff] (!%p7361_p9)  }
 0x6f0   : > { %5320 = vmatmul.mubr.bf16.vlgmr.msra.gmra.mrb[12].mxu1 %v5150_v4 }
 0x6f1   : > { %7508 = vmatpush3.bf16.msra.mxu1 %v8758_v3  ;;  %7523 = vmatprep.mubr.msk.bf16.mxu1 %vm9563_vm0, %v9562_v56  ;;  %v8789_v3 = vld [vmem:[#allocation26 + $0x38] sm:$0xff] (!%p7361_p9)  }
 0x6f2   : > { %7509 = vmatprep.subr.bf16.mxu1 %v9562_v56 }
 0x6f5   : > { %7510 = vmatpush3.bf16.msra.mxu1 %v8759_v40 }
 0x6f6   : > { %7511 = vmatprep.subr.bf16.mxu1 %v9562_v56 }
 0x6f9   : > { %7512 = vmatpush3.bf16.msra.mxu1 %v8760_v41 }
 0x6fa   : > { %7513 = vmatprep.subr.bf16.mxu1 %v9562_v56 }
 0x6fd   : > { %7514 = vmatpush3.bf16.msra.mxu1 %v8761_v43 }
 0x6fe   : > { %7515 = vmatprep.subr.bf16.mxu1 %v9562_v56 }
 0x701   : > { %7516 = vmatpush3.bf16.msra.mxu1 %v8762_v6 }
 0x702   : > { %7517 = vmatprep.subr.bf16.mxu1 %v9562_v56 }
 0x705   : > { %7518 = vmatpush3.bf16.msra.mxu1 %v8763_v7 }
 0x706   : > { %7519 = vmatprep.subr.bf16.mxu1 %v9562_v56 }
 0x709   : > { %7520 = vmatpush3.bf16.msra.mxu1 %v8764_v8 }
 0x70a   : > { %7521 = vmatprep.subr.bf16.mxu1 %v9562_v56 }
 0x70d   : > { %7522 = vmatpush3.bf16.msra.mxu1 %v8765_v10 }
 0x70e   : > { %7547 = vmatprep.subr.bf16.mxu1 (!%p7361_p9), %v9564_v26 }
 0x7c3   : > { %v7439_v11 = vpop.f32.mrb[12].mxu1 }
 0x7c4   : > { %v7440_v14 = vpop.f32.mrb[13].mxu1 }
 0x7c5   : > { %v7441_v16 = vadd.f32 %v7440_v14, %v7439_v11  ;;  %v7442_v18 = vpop.f32.mrb[14].mxu1 }
 0x7c6   : > { %v7443_v19 = vpop.f32.mrb[15].mxu1 }
 0x7c7   : > { %v5322_v5 = vadd.f32 %v7441_v16, %v7334_v12  ;;  %v7380_v16 = vld [vmem:[#allocation27] ss:$0 sm:$0xff] (!%p7361_p9) }
 0x7c9   : > { %5329 = vst [vmem:[%s5328_s17] sm:$0xff] %v5322_v5  ;;  %v5330_v20 = vpack.c.bf16 %v5322_v5, %v5322_v5 }
 0x7cb   : > { %7524 = vmatmul.mubr.bf16.vlgmr.msra.gmra.mrb[16].mxu1 %v5330_v20 }
 0x7cc   : > { %7548 = vmatpush3.bf16.msra.mxu1 (!%p7361_p9), %v8766_v25  ;;  %7563 = vmatprep.mubr.msk.bf16.mxu1 (!%p7361_p9), %vm9565_vm1, %v9564_v26 }
 0x7cd   : > { %7549 = vmatprep.subr.bf16.mxu1 (!%p7361_p9), %v9564_v26 }
 0x7d0   : > { %7550 = vmatpush3.bf16.msra.mxu1 (!%p7361_p9), %v8768_v27  ;;  %v5449_v37 = vld [vmem:[#allocation2 + $0x8] sm:$0xf] (!%p7361_p9)  ;;  %v5447_v45 = vld [vmem:[#allocation2] sm:$0xf] (!%p7361_p9) }
 0x7d1   : > { %7551 = vmatprep.subr.bf16.mxu1 (!%p7361_p9), %v9564_v26  ;;  %v5451_v39 = vrot.slane (!%p7361_p9), %v5449_v37, 4 }
 0x7d3   : > { %v5454_v49 = vsel (!%p7361_p9), %vm5453_vm2, %v5447_v45, %v5451_v39  ;;  %v8790_v39 = vld [vmem:[#allocation29] sm:$0xff] (!%p7361_p9)   ;;  %v8793_v45 = vld [vmem:[#allocation29 + $0x18] sm:$0xff] (!%p7361_p9)  }
 0x7d4   : > { %7552 = vmatpush3.bf16.msra.mxu1 (!%p7361_p9), %v8770_v29  ;;  %v5455_v50 = vpack.c.bf16 (!%p7361_p9), %v5454_v49, %v5454_v49  ;;  %v8796_v49 = vld [vmem:[#allocation29 + $0x30] sm:$0xff] (!%p7361_p9)  }
 0x7d5   : > { %7553 = vmatprep.subr.bf16.mxu1 (!%p7361_p9), %v9564_v26 }
 0x7d6   : > { %7544 = vmatmul.mubr.bf16.vlgmr.msra.gmra.mrb[0].mxu0 (!%p7361_p9), %v5455_v50 }
 0x7d7   : > { %7583 = vmatprep.mubr.msk.bf16.mxu0 (!%p7361_p9), %vm9565_vm1, %v9564_v26  ;;  %7568 = vmatpush3.bf16.msra.mxu0 (!%p7361_p9), %v8782_v61  ;;  %v8805_v61 = vld [vmem:[#allocation32 + $0x38] sm:$0xff] (!%p7361_p9)  }
 0x7d8   : > { %7554 = vmatpush3.bf16.msra.mxu1 (!%p7361_p9), %v8772_v31  ;;  %7569 = vmatprep.subr.bf16.mxu0 (!%p7361_p9), %v9564_v26 }
 0x7d9   : > { %7555 = vmatprep.subr.bf16.mxu1 (!%p7361_p9), %v9564_v26 }
 0x7db   : > { %7570 = vmatpush3.bf16.msra.mxu0 (!%p7361_p9), %v8783_v15  ;;  %v7395_v15 = vld [vmem:[#allocation30] ss:$0 sm:$0xff] (!%p7361_p9) }
 0x7dc   : > { %7556 = vmatpush3.bf16.msra.mxu1 (!%p7361_p9), %v8774_v33  ;;  %7571 = vmatprep.subr.bf16.mxu0 (!%p7361_p9), %v9564_v26 }
 0x7dd   : > { %7557 = vmatprep.subr.bf16.mxu1 (!%p7361_p9), %v9564_v26 }
 0x7df   : > { %7572 = vmatpush3.bf16.msra.mxu0 (!%p7361_p9), %v8784_v62 }
 0x7e0   : > { %7558 = vmatpush3.bf16.msra.mxu1 (!%p7361_p9), %v8776_v36  ;;  %7573 = vmatprep.subr.bf16.mxu0 (!%p7361_p9), %v9564_v26 }
 0x7e1   : > { %7559 = vmatprep.subr.bf16.mxu1 (!%p7361_p9), %v9564_v26 }
 0x7e3   : > { %7574 = vmatpush3.bf16.msra.mxu0 (!%p7361_p9), %v8785_v63 }
 0x7e4   : > { %7560 = vmatpush3.bf16.msra.mxu1 (!%p7361_p9), %v8778_v42  ;;  %7575 = vmatprep.subr.bf16.mxu0 (!%p7361_p9), %v9564_v26  ;;  %v8791_v42 = vld [vmem:[#allocation29 + $0x8] sm:$0xff] (!%p7361_p9)  }
 0x7e5   : > { %7561 = vmatprep.subr.bf16.mxu1 (!%p7361_p9), %v9564_v26 }
 0x7e7   : > { %7576 = vmatpush3.bf16.msra.mxu0 (!%p7361_p9), %v8786_v0 }
 0x7e8   : > { %7562 = vmatpush3.bf16.msra.mxu1 (!%p7361_p9), %v8780_v46  ;;  %7577 = vmatprep.subr.bf16.mxu0 (!%p7361_p9), %v9564_v26  ;;  %v8794_v46 = vld [vmem:[#allocation29 + $0x20] sm:$0xff] (!%p7361_p9)  }
 0x7e9   : > { %7587 = vmatprep.subr.mxu1 (!%p7361_p9), %v9564_v26 }
 0x7eb   : > { %7564 = vmatmul.mubr.bf16.vlgmr.msra.gmra.mrb[0].mxu1 (!%p7361_p9), %v5455_v50  ;;  %7578 = vmatpush3.bf16.msra.mxu0 (!%p7361_p9), %v8787_v1 }
 0x7ec   : > { %7589 = vmatprep.mubr.msk.f32.mxu1 (!%p7361_p9), %vm9565_vm1, %v9564_v26  ;;  %7579 = vmatprep.subr.bf16.mxu0 (!%p7361_p9), %v9564_v26 }
 0x7ef   : > { %7580 = vmatpush3.bf16.msra.mxu0 (!%p7361_p9), %v8788_v2 }
 0x7f0   : > { %7581 = vmatprep.subr.bf16.mxu0 (!%p7361_p9), %v9564_v26 }
 0x7f3   : > { %7582 = vmatpush3.bf16.msra.mxu0 (!%p7361_p9), %v8789_v3 }
 0x7f4   : > { %7627 = vmatprep.subr.bf16.mxu0 (!%p7361_p9), %v9564_v26 }
 0x7f6   : > { %7584 = vmatmul.mubr.bf16.vlgmr.msra.gmra.mrb[4].mxu0 (!%p7361_p9), %v5455_v50  ;;  %v8797_v50 = vld [vmem:[#allocation29 + $0x38] sm:$0xff] (!%p7361_p9)  }
 0x7f7   : > { %7643 = vmatprep.mubr.msk.bf16.mxu0 (!%p7361_p9), %vm9565_vm1, %v9564_v26 }
 0x89b   : > { %5446 = sbr.rel (%p7361_p9) target bundleno = 4081 (0xff1), region = 184 }
 0x89e   : > { %v5436_v30 = vpop.f32.mrb[16].mxu1 }
 0x89f   : > { %v5437_v13 = vadd.f32 %v7352_v21, %v5436_v30  ;;  %v7525_v22 = vpop.f32.mrb[17].mxu1 }
 0x8a0   : > { %v5439_v23 = vpop.f32.mrb[18].mxu1 }
 0x8a1   : > { %5442 = vst [vmem:[%s11062_s20] sm:$0xff] %v5437_v13  ;;  %v7526_v24 = vpop.f32.mrb[19].mxu1 }
 0x8a9   : > { %v5561_v55 = vpop.f32.mrb[0].mxu0 }
 0x8aa   : > { %v5562_v57 = vadd.f32 %v7362_v52, %v5561_v55  ;;  %v7545_v58 = vpop.f32.mrb[1].mxu0  ;;  %v8799_v52 = vld [vmem:[#allocation32 + $0x8] sm:$0xff]  }
 0x8ab   : > { %v5564_v60 = vpop.f32.mrb[2].mxu0  ;;  %v8801_v58 = vld [vmem:[#allocation32 + $0x18] sm:$0xff]  }
 0x8ac   : > { %v7546_v9 = vpop.f32.mrb[3].mxu0  ;;  %v8803_v60 = vld [vmem:[#allocation32 + $0x28] sm:$0xff]  }
 0x8ad   : > { %v8804_v9 = vld [vmem:[#allocation32 + $0x30] sm:$0xff]  }
 0x8be   : > { %v5672_v34 = vpop.f32.mrb[0].mxu1 }
 0x8bf   : > { %v5673_v53 = vadd.f32 %v7371_v51, %v5672_v34  ;;  %v7565_v54 = vpop.f32.mrb[1].mxu1  ;;  %v8798_v51 = vld [vmem:[#allocation32] sm:$0xff]   ;;  %v8800_v34 = vld [vmem:[#allocation32 + $0x10] sm:$0xff]  }
 0x8c0   : > { %v5675_v56 = vpop.f32.mrb[2].mxu1  ;;  %7628 = vmatpush3.bf16.msra.mxu0 %v8798_v51 }
 0x8c1   : > { %5954 = vrot.lane.b32.xlu1 %v5673_v53, %s9566_s13  ;;  %v7566_v59 = vpop.f32.mrb[3].mxu1  ;;  %7588 = vmatpush3.xpose.msk.msra.mxu1 %vm5789_vm3, %v5673_v53 }
 0x8c2   : > { %7592 = vmatprep.subr.mxu1 %v9564_v26  ;;  %7629 = vmatprep.subr.bf16.mxu0 %v9564_v26  ;;  %v8802_v59 = vld [vmem:[#allocation32 + $0x20] sm:$0xff]  }
 0x8c4   : > { %7590 = vmatmul.mubr.msk.f32.vlgmr.msra.gmra.mrb[4].mxu1 %vm5789_vm3, %v5562_v57  ;;  %7630 = vmatpush3.bf16.msra.mxu0 %v8799_v52 }
 0x8c5   : > { %5952 = vrot.lane.b32.xlu1 %v5562_v57, %s9566_s13  ;;  %7594 = vmatprep.mubr.msk.f32.mxu1 %vm9565_vm1, %v9564_v26 }
 0x8c6   : > { %7631 = vmatprep.subr.bf16.mxu0 %v9564_v26 }
 0x8c8   : > { %7632 = vmatpush3.bf16.msra.mxu0 %v8800_v34 }
 0x8c9   : > { %v5783_v12 = vpop.f32.mrb[4].mxu0  ;;  %7633 = vmatprep.subr.bf16.mxu0 %v9564_v26 }
 0x8ca   : > { %v7585_v14 = vpop.f32.mrb[5].mxu0  ;;  %v5784_v19 = vadd.f32 %v7380_v16, %v5783_v12 }
 0x8cb   : > { %v5786_v18 = vpop.f32.mrb[6].mxu0 }
 0x8cc   : > { %v7586_v5 = vpop.f32.mrb[7].mxu0  ;;  %7593 = vmatpush3.msra.mxu1 %v5784_v19  ;;  %7634 = vmatpush3.bf16.msra.mxu0 %v8801_v58 }
 0x8cd   : > { %7597 = vmatprep.subr.mxu1 %v9564_v26  ;;  %7635 = vmatprep.subr.bf16.mxu0 %v9564_v26 }
 0x8d0   : > { %7636 = vmatpush3.bf16.msra.mxu0 %v8802_v59 }
 0x8d1   : > { %7637 = vmatprep.subr.bf16.mxu0 %v9564_v26 }
 0x8d4   : > { %7638 = vmatpush3.bf16.msra.mxu0 %v8803_v60 }
 0x8d5   : > { %7639 = vmatprep.subr.bf16.mxu0 %v9564_v26 }
 0x8d8   : > { %7640 = vmatpush3.bf16.msra.mxu0 %v8804_v9 }
 0x8d9   : > { %7641 = vmatprep.subr.bf16.mxu0 %v9564_v26 }
 0x8dc   : > { %7642 = vmatpush3.bf16.msra.mxu0 %v8805_v61 }
 0x933   : > { %v5955_v30 = vpop.permute.xlu1 %5954 }
 0x937   : > { %v5953_v22 = vpop.permute.xlu1 %5952 }
 0x997   : > { %v5862_v4 = vpop.f32.mrb[4].mxu1 }
 0x998   : > { %v5866_v40 = vmul.f32 0.125, %v5862_v4  ;;  %v7591_v41 = vpop.f32.mrb[5].mxu1 }
 0x99a   : > { %v5868_v43 = vsel %vm5867_vm4, %v5866_v40, -inf }
 0x99b   : > { %5869 = vmax.xlane.f32.xlu0 %v5868_v43 }
 0xa28   : > { %v5870_v6 = vpop.xlane.xlu0 %5869 }
 0xa29   : > { %v5871_v7 = vsub.f32 %v5866_v40, %v5870_v6 }
 0xa2b   : > { %v5872_v8 = vmul.f32 1.442695, %v5871_v7 }
 0xa2d   : > { %8806 = vpow2.f32 %v5872_v8 }
 0xa37   : > { %v8807_v10 = vpop.eup %8806 }
 0xa38   : > { %v5874_v11 = vsel %vm5867_vm4, %v8807_v10, 0.0 }
 0xa39   : > { %5875 = vadd.xlane.f32.xlu0 %v5874_v11  ;;  %v6262_v11 = vld [vmem:[#allocation33] sm:$0x1] }
 0xac6   : > { %v5876_v20 = vpop.xlane.xlu0 %5875 }
 0xac7   : > { %8808 = vrcp.f32 %v5876_v20 }
 0xad1   : > { %v8809_v21 = vpop.eup %8808 }
 0xad2   : > { %v5878_v13 = vmul.f32 %v8809_v21, %v8807_v10 }
 0xad4   : > { %7595 = vmatmul.mubr.msk.f32.vlgmr.msra.gmra.mrb[6].mxu1 %vm5867_vm4, %v5878_v13 }
 0xad5   : > { %7598 = vmatpush3.xpose.msk.msra.mxu1 %vm5789_vm3, %v5955_v30  ;;  %7599 = vmatprep.mubr.msk.f32.mxu1 %vm9565_vm1, %v9564_v26 }
 0xad6   : > { %7602 = vmatprep.subr.mxu1 %v9564_v26 }
 0xad8   : > { %7600 = vmatmul.mubr.msk.f32.vlgmr.msra.gmra.mrb[8].mxu1 %vm5789_vm3, %v5953_v22 }
 0xad9   : > { %7604 = vmatprep.mubr.msk.f32.mxu1 %vm9565_vm1, %v9564_v26 }
 0xba7   : > { %v5948_v23 = vpop.f32.mrb[6].mxu1 }
 0xba8   : > { %v7596_v24 = vpop.f32.mrb[7].mxu1 }
 0xbab   : > { %v6026_v25 = vpop.f32.mrb[8].mxu1 }
 0xbac   : > { %v6030_v48 = vmul.f32 0.125, %v6026_v25  ;;  %v7601_v27 = vpop.f32.mrb[9].mxu1 }
 0xbae   : > { %v6031_v28 = vsel %vm5867_vm4, %v6030_v48, -inf }
 0xbaf   : > { %6032 = vmax.xlane.f32.xlu0 %v6031_v28 }
 0xbc5   : > { %6043 = vrot.lane.b32.xlu0 %v5784_v19, %s9566_s13 }
 0xc3c   : > { %v6033_v29 = vpop.xlane.xlu0 %6032 }
 0xc3d   : > { %v6034_v17 = vsub.f32 %v6030_v48, %v6033_v29 }
 0xc3f   : > { %v6035_v31 = vmul.f32 1.442695, %v6034_v17 }
 0xc40   : > { %v6044_v32 = vpop.permute.xlu0 %6043 }
 0xc41   : > { %8810 = vpow2.f32 %v6035_v31  ;;  %7603 = vmatpush3.msra.mxu1 %v6044_v32 }
 0xc42   : > { %7607 = vmatprep.subr.bf16.mxu1 %v9564_v26 }
 0xc4b   : > { %v8811_v33 = vpop.eup %8810 }
 0xc4c   : > { %v6037_v35 = vsel %vm5867_vm4, %v8811_v33, 0.0 }
 0xc4d   : > { %6038 = vadd.xlane.f32.xlu1 %v6037_v35 }
 0xcda   : > { %v6039_v36 = vpop.xlane.xlu1 %6038 }
 0xcdb   : > { %8812 = vrcp.f32 %v6039_v36 }
 0xce5   : > { %v8813_v37 = vpop.eup %8812 }
 0xce6   : > { %v6041_v38 = vmul.f32 %v8813_v37, %v8811_v33 }
 0xce8   : > { %7605 = vmatmul.mubr.msk.f32.vlgmr.msra.gmra.mrb[10].mxu1 %vm5867_vm4, %v6041_v38 }
 0xce9   : > { %7623 = vmatprep.mubr.msk.bf16.mxu1 %vm9565_vm1, %v9564_v26  ;;  %7608 = vmatpush3.bf16.msra.mxu1 %v8790_v39 }
 0xcea   : > { %7609 = vmatprep.subr.bf16.mxu1 %v9564_v26 }
 0xced   : > { %7610 = vmatpush3.bf16.msra.mxu1 %v8791_v42 }
 0xcee   : > { %7611 = vmatprep.subr.bf16.mxu1 %v9564_v26 }
 0xcf1   : > { %7612 = vmatpush3.bf16.msra.mxu1 %v8792_v44 }
 0xcf2   : > { %7613 = vmatprep.subr.bf16.mxu1 %v9564_v26 }
 0xcf5   : > { %7614 = vmatpush3.bf16.msra.mxu1 %v8793_v45 }
 0xcf6   : > { %7615 = vmatprep.subr.bf16.mxu1 %v9564_v26 }
 0xcf9   : > { %7616 = vmatpush3.bf16.msra.mxu1 %v8794_v46 }
 0xcfa   : > { %7617 = vmatprep.subr.bf16.mxu1 %v9564_v26 }
 0xcfd   : > { %7618 = vmatpush3.bf16.msra.mxu1 %v8795_v47 }
 0xcfe   : > { %7619 = vmatprep.subr.bf16.mxu1 %v9564_v26 }
 0xd01   : > { %7620 = vmatpush3.bf16.msra.mxu1 %v8796_v49 }
 0xd02   : > { %7621 = vmatprep.subr.bf16.mxu1 %v9564_v26 }
 0xd05   : > { %7622 = vmatpush3.bf16.msra.mxu1 %v8797_v50 }
 0xdbb   : > { %v6115_v53 = vpop.f32.mrb[10].mxu1 }
 0xdbc   : > { %6120 = vrot.lane.b32.xlu0 %v6115_v53, %s9566_s13  ;;  %v7606_v54 = vpop.f32.mrb[11].mxu1 }
 0xe2e   : > { %v6121_v55 = vpop.permute.xlu0 %6120 }
 0xe2f   : > { %v6123_v56 = vsel %vm5789_vm3, %v5948_v23, %v6121_v55 }
 0xe30   : > { %v6124_v57 = vpack.c.bf16 %v6123_v56, %v6123_v56 }
 0xe32   : > { %7624 = vmatmul.mubr.bf16.vlgmr.msra.gmra.mrb[12].mxu1 %v6124_v57 }
 0xf05   : > { %v6230_v62 = vpop.f32.mrb[12].mxu1 }
 0xf06   : > { %v6231_v63 = vadd.f32 %v7395_v15, %v6230_v62  ;;  %v7625_v0 = vpop.f32.mrb[13].mxu1 }
 0xf07   : > { %v6233_v1 = vpop.f32.mrb[14].mxu1 }
 0xf08   : > { %v6236_v2 = vrot.slane %v6231_v63, 4  ;;  %v7626_v3 = vpop.f32.mrb[15].mxu1 }
 0xf0a   : > { %v6237_v4 = vadd.f32 %v6236_v2, %v6231_v63 }
 0xf0c   : > { %v6238_v40 = vrot.slane %v6237_v4, 2 }
 0xf0e   : > { %v6239_v41 = vadd.f32 %v6238_v40, %v6237_v4 }
 0xf10   : > { %v6240_v43 = vrot.slane %v6239_v41, 1 }
 0xf12   : > { %v6241_v6 = vadd.f32 %v6240_v43, %v6239_v41 }
 0xf14   : > { %v6243_v7 = vmul.f32 0.125, %v6241_v6 }
 0xf16   : > { %v6244_v8 = vmax.f32 %v6243_v7, 0.0 }
 0xf18   : > { %v6245_v10 = vpack.c.bf16 %v6244_v8, %v6244_v8 }
 0xf1a   : > { %7644 = vmatmul.mubr.bf16.vlgmr.msra.gmra.mrb[8].mxu0 %v6245_v10 }
 0xfed   : > { %v6345_v26 = vpop.f32.mrb[8].mxu0 }
 0xfee   : > { %v6346_v12 = vadd.f32 %v6345_v26, %v6262_v11  ;;  %v7645_v14 = vpop.f32.mrb[9].mxu0 }
 0xfef   : > { %v6348_v16 = vpop.f32.mrb[10].mxu0 }
 0xff0   : > { %6351 = vst [vmem:[#allocation36] sm:$0x1] %v6346_v12  ;;  %v7646_v18 = vpop.f32.mrb[11].mxu0 }
 0xff1 PF: > { %s11363_s22 = sld [smem:[#allocation57_spill]]  ;;  %s7413_s4 = sshll.u32 %s9700_s29, 7 }
 0xff2   : > { %s11364_s28 = sld [smem:[#allocation76_spill]]  ;;  %s6366_s12 = sshll.u32 %s11062_s20, 4  ;;  %s6367_s12 = int_to_ptr.vmem [resolvable:$true] %s6366_s12 }
 0xff3   : > { %s6353_s6 = scalar_lea.sflag [#allocation5], %s10331_s21  ;;  %s9392_s23 = scalar_lea.vmem %s6367_s12, 128 }
 0xff4   : > { %p9393_p1 = scmp.ne.s32.totalorder %s6367_s12, %s9392_s23  ;;  %s9567_s30 = smov [#allocation35]  }
 0xff5   : > { %s9396_s26 = sshll.u32 %s9567_s30, 4  ;;  %s9397_s26 = int_to_ptr.vmem [resolvable:$false] %s9396_s26 }
 0xff6   : > { %s9398_s0 = scalar_lea.vmem %s9397_s26, 256  ;;  %p9399_p6 = scmp.lt.s32.totalorder %s6367_s12, %s9397_s26 }
 0xff7   : > { %p11365_p10 = scmp.ne.s32.totalorder %s11363_s22, 0  ;;  %p9400_p4 = scmp.lt.s32.totalorder %s9398_s0, %s9392_s23 }
 0xff8   : > { %s11148_s10 = scalar_lea.hbm %s11364_s28, %s7413_s4 }
 0xff9   : > { %p9394_p8 = pnand %p9393_p1, %p11365_p10  ;;  %p9401_p13 = por %p9400_p4, %p9399_p6 }
 0xffb   : > { %p9395_p7 = pneg %p9394_p8 }
 0xffd   : > { %p9402_p3 = pnand %p9401_p13, %p9395_p7 }
 0xfff   : > { %9405 = shalt.err (!%p9402_p3)
}
0x1000   : > { %s9406_s21 = scalar_lea.hbm %s11148_s10, 128  ;;  %s9410_s2 = scalar_lea.hbm %s11364_s28, 256 }
0x1001   : > { %p9407_p2 = scmp.ne.s32.totalorder %s11148_s10, %s9406_s21  ;;  %p9411_p11 = scmp.lt.u32.totalorder %s11148_s10, %s11364_s28 }
0x1002   : > { %p9412_p5 = scmp.lt.u32.totalorder %s9410_s2, %s9406_s21  ;;  %p9414_p1 = scmp.lt.u32.totalorder %s9406_s21, %s11148_s10 }
0x1003   : > { %p9408_p0 = pnand %p9407_p2, %p11365_p10 }
0x1004   : > { %p9413_p9 = por %p9412_p5, %p9411_p11 }
0x1005   : > { %p9409_p12 = pneg %p9408_p0 }
0x1006   : > { %p9415_p8 = por %p9414_p1, %p9413_p9 }
0x1008   : > { %p9416_p7 = pnand %p9415_p8, %p9409_p12 }
0x100a   : > { %9419 = shalt.err (!%p9416_p7)
}
0x100b   : > { %7765 = dma.vmem_to_hbm [thread:$0]  (%p11365_p10), %s6367_s12, 128, %s11148_s10, %s6353_s6  }
0x100c   : > { %s9568_s5 = smov [#allocation36]   ;;  %p11366_p4 = scmp.eq.s32.totalorder %s9700_s29, 1 }
0x100d   : > { %s6377_s20 = sshll.u32 %s9568_s5, 4  ;;  %s6378_s20 = int_to_ptr.vmem [resolvable:$true] %s6377_s20 }
0x100e   : > { %s9420_s13 = scalar_lea.vmem %s6378_s20, 16  ;;  %s9426_s4 = scalar_lea.vmem %s6378_s20, 32 }
0x100f   : > { %p9421_p6 = scmp.ne.s32.totalorder %s6378_s20, %s9420_s13  ;;  %p9427_p2 = scmp.lt.s32.totalorder %s6378_s20, %s6378_s20 }
0x1010   : > { %p9428_p0 = scmp.lt.s32.totalorder %s9426_s4, %s9420_s13 }
0x1011   : > { %p9422_p13 = pnand %p9421_p6, %p11366_p4 }
0x1012   : > { %p9429_p11 = por %p9428_p0, %p9427_p2 }
0x1013   : > { %p9423_p3 = pneg %p9422_p13 }
0x1015   : > { %p9430_p5 = pnand %p9429_p11, %p9423_p3 }
0x1017   : > { %9433 = shalt.err (!%p9430_p5)
}
0x1018   : > { %s11367_s22 = sld [smem:[#allocation77_spill]]  ;;  %p11368_p12 = pmov %p11366_p4 }
0x101e   : > { %s9434_s23 = scalar_lea.hbm %s11367_s22, 16 }
0x101f   : > { %p9435_p10 = scmp.ne.s32.totalorder %s11367_s22, %s9434_s23  ;;  %p9440_p8 = scmp.lt.u32.totalorder %s9434_s23, %s11367_s22 }
0x1021   : > { %p9436_p9 = pnand %p9435_p10, %p11368_p12 }
0x1023   : > { %p9437_p1 = pneg %p9436_p9 }
0x1025   : > { %p9442_p7 = pnand %p9440_p8, %p9437_p1 }
0x1027   : > { %9445 = shalt.err (!%p9442_p7)
}
0x1028   : > { %p11369_p6 = pmov %p11366_p4 }
0x102a   : > { %7767 = dma.vmem_to_hbm [thread:$0]  (%p11369_p6), %s6378_s20, 16, %s11367_s22, [#allocation37]  }
0x102b   : > { %9511 = dma.done.wait (%p11366_p4), [#allocation37], 16   ;;  %p11370_p13 = pmov %p11366_p4 }
0x102d   : > { %9513 = vsyncadd (%p11370_p13), [#allocation37], 4294967280 }
0x102e PF: > { %s11371_s21 = sld [smem:[#allocation52_spill]]  ;;  %s11372_s19 = sld [smem:[#allocation58_spill]] }
0x102f   : > { %p11374_p2 = scmp.ge.s32.totalorder %s9532_s27, 2 }
0x1034   : > { %s6393_s11 = sand.u32 1, %s11371_s21   ;;  %p11373_p3 = scmp.ne.s32.totalorder %s11372_s19, 0 }
0x1035   : > { %s6394_s2 = scalar_lea.sflag [#allocation5], %s6393_s11 }
0x1036   : > { %p7834_p0 = pnand %p11374_p2, %p11373_p3 }
0x1038   : > { %9515 = dma.done.wait (!%p7834_p0), %s6394_s2, 128  }
0x1039   : > { %9517 = vsyncadd (!%p7834_p0), %s6394_s2, 4294967168  ;;  %s11375_s27 = sld [smem:[#allocation55_spill]]  ;;  %s11376_s3 = sld [smem:[#allocation53_spill]] }
0x103a   : > { %s11377_s26 = sld [smem:[#allocation56_spill]]  ;;  %s11378_s2 = smov %s9524_s25 }
0x103f   : > { %p54_p11 = scmp.ge.s32.totalorder %s11375_s27, 4   ;;  %s11379_s25 = smov %s11376_s3 }
0x1041   :  { %56 = sbr.rel (!%p54_p11) target bundleno = 40 (0x28), region = 300 }
0x1048   :  { %6399 = vsyncpa [#allocation4], 1 }
0x1049   :  { %6401 = vsyncpa [#allocation4 + $0x1], 1 }
0x104a   :  { %6402 = vsyncpa [#allocation7], 1 }
0x104b   :  { %6404 = vsyncpa [#allocation7 + $0x1], 1 }
0x104c   :  { %6405 = vsyncpa [#allocation10], 1 }
0x104d   :  { %6407 = vsyncpa [#allocation10 + $0x1], 1 }
0x104e   :  { %6408 = vsyncpa [#allocation13], 1 }
0x104f   :  { %6410 = vsyncpa [#allocation13 + $0x1], 1 }
0x1050   :  { %6411 = vsyncpa [#allocation16], 1 }
0x1051   :  { %6413 = vsyncpa [#allocation16 + $0x1], 1 }
0x1052   :  { %6414 = vsyncpa [#allocation19], 1 }
0x1053   :  { %6416 = vsyncpa [#allocation19 + $0x1], 1 }
0x1054   :  { %6417 = vsyncpa [#allocation22], 1 }
0x1055   :  { %6418 = vsyncpa [#allocation25], 1 }
0x1056   :  { %6419 = vsyncpa [#allocation28], 1 }
0x1057   :  { %6420 = vsyncpa [#allocation31], 1 }
0x1058   :  { %6421 = vsyncpa [#allocation34], 1 }
0x1059   :  { %6422 = vsyncpa [#allocation5], 1 }
0x105a   :  { %6424 = vsyncpa [#allocation5 + $0x1], 1 }
0x105b   :  { %6425 = vsyncpa [#allocation37], 1 }

</bundles_post_ra>
